<compile_context>
chip_gen: v5e
topology: v5e:2x2
jax: 0.10.0
libtpu: 0.0.40
codegen_flags: <defaults>
</compile_context>

<pallas_src>
import functools

import numpy as np
import jax
import jax.numpy as jnp
from jax.experimental import pallas as pl
from jax.experimental.pallas import tpu as pltpu


# ----------------------------------------------------------------------------
# cfg (embedded; mirrors the block structure a darknet .cfg would produce)
# ----------------------------------------------------------------------------
CFG_TEXT = """
[net]
height=16
width=16
channels=3

[convolutional]
batch_normalize=1
filters=16
size=3
stride=1
pad=1
activation=leaky

[convolutional]
batch_normalize=1
filters=32
size=3
stride=2
pad=1
activation=leaky

[convolutional]
batch_normalize=1
filters=16
size=1
stride=1
pad=1
activation=leaky

[convolutional]
batch_normalize=1
filters=32
size=3
stride=1
pad=1
activation=leaky

[shortcut]
from=-3
activation=linear

[convolutional]
filters=18
size=1
stride=1
pad=1
activation=linear

[yolo]
mask=0,1,2
anchors=10,13, 16,30, 33,23, 30,61, 62,45, 59,119, 116,90, 156,198, 373,326
classes=1
num=9

[route]
layers=-3

[convolutional]
batch_normalize=1
filters=16
size=1
stride=1
pad=1
activation=leaky

[upsample]
stride=2

[route]
layers=-1,-10

[convolutional]
filters=18
size=1
stride=1
pad=1
activation=linear

[yolo]
mask=3,4,5
anchors=10,13, 16,30, 33,23, 30,61, 62,45, 59,119, 116,90, 156,198, 373,326
classes=1
num=9
"""

LANE = 128


def _tpu_vmem_capacity():
    """Per-TensorCore VMEM capacity; conservative (v7x = 64 MiB) fallback."""
    try:
        return int(pltpu.get_tpu_info().vmem_capacity_bytes)
    except Exception:
        return 64 * 1024 * 1024


_VMEM_CAP = _tpu_vmem_capacity()
VMEM_LIMIT = min((_VMEM_CAP * 3) // 4, 112 * 1024 * 1024)   # scoped-vmem limit
VMEM_BUDGET = VMEM_LIMIT // 2                               # per-step tile budget (headroom)


def parse_cfg_string(text):
    """Same semantics as parseCfg, but on an in-memory string (no file I/O)."""
    lines = [l for l in text.split("\n") if len(l) > 0]
    lines = [l for l in lines if l[0] != "#"]
    lines = [l.rstrip().lstrip() for l in lines]
    block, blocks = {}, []
    for line in lines:
        if line[0] == "[":
            if len(block) != 0:
                blocks.append(block)
                block = {}
            block["type"] = line[1:-1].rstrip()
        else:
            key, value = line.split("=")
            block[key.rstrip()] = value.lstrip()
    blocks.append(block)
    return blocks


def _round_up(n, m):
    return ((n + m - 1) // m) * m


def _pick_tm(M, per_row_bytes, fixed_bytes, budget, prefer_multi=False):
    """Largest M-tile that fits the VMEM budget; optionally force MT >= 2 (v7x megacore)."""
    cands = sorted({t for t in range(8, M + 1, 8) if M % t == 0} | {M}, reverse=True)

    def fits(t):
        # double-buffered streaming rows (in + out) + resident weights/constants
        return fixed_bytes + 2 * per_row_bytes * t <= budget

    fitting = [t for t in cands if fits(t)] or [cands[-1]]
    if prefer_multi:
        multi = [t for t in fitting if M // t >= 2]
        if multi:
            return multi[0]
    return fitting[0]


# ----------------------------------------------------------------------------
# Pallas kernels
# ----------------------------------------------------------------------------
def conv_fused_kernel(p_ref, w_ref, a_ref, b_ref, *rest, use_bn, leaky, has_residual):
    """Conv-as-matmul + (full-M tile) train-mode BN + affine + leaky (+ fused residual)."""
    if has_residual:
        res_ref, o_ref = rest
    else:
        (o_ref,) = rest
    y = jnp.dot(p_ref[...], w_ref[...], preferred_element_type=jnp.float32)
    if use_bn:
        mean = jnp.mean(y, axis=0, keepdims=True)
        centered = y - mean
        var = jnp.mean(centered * centered, axis=0, keepdims=True)
        y = centered * jax.lax.rsqrt(var + 1e-5)
    y = y * a_ref[...] + b_ref[...]
    if leaky:
        y = jnp.maximum(y, 0.1 * y)
    if has_residual:
        y = y + res_ref[...].astype(jnp.float32)
    o_ref[...] = y.astype(o_ref.dtype)


def matmul_stats_kernel(p_ref, w_ref, y_ref, sum_ref, ssq_ref):
    """Two-phase BN fallback, phase 1: matmul tile (bf16 out) + resident sum/sumsq accumulators."""
    y = jnp.dot(p_ref[...], w_ref[...], preferred_element_type=jnp.float32)
    y_ref[...] = y.astype(y_ref.dtype)

    @pl.when(pl.program_id(0) == 0)
    def _():
        sum_ref[...] = jnp.zeros_like(sum_ref)
        ssq_ref[...] = jnp.zeros_like(ssq_ref)

    sum_ref[...] += jnp.sum(y, axis=0, keepdims=True)
    ssq_ref[...] += jnp.sum(y * y, axis=0, keepdims=True)


def scale_act_kernel(y_ref, sc_ref, sh_ref, *rest, leaky, has_residual):
    """Two-phase BN fallback, phase 2: y * scale' + shift' (+ leaky, + residual)."""
    if has_residual:
        res_ref, o_ref = rest
    else:
        (o_ref,) = rest
    y = y_ref[...].astype(jnp.float32) * sc_ref[...] + sh_ref[...]
    if leaky:
        y = jnp.maximum(y, 0.1 * y)
    if has_residual:
        y = y + res_ref[...].astype(jnp.float32)
    o_ref[...] = y.astype(o_ref.dtype)


def head_yolo_kernel(x_ref, w_ref, c_ref, o_ref, *, G, GG):
    """Fused detection head: 1x1 conv + bias + YOLO transform, lane-dense output.

    Constant pack c_ref rows: 0=bias, 1=exp-mask, 2=scale, 3=is_x, 4=is_y.
    """
    y = jnp.dot(x_ref[...], w_ref[...], preferred_element_type=jnp.float32)
    c = c_ref[...]
    bias, expm, scale, isx, isy = c[0:1], c[1:2], c[2:3], c[3:4], c[4:5]
    y = y + bias
    # single exp; sigmoid derived as 1 - 1/(1+e) (overflow-safe: e=inf -> sig=1)
    e = jnp.exp(y)
    sig = 1.0 - pl.reciprocal(1.0 + e, approx=True)
    t = jnp.where(expm != 0.0, e, sig)
    # grid-cell offsets generated in-kernel (float math is exact for these sizes)
    tm = y.shape[0]
    rows = (pl.program_id(0) * tm
            + jax.lax.broadcasted_iota(jnp.int32, y.shape, 0)).astype(jnp.float32)
    cell = rows - jnp.floor(rows / GG) * GG
    gy = jnp.floor(cell / G)
    gx = cell - gy * G
    t = t + gx * isx + gy * isy
    o_ref[...] = t * scale


def upsample_kernel(ah_ref, x_ref, bw_ref, o_ref):
    """Separable bilinear 2x upsample (align_corners=True) as two lane-dense matmuls."""
    t = jnp.dot(ah_ref[...], x_ref[...], preferred_element_type=jnp.float32)
    o = jnp.dot(t.astype(jnp.bfloat16), bw_ref[...], preferred_element_type=jnp.float32)
    o_ref[...] = o.astype(o_ref.dtype)


def add_kernel(a_ref, b_ref, o_ref):
    o_ref[...] = (a_ref[...].astype(jnp.float32) + b_ref[...].astype(jnp.float32)).astype(o_ref.dtype)


# ----------------------------------------------------------------------------
# layer wrappers (glue + pallas_call)
# ----------------------------------------------------------------------------
def _im2col_nhwc(x, k, stride, pad):
    """x: (B, H, W, C) -> (B*Ho*Wo, k*k*C), column order [kh, kw, c]; no transposes."""
    B, H, W, C = x.shape
    if k == 1 and stride == 1 and pad == 0:
        return x.reshape(B * H * W, C), H, W
    if pad:
        x = jnp.pad(x, ((0, 0), (pad, pad), (pad, pad), (0, 0)))
    Hp, Wp = H + 2 * pad, W + 2 * pad
    Ho = (Hp - k) // stride + 1
    Wo = (Wp - k) // stride + 1
    cols = []
    for dy in range(k):
        for dx in range(k):
            cols.append(x[:, dy:dy + stride * Ho:stride, dx:dx + stride * Wo:stride, :])
    p = jnp.concatenate(cols, axis=-1)              # (B, Ho, Wo, k*k*C)
    return p.reshape(B * Ho * Wo, k * k * C), Ho, Wo


def conv_block(x, p, k, stride, pad, use_bn, leaky, residual=None):
    """NHWC conv + (train-mode) BN + LeakyReLU, optional fused residual add. bf16 in/out."""
    B = x.shape[0]
    # cast before im2col so the k*k-expanded patches are bf16 (halves that HBM traffic)
    patches, Ho, Wo = _im2col_nhwc(x.astype(jnp.bfloat16), k, stride, pad)
    M, K = patches.shape
    npad, cout = p["npad"], p["cout"]
    w2d, scale, shift = p["w2d"], p["scale_p"], p["shift_p"]
    has_res = residual is not None

    row_bytes = K * 2 + npad * 2 + (npad * 2 if has_res else 0)      # bf16 rows streamed
    fixed = K * npad * 2 + 4 * npad * 4                              # weights + consts
    # BN wants the whole M in one tile (single-pass batch stats); non-BN prefers MT>=2 (v7x).
    TM = _pick_tm(M, row_bytes, fixed, VMEM_BUDGET, prefer_multi=(not use_bn))
    MT = M // TM
    const1 = pl.BlockSpec((1, npad), lambda m: (0, 0))

    if has_res:
        res2d = jnp.pad(residual.reshape(M, cout), ((0, 0), (0, npad - cout))).astype(jnp.bfloat16)
        res_spec = pl.BlockSpec((TM, npad), lambda m: (m, 0))

    cp_par = pltpu.CompilerParams(dimension_semantics=("parallel",),
                                  vmem_limit_bytes=VMEM_LIMIT)
    cp_arb = pltpu.CompilerParams(dimension_semantics=("arbitrary",),
                                  vmem_limit_bytes=VMEM_LIMIT)

    if (not use_bn) or TM == M:
        kern = functools.partial(conv_fused_kernel, use_bn=use_bn, leaky=leaky,
                                 has_residual=has_res)
        in_specs = [pl.BlockSpec((TM, K), lambda m: (m, 0)),
                    pl.BlockSpec((K, npad), lambda m: (0, 0)),
                    const1, const1]
        args = [patches, w2d, scale, shift]
        if has_res:
            in_specs.append(res_spec)
            args.append(res2d)
        y = pl.pallas_call(
            kern,
            out_shape=jax.ShapeDtypeStruct((M, npad), jnp.bfloat16),
            grid=(MT,),
            in_specs=in_specs,
            out_specs=pl.BlockSpec((TM, npad), lambda m: (m, 0)),
            compiler_params=cp_arb if use_bn else cp_par,
        )(*args)
    else:
        # Fallback for M too large for one tile: phase 1 matmul + resident stats (bf16 y).
        y_raw, s, ss = pl.pallas_call(
            matmul_stats_kernel,
            out_shape=(jax.ShapeDtypeStruct((M, npad), jnp.bfloat16),
                       jax.ShapeDtypeStruct((1, npad), jnp.float32),
                       jax.ShapeDtypeStruct((1, npad), jnp.float32)),
            grid=(MT,),
            in_specs=[pl.BlockSpec((TM, K), lambda m: (m, 0)),
                      pl.BlockSpec((K, npad), lambda m: (0, 0))],
            out_specs=(pl.BlockSpec((TM, npad), lambda m: (m, 0)), const1, const1),
            compiler_params=cp_arb,
        )(patches, w2d)
        # Fold batch stats into scale'/shift' once (tiny XLA elementwise on (1, npad)).
        inv_m = 1.0 / M
        mean = s * inv_m
        var = jnp.maximum(ss * inv_m - mean * mean, 0.0)
        sc = scale * jax.lax.rsqrt(var + 1e-5)
        sh = shift - mean * sc
        kern = functools.partial(scale_act_kernel, leaky=leaky, has_residual=has_res)
        in_specs = [pl.BlockSpec((TM, npad), lambda m: (m, 0)), const1, const1]
        args = [y_raw, sc, sh]
        if has_res:
            in_specs.append(res_spec)
            args.append(res2d)
        y = pl.pallas_call(
            kern,
            out_shape=jax.ShapeDtypeStruct((M, npad), jnp.bfloat16),
            grid=(MT,),
            in_specs=in_specs,
            out_specs=pl.BlockSpec((TM, npad), lambda m: (m, 0)),
            compiler_params=cp_par,
        )(*args)

    return y[:, :cout].reshape(B, Ho, Wo, cout)


def head_yolo_block(x, conv_p, yolo_p, inp_dim, num_classes):
    """Fused 1x1 linear conv + YOLO detection transform. x: (B, G, G, Cin) NHWC bf16."""
    B, G, G2, Cin = x.shape
    assert G == G2
    stride = inp_dim // G
    anchors = yolo_p["anchors"]
    na = len(anchors)
    bbox = 5 + num_classes
    npad, cout = conv_p["npad"], conv_p["cout"]
    assert cout == na * bbox
    M = B * G * G

    cells = x.reshape(M, Cin).astype(jnp.bfloat16)
    w2d = conv_p["w2d"]

    # per-channel constants packed into one (8, npad) block: [bias, expm, scale, isx, isy, 0, 0, 0]
    attr = np.arange(npad) % bbox
    valid = np.arange(npad) < cout
    rows_np = np.zeros((7, npad), np.float32)
    rows_np[0] = (((attr == 2) | (attr == 3)) & valid).astype(np.float32)   # exp mask (w, h)
    scale = np.zeros(npad, np.float32)
    for a_i, (aw, ah) in enumerate(anchors):
        base = a_i * bbox
        scale[base + 0] = stride
        scale[base + 1] = stride
        scale[base + 2] = float(aw)
        scale[base + 3] = float(ah)
        scale[base + 4:base + bbox] = 1.0
    rows_np[1] = scale
    rows_np[2] = ((attr == 0) & valid).astype(np.float32)                   # is_x
    rows_np[3] = ((attr == 1) & valid).astype(np.float32)                   # is_y
    consts = jnp.concatenate([conv_p["shift_p"], jnp.asarray(rows_np)], axis=0)   # (8, npad)

    row_bytes = Cin * 2 + npad * 4
    fixed = Cin * npad * 2 + 8 * npad * 4
    TM = _pick_tm(M, row_bytes, fixed, VMEM_BUDGET, prefer_multi=True)
    MT = M // TM

    kern = functools.partial(head_yolo_kernel, G=G, GG=G * G)
    out = pl.pallas_call(
        kern,
        out_shape=jax.ShapeDtypeStruct((M, npad), jnp.float32),
        grid=(MT,),
        in_specs=[pl.BlockSpec((TM, Cin), lambda m: (m, 0)),
                  pl.BlockSpec((Cin, npad), lambda m: (0, 0)),
                  pl.BlockSpec((8, npad), lambda m: (0, 0))],
        out_specs=pl.BlockSpec((TM, npad), lambda m: (m, 0)),
        compiler_params=pltpu.CompilerParams(dimension_semantics=("parallel",),
                                             vmem_limit_bytes=VMEM_LIMIT),
    )(cells, w2d, consts)

    return out[:, :cout].reshape(B, G * G * na, bbox)


def _interp_matrix(n_out, n_in):
    """align_corners=True bilinear interpolation matrix (n_out, n_in)."""
    A = np.zeros((n_out, n_in), np.float32)
    if n_in == 1:
        A[:, 0] = 1.0
        return A
    scale = (n_in - 1) / (n_out - 1)
    for i in range(n_out):
        s = i * scale
        i0 = int(np.floor(s))
        i1 = min(i0 + 1, n_in - 1)
        f = s - i0
        A[i, i0] += 1.0 - f
        A[i, i1] += f
    return A


def upsample2x(x):
    """NHWC bilinear 2x upsample (align_corners=True); per-batch grid, lane-dense matmuls."""
    B, H, W, C = x.shape
    Ho, Wo = 2 * H, 2 * W
    Ah = _interp_matrix(Ho, H)                                   # (Ho, H)
    Aw = _interp_matrix(Wo, W)                                   # (Wo, W)
    Bwc = np.kron(Aw.T, np.eye(C, dtype=np.float32))             # (W*C, Wo*C)
    # TODO(synk): at real resolutions/channel counts replace kron(Aw.T, I_C) with a
    # lane-dense 2-tap stencil (pltpu.roll) to avoid the C^2 weight blowup.

    x_flat = x.reshape(B * H, W * C).astype(jnp.bfloat16)
    out = pl.pallas_call(
        upsample_kernel,
        out_shape=jax.ShapeDtypeStruct((B * Ho, Wo * C), jnp.bfloat16),
        grid=(B,),
        in_specs=[pl.BlockSpec((Ho, H), lambda b: (0, 0)),
                  pl.BlockSpec((H, W * C), lambda b: (b, 0)),
                  pl.BlockSpec((W * C, Wo * C), lambda b: (0, 0))],
        out_specs=pl.BlockSpec((Ho, Wo * C), lambda b: (b, 0)),
        compiler_params=pltpu.CompilerParams(dimension_semantics=("parallel",),
                                             vmem_limit_bytes=VMEM_LIMIT),
    )(jnp.asarray(Ah, jnp.bfloat16), x_flat, jnp.asarray(Bwc, jnp.bfloat16))
    return out.reshape(B, Ho, Wo, C)


def shortcut_add(a, b):
    """Lane-dense residual add (fallback path; normally fused into the conv epilogue)."""
    B, H, W, C = a.shape
    ar = a.reshape(B * H, W * C)
    br = b.reshape(B * H, W * C)
    out = pl.pallas_call(
        add_kernel,
        out_shape=jax.ShapeDtypeStruct(ar.shape, jnp.bfloat16),
        grid=(1,),
        in_specs=[pl.BlockSpec(ar.shape, lambda i: (0, 0)),
                  pl.BlockSpec(ar.shape, lambda i: (0, 0))],
        out_specs=pl.BlockSpec(ar.shape, lambda i: (0, 0)),
        compiler_params=pltpu.CompilerParams(vmem_limit_bytes=VMEM_LIMIT),
    )(ar, br)
    return out.reshape(B, H, W, C)


def predict_transform_xla(x_nhwc, inp_dim, anchors, num_classes):
    # TODO(synk): non-fused YOLO path (never taken with the embedded cfg) falls back to XLA.
    B, G, _, _ = x_nhwc.shape
    stride = inp_dim // G
    na = len(anchors)
    bbox = 5 + num_classes
    p = x_nhwc.astype(jnp.float32).reshape(B, G * G, na, bbox)
    gx = jnp.tile(jnp.arange(G, dtype=jnp.float32), G).reshape(1, G * G, 1)
    gy = jnp.repeat(jnp.arange(G, dtype=jnp.float32), G).reshape(1, G * G, 1)
    off = jnp.concatenate([gx, gy], axis=-1).reshape(1, G * G, 1, 2)
    anc = jnp.asarray(np.asarray(anchors, np.float32)).reshape(1, 1, na, 2)
    xy = (jax.nn.sigmoid(p[..., 0:2]) + off) * stride
    wh = jnp.exp(p[..., 2:4]) * anc
    rest = jax.nn.sigmoid(p[..., 4:])
    return jnp.concatenate([xy, wh, rest], axis=-1).reshape(B, G * G * na, bbox)


# ----------------------------------------------------------------------------
# parameter construction (mirrors createModules bookkeeping) & forward
# ----------------------------------------------------------------------------
def build_params(blocks, key):
    prev_filters = 3
    filters = prev_filters
    output_filters = []
    params = {}
    for i, m in enumerate(blocks[1:]):
        if m["type"] == "convolutional":
            bn = int(m.get("batch_normalize", 0))
            filters = int(m["filters"])
            k = int(m["size"])
            key, kw, kb = jax.random.split(key, 3)
            w = 0.1 * jax.random.normal(kw, (filters, prev_filters, k, k), jnp.float32)
            npad = _round_up(filters, LANE)
            # (Cout, Cin, kh, kw) -> (kh, kw, Cin, Cout) -> (k*k*Cin, Npad), bf16, precomputed
            w2d = jnp.transpose(w, (2, 3, 1, 0)).reshape(k * k * prev_filters, filters)
            w2d = jnp.pad(w2d, ((0, 0), (0, npad - filters))).astype(jnp.bfloat16)
            p = {"w2d": w2d, "cout": filters, "cin": prev_filters, "npad": npad}
            if bn:  # PyTorch BN default init: gamma=1, beta=0 (train-mode batch stats)
                p["scale_p"] = jnp.pad(jnp.ones((1, filters), jnp.float32),
                                       ((0, 0), (0, npad - filters)))
                p["shift_p"] = jnp.zeros((1, npad), jnp.float32)
            else:
                b = 0.1 * jax.random.normal(kb, (filters,), jnp.float32)
                p["scale_p"] = jnp.pad(jnp.ones((1, filters), jnp.float32),
                                       ((0, 0), (0, npad - filters)))
                p["shift_p"] = jnp.pad(b.reshape(1, filters), ((0, 0), (0, npad - filters)))
            params[i] = p
        elif m["type"] == "route":
            ls = [int(a) for a in m["layers"].split(",")]
            start = ls[0]
            end = ls[1] if len(ls) > 1 else 0
            if start > 0:
                start -= i
            if end > 0:
                end -= i
            if end < 0:
                filters = output_filters[i + start] + output_filters[i + end]
            else:
                filters = output_filters[i + start]
        elif m["type"] == "yolo":
            mask = [int(y) for y in m["mask"].split(",")]
            anchors = [int(y) for y in m["anchors"].split(",")]
            anchors = [(anchors[j], anchors[j + 1]) for j in range(0, len(anchors), 2)]
            params[i] = {"anchors": [anchors[j] for j in mask]}
        # upsample / shortcut: filters unchanged (same as createModules)
        prev_filters = filters
        output_filters.append(filters)
    return params


def _route_layer_indices(m, i):
    ls = [int(a) for a in m["layers"].split(",")]
    out = []
    for l in ls:
        if l > 0:
            l = l - i
        out.append(i + l)
    return out


def _build_consumers(modules):
    """For each module index j, the set of module indices that read outputs[j]."""
    cons = {j: set() for j in range(len(modules))}
    for j, m in enumerate(modules):
        t = m["type"]
        if t in ("convolutional", "upsample", "yolo"):
            if j > 0:
                cons[j - 1].add(j)
        elif t == "shortcut":
            cons[j - 1].add(j)
            cons[j + int(m["from"])].add(j)
        elif t == "route":
            for l in _route_layer_indices(m, j):
                cons[l].add(j)
    return cons


def darknet_forward(blocks, params, x_nchw):
    net_info = blocks[0]
    modules = blocks[1:]
    consumers = _build_consumers(modules)

    # NCHW -> NHWC once at entry; activations kept bf16 between layers
    x = jnp.transpose(x_nchw, (0, 2, 3, 1)).astype(jnp.bfloat16)
    outputs = {}
    detections = None
    skip = set()

    for i, m in enumerate(modules):
        if i in skip:             # module fused into its producer; result already in x
            outputs[i] = x
            continue
        t = m["type"]
        if t == "convolutional":
            k = int(m["size"])
            stride = int(m["stride"])
            pad = (k - 1) // 2 if int(m["pad"]) else 0
            use_bn = bool(int(m.get("batch_normalize", 0)))
            leaky = m["activation"] == "leaky"
            nxt = modules[i + 1] if i + 1 < len(modules) else None
            fusable = nxt is not None and consumers.get(i, set()) <= {i + 1}
            if (fusable and nxt["type"] == "yolo" and not use_bn and not leaky
                    and k == 1 and stride == 1):
                # fused detection head: 1x1 conv + YOLO transform in one kernel
                x = head_yolo_block(x, params[i], params[i + 1],
                                    int(net_info["height"]), int(nxt["classes"]))
                detections = x if detections is None else jnp.concatenate((detections, x), axis=1)
                skip.add(i + 1)
            elif (fusable and nxt["type"] == "shortcut"
                  and nxt.get("activation", "linear") == "linear"):
                # fuse the residual add into this conv's epilogue
                res = outputs[i + 1 + int(nxt["from"])]
                x = conv_block(x, params[i], k, stride, pad, use_bn, leaky, residual=res)
                skip.add(i + 1)
            else:
                x = conv_block(x, params[i], k, stride, pad, use_bn, leaky)
        elif t == "upsample":
            x = upsample2x(x)
        elif t == "route":
            idxs = _route_layer_indices(m, i)
            if len(idxs) == 1:
                x = outputs[idxs[0]]
            else:
                x = jnp.concatenate([outputs[j] for j in idxs], axis=-1)  # channel concat (NHWC)
        elif t == "shortcut":
            x = shortcut_add(outputs[i - 1], outputs[i + int(m["from"])])
        elif t == "yolo":
            anchors = params[i]["anchors"]
            x = predict_transform_xla(x, int(net_info["height"]), anchors, int(m["classes"]))
            detections = x if detections is None else jnp.concatenate((detections, x), axis=1)
        outputs[i] = x
    return detections


# ----------------------------------------------------------------------------
if __name__ == "__main__":
    blocks = parse_cfg_string(CFG_TEXT)
    key = jax.random.PRNGKey(0)
    key, pk, xk = jax.random.split(key, 3)
    params = build_params(blocks, pk)

    x = jax.random.normal(xk, (2, 3, 16, 16), jnp.float32)  # NCHW, matches net height/width=16

    forward = jax.jit(functools.partial(darknet_forward, blocks, params))
    detections = forward(x)
    detections = jax.block_until_ready(detections)

    expected = (2, 8 * 8 * 3 + 16 * 16 * 3, 6)  # (B, 960, 5+classes)
    assert detections.shape == expected, detections.shape
    assert bool(jnp.all(jnp.isfinite(detections)))
    print("KERNEL_OK")
</pallas_src>

<mosaic_0001>
module attributes {stable_mosaic.version = 11 : i64} {
  func.func @conv_fused_kernel(%arg0: i32, %arg1: memref<512x27xbf16, #tpu.memory_space<vmem>>, %arg2: memref<27x128xbf16, #tpu.memory_space<vmem>>, %arg3: memref<1x128xf32, #tpu.memory_space<vmem>>, %arg4: memref<1x128xf32, #tpu.memory_space<vmem>>, %arg5: memref<512x128xbf16, #tpu.memory_space<vmem>>) attributes {dimension_semantics = [#tpu.dimension_semantics<arbitrary>], iteration_bounds = array<i64: 1>, scalar_prefetch = 0 : i64, scratch_operands = 0 : i64, tpu.core_type = #tpu.core_type<tc>, window_params = [{transform_indices = @transform_0, window_bounds = array<i64: 512, 27>}, {pipeline_mode = #tpu.pipeline_mode<synchronous>, transform_indices = @transform_1, window_bounds = array<i64: 27, 128>}, {pipeline_mode = #tpu.pipeline_mode<synchronous>, transform_indices = @transform_2, window_bounds = array<i64: 1, 128>}, {pipeline_mode = #tpu.pipeline_mode<synchronous>, transform_indices = @transform_3, window_bounds = array<i64: 1, 128>}, {transform_indices = @transform_4, window_bounds = array<i64: 512, 128>}]} {
    %c0 = arith.constant 0 : index
    %c0_0 = arith.constant 0 : index
    %0 = vector.load %arg1[%c0, %c0_0] : memref<512x27xbf16, #tpu.memory_space<vmem>>, vector<512x27xbf16>
    %c0_1 = arith.constant 0 : index
    %c0_2 = arith.constant 0 : index
    %1 = vector.load %arg2[%c0_1, %c0_2] : memref<27x128xbf16, #tpu.memory_space<vmem>>, vector<27x128xbf16>
    %cst = arith.constant dense<0.000000e+00> : vector<512x128xf32>
    %2 = tpu.matmul %0, %1, %cst {dimension_numbers = #tpu.dot_dimension_numbers<[1], [0], [0], [1], [0, 0, 1, 1], [], []>} : vector<512x27xbf16>, vector<27x128xbf16>, vector<512x128xf32> -> vector<512x128xf32>
    %cst_3 = arith.constant dense<0.000000e+00> : vector<128xf32>
    %3 = vector.multi_reduction <add>, %2, %cst_3 [0] : vector<512x128xf32> to vector<128xf32>
    %4 = vector.shape_cast %3 : vector<128xf32> to vector<1x128xf32>
    %cst_4 = arith.constant 5.120000e+02 : f32
    %5 = vector.broadcast %cst_4 : f32 to vector<1x128xf32>
    %6 = arith.divf %4, %5 : vector<1x128xf32>
    %7 = vector.broadcast %6 : vector<1x128xf32> to vector<512x128xf32>
    %8 = arith.subf %2, %7 : vector<512x128xf32>
    %9 = arith.mulf %8, %8 : vector<512x128xf32>
    %cst_5 = arith.constant dense<0.000000e+00> : vector<128xf32>
    %10 = vector.multi_reduction <add>, %9, %cst_5 [0] : vector<512x128xf32> to vector<128xf32>
    %11 = vector.shape_cast %10 : vector<128xf32> to vector<1x128xf32>
    %cst_6 = arith.constant 5.120000e+02 : f32
    %12 = vector.broadcast %cst_6 : f32 to vector<1x128xf32>
    %13 = arith.divf %11, %12 : vector<1x128xf32>
    %cst_7 = arith.constant 9.99999974E-6 : f32
    %14 = vector.broadcast %cst_7 : f32 to vector<1x128xf32>
    %15 = arith.addf %13, %14 : vector<1x128xf32>
    %16 = math.rsqrt %15 : vector<1x128xf32>
    %17 = vector.broadcast %16 : vector<1x128xf32> to vector<512x128xf32>
    %18 = arith.mulf %8, %17 : vector<512x128xf32>
    %c0_8 = arith.constant 0 : index
    %c0_9 = arith.constant 0 : index
    %19 = vector.load %arg3[%c0_8, %c0_9] : memref<1x128xf32, #tpu.memory_space<vmem>>, vector<1x128xf32>
    %20 = vector.broadcast %19 : vector<1x128xf32> to vector<512x128xf32>
    %21 = arith.mulf %18, %20 : vector<512x128xf32>
    %c0_10 = arith.constant 0 : index
    %c0_11 = arith.constant 0 : index
    %22 = vector.load %arg4[%c0_10, %c0_11] : memref<1x128xf32, #tpu.memory_space<vmem>>, vector<1x128xf32>
    %23 = vector.broadcast %22 : vector<1x128xf32> to vector<512x128xf32>
    %24 = arith.addf %21, %23 : vector<512x128xf32>
    %cst_12 = arith.constant 1.000000e-01 : f32
    %25 = vector.broadcast %cst_12 : f32 to vector<512x128xf32>
    %26 = arith.mulf %25, %24 : vector<512x128xf32>
    %27 = arith.maximumf %24, %26 : vector<512x128xf32>
    %28 = arith.truncf %27 : vector<512x128xf32> to vector<512x128xbf16>
    %c0_13 = arith.constant 0 : index
    %c0_14 = arith.constant 0 : index
    %29 = vector.load %arg5[%c0_13, %c0_14] : memref<512x128xbf16, #tpu.memory_space<vmem>>, vector<512x128xbf16>
    tpu.vector_store %arg5[%c0_13, %c0_14], %28 {strides = array<i32>} : memref<512x128xbf16, #tpu.memory_space<vmem>>, vector<512x128xbf16>,
    return
  }
  func.func @transform_0(%arg0: i32) -> (i32, i32) {
    %c0_i32 = arith.constant 0 : i32
    %c0_i32_0 = arith.constant 0 : i32
    return %arg0, %c0_i32 : i32, i32
  }
  func.func @transform_1(%arg0: i32) -> (i32, i32) {
    %c0_i32 = arith.constant 0 : i32
    %c0_i32_0 = arith.constant 0 : i32
    %c0_i32_1 = arith.constant 0 : i32
    return %c0_i32, %c0_i32_0 : i32, i32
  }
  func.func @transform_2(%arg0: i32) -> (i32, i32) {
    %c0_i32 = arith.constant 0 : i32
    %c0_i32_0 = arith.constant 0 : i32
    %c0_i32_1 = arith.constant 0 : i32
    return %c0_i32, %c0_i32_0 : i32, i32
  }
  func.func @transform_3(%arg0: i32) -> (i32, i32) {
    %c0_i32 = arith.constant 0 : i32
    %c0_i32_0 = arith.constant 0 : i32
    %c0_i32_1 = arith.constant 0 : i32
    return %c0_i32, %c0_i32_0 : i32, i32
  }
  func.func @transform_4(%arg0: i32) -> (i32, i32) {
    %c0_i32 = arith.constant 0 : i32
    %c0_i32_0 = arith.constant 0 : i32
    return %arg0, %c0_i32 : i32, i32
  }
}

module attributes {stable_mosaic.version = 11 : i64} {
  func.func @conv_fused_kernel(%arg0: i32, %arg1: memref<128x144xbf16, #tpu.memory_space<vmem>>, %arg2: memref<144x128xbf16, #tpu.memory_space<vmem>>, %arg3: memref<1x128xf32, #tpu.memory_space<vmem>>, %arg4: memref<1x128xf32, #tpu.memory_space<vmem>>, %arg5: memref<128x128xbf16, #tpu.memory_space<vmem>>) attributes {dimension_semantics = [#tpu.dimension_semantics<arbitrary>], iteration_bounds = array<i64: 1>, scalar_prefetch = 0 : i64, scratch_operands = 0 : i64, tpu.core_type = #tpu.core_type<tc>, window_params = [{transform_indices = @transform_0, window_bounds = array<i64: 128, 144>}, {pipeline_mode = #tpu.pipeline_mode<synchronous>, transform_indices = @transform_1, window_bounds = array<i64: 144, 128>}, {pipeline_mode = #tpu.pipeline_mode<synchronous>, transform_indices = @transform_2, window_bounds = array<i64: 1, 128>}, {pipeline_mode = #tpu.pipeline_mode<synchronous>, transform_indices = @transform_3, window_bounds = array<i64: 1, 128>}, {transform_indices = @transform_4, window_bounds = array<i64: 128, 128>}]} {
    %c0 = arith.constant 0 : index
    %c0_0 = arith.constant 0 : index
    %0 = vector.load %arg1[%c0, %c0_0] : memref<128x144xbf16, #tpu.memory_space<vmem>>, vector<128x144xbf16>
    %c0_1 = arith.constant 0 : index
    %c0_2 = arith.constant 0 : index
    %1 = vector.load %arg2[%c0_1, %c0_2] : memref<144x128xbf16, #tpu.memory_space<vmem>>, vector<144x128xbf16>
    %cst = arith.constant dense<0.000000e+00> : vector<128x128xf32>
    %2 = tpu.matmul %0, %1, %cst {dimension_numbers = #tpu.dot_dimension_numbers<[1], [0], [0], [1], [0, 0, 1, 1], [], []>} : vector<128x144xbf16>, vector<144x128xbf16>, vector<128x128xf32> -> vector<128x128xf32>
    %cst_3 = arith.constant dense<0.000000e+00> : vector<128xf32>
    %3 = vector.multi_reduction <add>, %2, %cst_3 [0] : vector<128x128xf32> to vector<128xf32>
    %4 = vector.shape_cast %3 : vector<128xf32> to vector<1x128xf32>
    %cst_4 = arith.constant 1.280000e+02 : f32
    %5 = vector.broadcast %cst_4 : f32 to vector<1x128xf32>
    %6 = arith.divf %4, %5 : vector<1x128xf32>
    %7 = vector.broadcast %6 : vector<1x128xf32> to vector<128x128xf32>
    %8 = arith.subf %2, %7 : vector<128x128xf32>
    %9 = arith.mulf %8, %8 : vector<128x128xf32>
    %cst_5 = arith.constant dense<0.000000e+00> : vector<128xf32>
    %10 = vector.multi_reduction <add>, %9, %cst_5 [0] : vector<128x128xf32> to vector<128xf32>
    %11 = vector.shape_cast %10 : vector<128xf32> to vector<1x128xf32>
    %cst_6 = arith.constant 1.280000e+02 : f32
    %12 = vector.broadcast %cst_6 : f32 to vector<1x128xf32>
    %13 = arith.divf %11, %12 : vector<1x128xf32>
    %cst_7 = arith.constant 9.99999974E-6 : f32
    %14 = vector.broadcast %cst_7 : f32 to vector<1x128xf32>
    %15 = arith.addf %13, %14 : vector<1x128xf32>
    %16 = math.rsqrt %15 : vector<1x128xf32>
    %17 = vector.broadcast %16 : vector<1x128xf32> to vector<128x128xf32>
    %18 = arith.mulf %8, %17 : vector<128x128xf32>
    %c0_8 = arith.constant 0 : index
    %c0_9 = arith.constant 0 : index
    %19 = vector.load %arg3[%c0_8, %c0_9] : memref<1x128xf32, #tpu.memory_space<vmem>>, vector<1x128xf32>
    %20 = vector.broadcast %19 : vector<1x128xf32> to vector<128x128xf32>
    %21 = arith.mulf %18, %20 : vector<128x128xf32>
    %c0_10 = arith.constant 0 : index
    %c0_11 = arith.constant 0 : index
    %22 = vector.load %arg4[%c0_10, %c0_11] : memref<1x128xf32, #tpu.memory_space<vmem>>, vector<1x128xf32>
    %23 = vector.broadcast %22 : vector<1x128xf32> to vector<128x128xf32>
    %24 = arith.addf %21, %23 : vector<128x128xf32>
    %cst_12 = arith.constant 1.000000e-01 : f32
    %25 = vector.broadcast %cst_12 : f32 to vector<128x128xf32>
    %26 = arith.mulf %25, %24 : vector<128x128xf32>
    %27 = arith.maximumf %24, %26 : vector<128x128xf32>
    %28 = arith.truncf %27 : vector<128x128xf32> to vector<128x128xbf16>
    %c0_13 = arith.constant 0 : index
    %c0_14 = arith.constant 0 : index
    %29 = vector.load %arg5[%c0_13, %c0_14] : memref<128x128xbf16, #tpu.memory_space<vmem>>, vector<128x128xbf16>
    tpu.vector_store %arg5[%c0_13, %c0_14], %28 {strides = array<i32>} : memref<128x128xbf16, #tpu.memory_space<vmem>>, vector<128x128xbf16>,
    return
  }
  func.func @transform_0(%arg0: i32) -> (i32, i32) {
    %c0_i32 = arith.constant 0 : i32
    %c0_i32_0 = arith.constant 0 : i32
    return %arg0, %c0_i32 : i32, i32
  }
  func.func @transform_1(%arg0: i32) -> (i32, i32) {
    %c0_i32 = arith.constant 0 : i32
    %c0_i32_0 = arith.constant 0 : i32
    %c0_i32_1 = arith.constant 0 : i32
    return %c0_i32, %c0_i32_0 : i32, i32
  }
  func.func @transform_2(%arg0: i32) -> (i32, i32) {
    %c0_i32 = arith.constant 0 : i32
    %c0_i32_0 = arith.constant 0 : i32
    %c0_i32_1 = arith.constant 0 : i32
    return %c0_i32, %c0_i32_0 : i32, i32
  }
  func.func @transform_3(%arg0: i32) -> (i32, i32) {
    %c0_i32 = arith.constant 0 : i32
    %c0_i32_0 = arith.constant 0 : i32
    %c0_i32_1 = arith.constant 0 : i32
    return %c0_i32, %c0_i32_0 : i32, i32
  }
  func.func @transform_4(%arg0: i32) -> (i32, i32) {
    %c0_i32 = arith.constant 0 : i32
    %c0_i32_0 = arith.constant 0 : i32
    return %arg0, %c0_i32 : i32, i32
  }
}

module attributes {stable_mosaic.version = 11 : i64} {
  func.func @conv_fused_kernel(%arg0: i32, %arg1: memref<128x32xbf16, #tpu.memory_space<vmem>>, %arg2: memref<32x128xbf16, #tpu.memory_space<vmem>>, %arg3: memref<1x128xf32, #tpu.memory_space<vmem>>, %arg4: memref<1x128xf32, #tpu.memory_space<vmem>>, %arg5: memref<128x128xbf16, #tpu.memory_space<vmem>>) attributes {dimension_semantics = [#tpu.dimension_semantics<arbitrary>], iteration_bounds = array<i64: 1>, scalar_prefetch = 0 : i64, scratch_operands = 0 : i64, tpu.core_type = #tpu.core_type<tc>, window_params = [{transform_indices = @transform_0, window_bounds = array<i64: 128, 32>}, {pipeline_mode = #tpu.pipeline_mode<synchronous>, transform_indices = @transform_1, window_bounds = array<i64: 32, 128>}, {pipeline_mode = #tpu.pipeline_mode<synchronous>, transform_indices = @transform_2, window_bounds = array<i64: 1, 128>}, {pipeline_mode = #tpu.pipeline_mode<synchronous>, transform_indices = @transform_3, window_bounds = array<i64: 1, 128>}, {transform_indices = @transform_4, window_bounds = array<i64: 128, 128>}]} {
    %c0 = arith.constant 0 : index
    %c0_0 = arith.constant 0 : index
    %0 = vector.load %arg1[%c0, %c0_0] : memref<128x32xbf16, #tpu.memory_space<vmem>>, vector<128x32xbf16>
    %c0_1 = arith.constant 0 : index
    %c0_2 = arith.constant 0 : index
    %1 = vector.load %arg2[%c0_1, %c0_2] : memref<32x128xbf16, #tpu.memory_space<vmem>>, vector<32x128xbf16>
    %cst = arith.constant dense<0.000000e+00> : vector<128x128xf32>
    %2 = tpu.matmul %0, %1, %cst {dimension_numbers = #tpu.dot_dimension_numbers<[1], [0], [0], [1], [0, 0, 1, 1], [], []>} : vector<128x32xbf16>, vector<32x128xbf16>, vector<128x128xf32> -> vector<128x128xf32>
    %cst_3 = arith.constant dense<0.000000e+00> : vector<128xf32>
    %3 = vector.multi_reduction <add>, %2, %cst_3 [0] : vector<128x128xf32> to vector<128xf32>
    %4 = vector.shape_cast %3 : vector<128xf32> to vector<1x128xf32>
    %cst_4 = arith.constant 1.280000e+02 : f32
    %5 = vector.broadcast %cst_4 : f32 to vector<1x128xf32>
    %6 = arith.divf %4, %5 : vector<1x128xf32>
    %7 = vector.broadcast %6 : vector<1x128xf32> to vector<128x128xf32>
    %8 = arith.subf %2, %7 : vector<128x128xf32>
    %9 = arith.mulf %8, %8 : vector<128x128xf32>
    %cst_5 = arith.constant dense<0.000000e+00> : vector<128xf32>
    %10 = vector.multi_reduction <add>, %9, %cst_5 [0] : vector<128x128xf32> to vector<128xf32>
    %11 = vector.shape_cast %10 : vector<128xf32> to vector<1x128xf32>
    %cst_6 = arith.constant 1.280000e+02 : f32
    %12 = vector.broadcast %cst_6 : f32 to vector<1x128xf32>
    %13 = arith.divf %11, %12 : vector<1x128xf32>
    %cst_7 = arith.constant 9.99999974E-6 : f32
    %14 = vector.broadcast %cst_7 : f32 to vector<1x128xf32>
    %15 = arith.addf %13, %14 : vector<1x128xf32>
    %16 = math.rsqrt %15 : vector<1x128xf32>
    %17 = vector.broadcast %16 : vector<1x128xf32> to vector<128x128xf32>
    %18 = arith.mulf %8, %17 : vector<128x128xf32>
    %c0_8 = arith.constant 0 : index
    %c0_9 = arith.constant 0 : index
    %19 = vector.load %arg3[%c0_8, %c0_9] : memref<1x128xf32, #tpu.memory_space<vmem>>, vector<1x128xf32>
    %20 = vector.broadcast %19 : vector<1x128xf32> to vector<128x128xf32>
    %21 = arith.mulf %18, %20 : vector<128x128xf32>
    %c0_10 = arith.constant 0 : index
    %c0_11 = arith.constant 0 : index
    %22 = vector.load %arg4[%c0_10, %c0_11] : memref<1x128xf32, #tpu.memory_space<vmem>>, vector<1x128xf32>
    %23 = vector.broadcast %22 : vector<1x128xf32> to vector<128x128xf32>
    %24 = arith.addf %21, %23 : vector<128x128xf32>
    %cst_12 = arith.constant 1.000000e-01 : f32
    %25 = vector.broadcast %cst_12 : f32 to vector<128x128xf32>
    %26 = arith.mulf %25, %24 : vector<128x128xf32>
    %27 = arith.maximumf %24, %26 : vector<128x128xf32>
    %28 = arith.truncf %27 : vector<128x128xf32> to vector<128x128xbf16>
    %c0_13 = arith.constant 0 : index
    %c0_14 = arith.constant 0 : index
    %29 = vector.load %arg5[%c0_13, %c0_14] : memref<128x128xbf16, #tpu.memory_space<vmem>>, vector<128x128xbf16>
    tpu.vector_store %arg5[%c0_13, %c0_14], %28 {strides = array<i32>} : memref<128x128xbf16, #tpu.memory_space<vmem>>, vector<128x128xbf16>,
    return
  }
  func.func @transform_0(%arg0: i32) -> (i32, i32) {
    %c0_i32 = arith.constant 0 : i32
    %c0_i32_0 = arith.constant 0 : i32
    return %arg0, %c0_i32 : i32, i32
  }
  func.func @transform_1(%arg0: i32) -> (i32, i32) {
    %c0_i32 = arith.constant 0 : i32
    %c0_i32_0 = arith.constant 0 : i32
    %c0_i32_1 = arith.constant 0 : i32
    return %c0_i32, %c0_i32_0 : i32, i32
  }
  func.func @transform_2(%arg0: i32) -> (i32, i32) {
    %c0_i32 = arith.constant 0 : i32
    %c0_i32_0 = arith.constant 0 : i32
    %c0_i32_1 = arith.constant 0 : i32
    return %c0_i32, %c0_i32_0 : i32, i32
  }
  func.func @transform_3(%arg0: i32) -> (i32, i32) {
    %c0_i32 = arith.constant 0 : i32
    %c0_i32_0 = arith.constant 0 : i32
    %c0_i32_1 = arith.constant 0 : i32
    return %c0_i32, %c0_i32_0 : i32, i32
  }
  func.func @transform_4(%arg0: i32) -> (i32, i32) {
    %c0_i32 = arith.constant 0 : i32
    %c0_i32_0 = arith.constant 0 : i32
    return %arg0, %c0_i32 : i32, i32
  }
}

module attributes {stable_mosaic.version = 11 : i64} {
  func.func @conv_fused_kernel(%arg0: i32, %arg1: memref<128x144xbf16, #tpu.memory_space<vmem>>, %arg2: memref<144x128xbf16, #tpu.memory_space<vmem>>, %arg3: memref<1x128xf32, #tpu.memory_space<vmem>>, %arg4: memref<1x128xf32, #tpu.memory_space<vmem>>, %arg5: memref<128x128xbf16, #tpu.memory_space<vmem>>, %arg6: memref<128x128xbf16, #tpu.memory_space<vmem>>) attributes {dimension_semantics = [#tpu.dimension_semantics<arbitrary>], iteration_bounds = array<i64: 1>, scalar_prefetch = 0 : i64, scratch_operands = 0 : i64, tpu.core_type = #tpu.core_type<tc>, window_params = [{transform_indices = @transform_0, window_bounds = array<i64: 128, 144>}, {pipeline_mode = #tpu.pipeline_mode<synchronous>, transform_indices = @transform_1, window_bounds = array<i64: 144, 128>}, {pipeline_mode = #tpu.pipeline_mode<synchronous>, transform_indices = @transform_2, window_bounds = array<i64: 1, 128>}, {pipeline_mode = #tpu.pipeline_mode<synchronous>, transform_indices = @transform_3, window_bounds = array<i64: 1, 128>}, {transform_indices = @transform_4, window_bounds = array<i64: 128, 128>}, {transform_indices = @transform_5, window_bounds = array<i64: 128, 128>}]} {
    %c0 = arith.constant 0 : index
    %c0_0 = arith.constant 0 : index
    %0 = vector.load %arg1[%c0, %c0_0] : memref<128x144xbf16, #tpu.memory_space<vmem>>, vector<128x144xbf16>
    %c0_1 = arith.constant 0 : index
    %c0_2 = arith.constant 0 : index
    %1 = vector.load %arg2[%c0_1, %c0_2] : memref<144x128xbf16, #tpu.memory_space<vmem>>, vector<144x128xbf16>
    %cst = arith.constant dense<0.000000e+00> : vector<128x128xf32>
    %2 = tpu.matmul %0, %1, %cst {dimension_numbers = #tpu.dot_dimension_numbers<[1], [0], [0], [1], [0, 0, 1, 1], [], []>} : vector<128x144xbf16>, vector<144x128xbf16>, vector<128x128xf32> -> vector<128x128xf32>
    %cst_3 = arith.constant dense<0.000000e+00> : vector<128xf32>
    %3 = vector.multi_reduction <add>, %2, %cst_3 [0] : vector<128x128xf32> to vector<128xf32>
    %4 = vector.shape_cast %3 : vector<128xf32> to vector<1x128xf32>
    %cst_4 = arith.constant 1.280000e+02 : f32
    %5 = vector.broadcast %cst_4 : f32 to vector<1x128xf32>
    %6 = arith.divf %4, %5 : vector<1x128xf32>
    %7 = vector.broadcast %6 : vector<1x128xf32> to vector<128x128xf32>
    %8 = arith.subf %2, %7 : vector<128x128xf32>
    %9 = arith.mulf %8, %8 : vector<128x128xf32>
    %cst_5 = arith.constant dense<0.000000e+00> : vector<128xf32>
    %10 = vector.multi_reduction <add>, %9, %cst_5 [0] : vector<128x128xf32> to vector<128xf32>
    %11 = vector.shape_cast %10 : vector<128xf32> to vector<1x128xf32>
    %cst_6 = arith.constant 1.280000e+02 : f32
    %12 = vector.broadcast %cst_6 : f32 to vector<1x128xf32>
    %13 = arith.divf %11, %12 : vector<1x128xf32>
    %cst_7 = arith.constant 9.99999974E-6 : f32
    %14 = vector.broadcast %cst_7 : f32 to vector<1x128xf32>
    %15 = arith.addf %13, %14 : vector<1x128xf32>
    %16 = math.rsqrt %15 : vector<1x128xf32>
    %17 = vector.broadcast %16 : vector<1x128xf32> to vector<128x128xf32>
    %18 = arith.mulf %8, %17 : vector<128x128xf32>
    %c0_8 = arith.constant 0 : index
    %c0_9 = arith.constant 0 : index
    %19 = vector.load %arg3[%c0_8, %c0_9] : memref<1x128xf32, #tpu.memory_space<vmem>>, vector<1x128xf32>
    %20 = vector.broadcast %19 : vector<1x128xf32> to vector<128x128xf32>
    %21 = arith.mulf %18, %20 : vector<128x128xf32>
    %c0_10 = arith.constant 0 : index
    %c0_11 = arith.constant 0 : index
    %22 = vector.load %arg4[%c0_10, %c0_11] : memref<1x128xf32, #tpu.memory_space<vmem>>, vector<1x128xf32>
    %23 = vector.broadcast %22 : vector<1x128xf32> to vector<128x128xf32>
    %24 = arith.addf %21, %23 : vector<128x128xf32>
    %cst_12 = arith.constant 1.000000e-01 : f32
    %25 = vector.broadcast %cst_12 : f32 to vector<128x128xf32>
    %26 = arith.mulf %25, %24 : vector<128x128xf32>
    %27 = arith.maximumf %24, %26 : vector<128x128xf32>
    %c0_13 = arith.constant 0 : index
    %c0_14 = arith.constant 0 : index
    %28 = vector.load %arg5[%c0_13, %c0_14] : memref<128x128xbf16, #tpu.memory_space<vmem>>, vector<128x128xbf16>
    %29 = arith.extf %28 : vector<128x128xbf16> to vector<128x128xf32>
    %30 = arith.addf %27, %29 : vector<128x128xf32>
    %31 = arith.truncf %30 : vector<128x128xf32> to vector<128x128xbf16>
    %c0_15 = arith.constant 0 : index
    %c0_16 = arith.constant 0 : index
    %32 = vector.load %arg6[%c0_15, %c0_16] : memref<128x128xbf16, #tpu.memory_space<vmem>>, vector<128x128xbf16>
    tpu.vector_store %arg6[%c0_15, %c0_16], %31 {strides = array<i32>} : memref<128x128xbf16, #tpu.memory_space<vmem>>, vector<128x128xbf16>,
    return
  }
  func.func @transform_0(%arg0: i32) -> (i32, i32) {
    %c0_i32 = arith.constant 0 : i32
    %c0_i32_0 = arith.constant 0 : i32
    return %arg0, %c0_i32 : i32, i32
  }
  func.func @transform_1(%arg0: i32) -> (i32, i32) {
    %c0_i32 = arith.constant 0 : i32
    %c0_i32_0 = arith.constant 0 : i32
    %c0_i32_1 = arith.constant 0 : i32
    return %c0_i32, %c0_i32_0 : i32, i32
  }
  func.func @transform_2(%arg0: i32) -> (i32, i32) {
    %c0_i32 = arith.constant 0 : i32
    %c0_i32_0 = arith.constant 0 : i32
    %c0_i32_1 = arith.constant 0 : i32
    return %c0_i32, %c0_i32_0 : i32, i32
  }
  func.func @transform_3(%arg0: i32) -> (i32, i32) {
    %c0_i32 = arith.constant 0 : i32
    %c0_i32_0 = arith.constant 0 : i32
    %c0_i32_1 = arith.constant 0 : i32
    return %c0_i32, %c0_i32_0 : i32, i32
  }
  func.func @transform_4(%arg0: i32) -> (i32, i32) {
    %c0_i32 = arith.constant 0 : i32
    %c0_i32_0 = arith.constant 0 : i32
    return %arg0, %c0_i32 : i32, i32
  }
  func.func @transform_5(%arg0: i32) -> (i32, i32) {
    %c0_i32 = arith.constant 0 : i32
    %c0_i32_0 = arith.constant 0 : i32
    return %arg0, %c0_i32 : i32, i32
  }
}

module attributes {stable_mosaic.version = 11 : i64} {
  func.func @upsample_kernel(%arg0: i32, %arg1: memref<16x8xbf16, #tpu.memory_space<vmem>>, %arg2: memref<8x128xbf16, #tpu.memory_space<vmem>>, %arg3: memref<128x256xbf16, #tpu.memory_space<vmem>>, %arg4: memref<16x256xbf16, #tpu.memory_space<vmem>>) attributes {dimension_semantics = [#tpu.dimension_semantics<parallel>], iteration_bounds = array<i64: 2>, scalar_prefetch = 0 : i64, scratch_operands = 0 : i64, tpu.core_type = #tpu.core_type<tc>, window_params = [{pipeline_mode = #tpu.pipeline_mode<synchronous>, transform_indices = @transform_0, window_bounds = array<i64: 16, 8>}, {transform_indices = @transform_1, window_bounds = array<i64: 8, 128>}, {pipeline_mode = #tpu.pipeline_mode<synchronous>, transform_indices = @transform_2, window_bounds = array<i64: 128, 256>}, {transform_indices = @transform_3, window_bounds = array<i64: 16, 256>}]} {
    %c0 = arith.constant 0 : index
    %c0_0 = arith.constant 0 : index
    %0 = vector.load %arg1[%c0, %c0_0] : memref<16x8xbf16, #tpu.memory_space<vmem>>, vector<16x8xbf16>
    %c0_1 = arith.constant 0 : index
    %c0_2 = arith.constant 0 : index
    %1 = vector.load %arg2[%c0_1, %c0_2] : memref<8x128xbf16, #tpu.memory_space<vmem>>, vector<8x128xbf16>
    %cst = arith.constant dense<0.000000e+00> : vector<16x128xf32>
    %2 = tpu.matmul %0, %1, %cst {dimension_numbers = #tpu.dot_dimension_numbers<[1], [0], [0], [1], [0, 0, 1, 1], [], []>} : vector<16x8xbf16>, vector<8x128xbf16>, vector<16x128xf32> -> vector<16x128xf32>
    %3 = arith.truncf %2 : vector<16x128xf32> to vector<16x128xbf16>
    %c0_3 = arith.constant 0 : index
    %c0_4 = arith.constant 0 : index
    %4 = vector.load %arg3[%c0_3, %c0_4] : memref<128x256xbf16, #tpu.memory_space<vmem>>, vector<128x256xbf16>
    %cst_5 = arith.constant dense<0.000000e+00> : vector<16x256xf32>
    %5 = tpu.matmul %3, %4, %cst_5 {dimension_numbers = #tpu.dot_dimension_numbers<[1], [0], [0], [1], [0, 0, 1, 1], [], []>} : vector<16x128xbf16>, vector<128x256xbf16>, vector<16x256xf32> -> vector<16x256xf32>
    %6 = arith.truncf %5 : vector<16x256xf32> to vector<16x256xbf16>
    %c0_6 = arith.constant 0 : index
    %c0_7 = arith.constant 0 : index
    %7 = vector.load %arg4[%c0_6, %c0_7] : memref<16x256xbf16, #tpu.memory_space<vmem>>, vector<16x256xbf16>
    tpu.vector_store %arg4[%c0_6, %c0_7], %6 {strides = array<i32>} : memref<16x256xbf16, #tpu.memory_space<vmem>>, vector<16x256xbf16>,
    return
  }
  func.func @transform_0(%arg0: i32) -> (i32, i32) {
    %c0_i32 = arith.constant 0 : i32
    %c0_i32_0 = arith.constant 0 : i32
    %c0_i32_1 = arith.constant 0 : i32
    return %c0_i32, %c0_i32_0 : i32, i32
  }
  func.func @transform_1(%arg0: i32) -> (i32, i32) {
    %c0_i32 = arith.constant 0 : i32
    %c0_i32_0 = arith.constant 0 : i32
    return %arg0, %c0_i32 : i32, i32
  }
  func.func @transform_2(%arg0: i32) -> (i32, i32) {
    %c0_i32 = arith.constant 0 : i32
    %c0_i32_0 = arith.constant 0 : i32
    %c0_i32_1 = arith.constant 0 : i32
    return %c0_i32, %c0_i32_0 : i32, i32
  }
  func.func @transform_3(%arg0: i32) -> (i32, i32) {
    %c0_i32 = arith.constant 0 : i32
    %c0_i32_0 = arith.constant 0 : i32
    return %arg0, %c0_i32 : i32, i32
  }
}

module attributes {stable_mosaic.version = 11 : i64} {
  func.func @head_yolo_kernel(%arg0: i32, %arg1: memref<64x32xbf16, #tpu.memory_space<vmem>>, %arg2: memref<32x128xbf16, #tpu.memory_space<vmem>>, %arg3: memref<8x128xf32, #tpu.memory_space<vmem>>, %arg4: memref<64x128xf32, #tpu.memory_space<vmem>>) attributes {dimension_semantics = [#tpu.dimension_semantics<parallel>], iteration_bounds = array<i64: 2>, scalar_prefetch = 0 : i64, scratch_operands = 0 : i64, tpu.core_type = #tpu.core_type<tc>, window_params = [{transform_indices = @transform_0, window_bounds = array<i64: 64, 32>}, {pipeline_mode = #tpu.pipeline_mode<synchronous>, transform_indices = @transform_1, window_bounds = array<i64: 32, 128>}, {pipeline_mode = #tpu.pipeline_mode<synchronous>, transform_indices = @transform_2, window_bounds = array<i64: 8, 128>}, {transform_indices = @transform_3, window_bounds = array<i64: 64, 128>}]} {
    %c0 = arith.constant 0 : index
    %c0_0 = arith.constant 0 : index
    %0 = vector.load %arg1[%c0, %c0_0] : memref<64x32xbf16, #tpu.memory_space<vmem>>, vector<64x32xbf16>
    %c0_1 = arith.constant 0 : index
    %c0_2 = arith.constant 0 : index
    %1 = vector.load %arg2[%c0_1, %c0_2] : memref<32x128xbf16, #tpu.memory_space<vmem>>, vector<32x128xbf16>
    %cst = arith.constant dense<0.000000e+00> : vector<64x128xf32>
    %2 = tpu.matmul %0, %1, %cst {dimension_numbers = #tpu.dot_dimension_numbers<[1], [0], [0], [1], [0, 0, 1, 1], [], []>} : vector<64x32xbf16>, vector<32x128xbf16>, vector<64x128xf32> -> vector<64x128xf32>
    %c0_3 = arith.constant 0 : index
    %c0_4 = arith.constant 0 : index
    %3 = vector.load %arg3[%c0_3, %c0_4] : memref<8x128xf32, #tpu.memory_space<vmem>>, vector<8x128xf32>
    %4 = vector.extract_strided_slice %3 {offsets = [0, 0], sizes = [1, 128], strides = [1, 1]} : vector<8x128xf32> to vector<1x128xf32>
    %5 = vector.extract_strided_slice %3 {offsets = [1, 0], sizes = [1, 128], strides = [1, 1]} : vector<8x128xf32> to vector<1x128xf32>
    %6 = vector.extract_strided_slice %3 {offsets = [2, 0], sizes = [1, 128], strides = [1, 1]} : vector<8x128xf32> to vector<1x128xf32>
    %7 = vector.extract_strided_slice %3 {offsets = [3, 0], sizes = [1, 128], strides = [1, 1]} : vector<8x128xf32> to vector<1x128xf32>
    %8 = vector.extract_strided_slice %3 {offsets = [4, 0], sizes = [1, 128], strides = [1, 1]} : vector<8x128xf32> to vector<1x128xf32>
    %9 = vector.broadcast %4 : vector<1x128xf32> to vector<64x128xf32>
    %10 = arith.addf %2, %9 : vector<64x128xf32>
    %11 = math.exp %10 : vector<64x128xf32>
    %cst_5 = arith.constant 1.000000e+00 : f32
    %12 = vector.broadcast %cst_5 : f32 to vector<64x128xf32>
    %13 = arith.addf %12, %11 : vector<64x128xf32>
    %14 = tpu.reciprocal %13 {approx = true} : vector<64x128xf32> -> vector<64x128xf32>
    %cst_6 = arith.constant 1.000000e+00 : f32
    %15 = vector.broadcast %cst_6 : f32 to vector<64x128xf32>
    %16 = arith.subf %15, %14 : vector<64x128xf32>
    %cst_7 = arith.constant 0.000000e+00 : f32
    %17 = vector.broadcast %cst_7 : f32 to vector<1x128xf32>
    %18 = arith.cmpf one, %5, %17 : vector<1x128xf32>
    %19 = vector.shape_cast %18 : vector<1x128xi1> to vector<1x128xi1>
    %20 = vector.broadcast %19 : vector<1x128xi1> to vector<64x128xi1>
    %21 = arith.select %20, %11, %16 : vector<64x128xi1>, vector<64x128xf32>
    %c64_i32 = arith.constant 64 : i32
    %22 = arith.muli %arg0, %c64_i32 : i32
    %23 = tpu.iota {dimensions = array<i32: 0>} : vector<64x128xi32>
    %24 = vector.broadcast %22 : i32 to vector<64x128xi32>
    %25 = arith.addi %24, %23 : vector<64x128xi32>
    %26 = arith.sitofp %25 : vector<64x128xi32> to vector<64x128xf32>
    %cst_8 = arith.constant 6.400000e+01 : f32
    %27 = vector.broadcast %cst_8 : f32 to vector<64x128xf32>
    %28 = arith.divf %26, %27 : vector<64x128xf32>
    %29 = math.floor %28 : vector<64x128xf32>
    %cst_9 = arith.constant 6.400000e+01 : f32
    %30 = vector.broadcast %cst_9 : f32 to vector<64x128xf32>
    %31 = arith.mulf %29, %30 : vector<64x128xf32>
    %32 = arith.subf %26, %31 : vector<64x128xf32>
    %cst_10 = arith.constant 8.000000e+00 : f32
    %33 = vector.broadcast %cst_10 : f32 to vector<64x128xf32>
    %34 = arith.divf %32, %33 : vector<64x128xf32>
    %35 = math.floor %34 : vector<64x128xf32>
    %cst_11 = arith.constant 8.000000e+00 : f32
    %36 = vector.broadcast %cst_11 : f32 to vector<64x128xf32>
    %37 = arith.mulf %35, %36 : vector<64x128xf32>
    %38 = arith.subf %32, %37 : vector<64x128xf32>
    %39 = vector.broadcast %7 : vector<1x128xf32> to vector<64x128xf32>
    %40 = arith.mulf %38, %39 : vector<64x128xf32>
    %41 = arith.addf %21, %40 : vector<64x128xf32>
    %42 = vector.broadcast %8 : vector<1x128xf32> to vector<64x128xf32>
    %43 = arith.mulf %35, %42 : vector<64x128xf32>
    %44 = arith.addf %41, %43 : vector<64x128xf32>
    %45 = vector.broadcast %6 : vector<1x128xf32> to vector<64x128xf32>
    %46 = arith.mulf %44, %45 : vector<64x128xf32>
    %c0_12 = arith.constant 0 : index
    %c0_13 = arith.constant 0 : index
    %47 = vector.load %arg4[%c0_12, %c0_13] : memref<64x128xf32, #tpu.memory_space<vmem>>, vector<64x128xf32>
    tpu.vector_store %arg4[%c0_12, %c0_13], %46 {strides = array<i32>} : memref<64x128xf32, #tpu.memory_space<vmem>>, vector<64x128xf32>,
    return
  }
  func.func @transform_0(%arg0: i32) -> (i32, i32) {
    %c0_i32 = arith.constant 0 : i32
    %c0_i32_0 = arith.constant 0 : i32
    return %arg0, %c0_i32 : i32, i32
  }
  func.func @transform_1(%arg0: i32) -> (i32, i32) {
    %c0_i32 = arith.constant 0 : i32
    %c0_i32_0 = arith.constant 0 : i32
    %c0_i32_1 = arith.constant 0 : i32
    return %c0_i32, %c0_i32_0 : i32, i32
  }
  func.func @transform_2(%arg0: i32) -> (i32, i32) {
    %c0_i32 = arith.constant 0 : i32
    %c0_i32_0 = arith.constant 0 : i32
    %c0_i32_1 = arith.constant 0 : i32
    return %c0_i32, %c0_i32_0 : i32, i32
  }
  func.func @transform_3(%arg0: i32) -> (i32, i32) {
    %c0_i32 = arith.constant 0 : i32
    %c0_i32_0 = arith.constant 0 : i32
    return %arg0, %c0_i32 : i32, i32
  }
}

module attributes {stable_mosaic.version = 11 : i64} {
  func.func @head_yolo_kernel(%arg0: i32, %arg1: memref<256x32xbf16, #tpu.memory_space<vmem>>, %arg2: memref<32x128xbf16, #tpu.memory_space<vmem>>, %arg3: memref<8x128xf32, #tpu.memory_space<vmem>>, %arg4: memref<256x128xf32, #tpu.memory_space<vmem>>) attributes {dimension_semantics = [#tpu.dimension_semantics<parallel>], iteration_bounds = array<i64: 2>, scalar_prefetch = 0 : i64, scratch_operands = 0 : i64, tpu.core_type = #tpu.core_type<tc>, window_params = [{transform_indices = @transform_0, window_bounds = array<i64: 256, 32>}, {pipeline_mode = #tpu.pipeline_mode<synchronous>, transform_indices = @transform_1, window_bounds = array<i64: 32, 128>}, {pipeline_mode = #tpu.pipeline_mode<synchronous>, transform_indices = @transform_2, window_bounds = array<i64: 8, 128>}, {transform_indices = @transform_3, window_bounds = array<i64: 256, 128>}]} {
    %c0 = arith.constant 0 : index
    %c0_0 = arith.constant 0 : index
    %0 = vector.load %arg1[%c0, %c0_0] : memref<256x32xbf16, #tpu.memory_space<vmem>>, vector<256x32xbf16>
    %c0_1 = arith.constant 0 : index
    %c0_2 = arith.constant 0 : index
    %1 = vector.load %arg2[%c0_1, %c0_2] : memref<32x128xbf16, #tpu.memory_space<vmem>>, vector<32x128xbf16>
    %cst = arith.constant dense<0.000000e+00> : vector<256x128xf32>
    %2 = tpu.matmul %0, %1, %cst {dimension_numbers = #tpu.dot_dimension_numbers<[1], [0], [0], [1], [0, 0, 1, 1], [], []>} : vector<256x32xbf16>, vector<32x128xbf16>, vector<256x128xf32> -> vector<256x128xf32>
    %c0_3 = arith.constant 0 : index
    %c0_4 = arith.constant 0 : index
    %3 = vector.load %arg3[%c0_3, %c0_4] : memref<8x128xf32, #tpu.memory_space<vmem>>, vector<8x128xf32>
    %4 = vector.extract_strided_slice %3 {offsets = [0, 0], sizes = [1, 128], strides = [1, 1]} : vector<8x128xf32> to vector<1x128xf32>
    %5 = vector.extract_strided_slice %3 {offsets = [1, 0], sizes = [1, 128], strides = [1, 1]} : vector<8x128xf32> to vector<1x128xf32>
    %6 = vector.extract_strided_slice %3 {offsets = [2, 0], sizes = [1, 128], strides = [1, 1]} : vector<8x128xf32> to vector<1x128xf32>
    %7 = vector.extract_strided_slice %3 {offsets = [3, 0], sizes = [1, 128], strides = [1, 1]} : vector<8x128xf32> to vector<1x128xf32>
    %8 = vector.extract_strided_slice %3 {offsets = [4, 0], sizes = [1, 128], strides = [1, 1]} : vector<8x128xf32> to vector<1x128xf32>
    %9 = vector.broadcast %4 : vector<1x128xf32> to vector<256x128xf32>
    %10 = arith.addf %2, %9 : vector<256x128xf32>
    %11 = math.exp %10 : vector<256x128xf32>
    %cst_5 = arith.constant 1.000000e+00 : f32
    %12 = vector.broadcast %cst_5 : f32 to vector<256x128xf32>
    %13 = arith.addf %12, %11 : vector<256x128xf32>
    %14 = tpu.reciprocal %13 {approx = true} : vector<256x128xf32> -> vector<256x128xf32>
    %cst_6 = arith.constant 1.000000e+00 : f32
    %15 = vector.broadcast %cst_6 : f32 to vector<256x128xf32>
    %16 = arith.subf %15, %14 : vector<256x128xf32>
    %cst_7 = arith.constant 0.000000e+00 : f32
    %17 = vector.broadcast %cst_7 : f32 to vector<1x128xf32>
    %18 = arith.cmpf one, %5, %17 : vector<1x128xf32>
    %19 = vector.shape_cast %18 : vector<1x128xi1> to vector<1x128xi1>
    %20 = vector.broadcast %19 : vector<1x128xi1> to vector<256x128xi1>
    %21 = arith.select %20, %11, %16 : vector<256x128xi1>, vector<256x128xf32>
    %c256_i32 = arith.constant 256 : i32
    %22 = arith.muli %arg0, %c256_i32 : i32
    %23 = tpu.iota {dimensions = array<i32: 0>} : vector<256x128xi32>
    %24 = vector.broadcast %22 : i32 to vector<256x128xi32>
    %25 = arith.addi %24, %23 : vector<256x128xi32>
    %26 = arith.sitofp %25 : vector<256x128xi32> to vector<256x128xf32>
    %cst_8 = arith.constant 2.560000e+02 : f32
    %27 = vector.broadcast %cst_8 : f32 to vector<256x128xf32>
    %28 = arith.divf %26, %27 : vector<256x128xf32>
    %29 = math.floor %28 : vector<256x128xf32>
    %cst_9 = arith.constant 2.560000e+02 : f32
    %30 = vector.broadcast %cst_9 : f32 to vector<256x128xf32>
    %31 = arith.mulf %29, %30 : vector<256x128xf32>
    %32 = arith.subf %26, %31 : vector<256x128xf32>
    %cst_10 = arith.constant 1.600000e+01 : f32
    %33 = vector.broadcast %cst_10 : f32 to vector<256x128xf32>
    %34 = arith.divf %32, %33 : vector<256x128xf32>
    %35 = math.floor %34 : vector<256x128xf32>
    %cst_11 = arith.constant 1.600000e+01 : f32
    %36 = vector.broadcast %cst_11 : f32 to vector<256x128xf32>
    %37 = arith.mulf %35, %36 : vector<256x128xf32>
    %38 = arith.subf %32, %37 : vector<256x128xf32>
    %39 = vector.broadcast %7 : vector<1x128xf32> to vector<256x128xf32>
    %40 = arith.mulf %38, %39 : vector<256x128xf32>
    %41 = arith.addf %21, %40 : vector<256x128xf32>
    %42 = vector.broadcast %8 : vector<1x128xf32> to vector<256x128xf32>
    %43 = arith.mulf %35, %42 : vector<256x128xf32>
    %44 = arith.addf %41, %43 : vector<256x128xf32>
    %45 = vector.broadcast %6 : vector<1x128xf32> to vector<256x128xf32>
    %46 = arith.mulf %44, %45 : vector<256x128xf32>
    %c0_12 = arith.constant 0 : index
    %c0_13 = arith.constant 0 : index
    %47 = vector.load %arg4[%c0_12, %c0_13] : memref<256x128xf32, #tpu.memory_space<vmem>>, vector<256x128xf32>
    tpu.vector_store %arg4[%c0_12, %c0_13], %46 {strides = array<i32>} : memref<256x128xf32, #tpu.memory_space<vmem>>, vector<256x128xf32>,
    return
  }
  func.func @transform_0(%arg0: i32) -> (i32, i32) {
    %c0_i32 = arith.constant 0 : i32
    %c0_i32_0 = arith.constant 0 : i32
    return %arg0, %c0_i32 : i32, i32
  }
  func.func @transform_1(%arg0: i32) -> (i32, i32) {
    %c0_i32 = arith.constant 0 : i32
    %c0_i32_0 = arith.constant 0 : i32
    %c0_i32_1 = arith.constant 0 : i32
    return %c0_i32, %c0_i32_0 : i32, i32
  }
  func.func @transform_2(%arg0: i32) -> (i32, i32) {
    %c0_i32 = arith.constant 0 : i32
    %c0_i32_0 = arith.constant 0 : i32
    %c0_i32_1 = arith.constant 0 : i32
    return %c0_i32, %c0_i32_0 : i32, i32
  }
  func.func @transform_3(%arg0: i32) -> (i32, i32) {
    %c0_i32 = arith.constant 0 : i32
    %c0_i32_0 = arith.constant 0 : i32
    return %arg0, %c0_i32 : i32, i32
  }
}

</mosaic_0001>

<bundles_post_ra>
// kernel: darknet_forward.8
= control target key start
LH: loop header
LB: loop body
LE: loop exit
PB: predicated region body
PF: predicated region fallthrough
CT: control target
= control target key end

     0   :  { %vm354_vm0 = vcmask 1044480   ;;  %vm355_vm1 = vcmask 1045504   ;;  %v1683_v2 = vmov 65535   ;;  %vm257_vm2 = vcmask 220160   ;;  %s3563_s1 = inlined_call_operand.vmem [shape: bf16[27,128], index: 1, kind: input, shape index: {}]   ;;  %s3564_s0 = inlined_call_operand.vmem [shape: bf16[512,27], index: 0, kind: input, shape index: {}]   ;;  %s3565_s2 = inlined_call_operand.vmem [shape: f32[1,128], index: 2, kind: input, shape index: {}]   ;;  %s3566_s3 = inlined_call_operand.vmem [shape: f32[1,128], index: 3, kind: input, shape index: {}]   ;;  %s3567_s4 = inlined_call_operand.vmem [shape: bf16[512,128], index: 4, kind: output, shape index: {}]  }
   0x1   :  { %v1410_v0 = vld [vmem:[%s3563_s1 + $0x8] sm:$0xf]  ;;  %v1477_v1 = vld [vmem:[%s3563_s1 + $0x8] sm:$0x30]  ;;  %v356_v3 = vsel %vm354_vm0, 4294967295, %v1683_v2  ;;  %v1476_v7 = vld [vmem:[%s3563_s1] sm:$0xff] }
   0x2   :  { %v1411_v4 = vor.u32 %v1477_v1, %v1410_v0  ;;  %v357_v5 = vsel %vm355_vm1, %v356_v3, 0  ;;  %v1444_v8 = vld [vmem:[%s3564_s0] sm:$0xff]  ;;  %v1445_v10 = vld [vmem:[%s3564_s0 + $0x8] sm:$0xff]  ;;  %v1446_v13 = vld [vmem:[%s3564_s0 + $0x10] sm:$0xff] }
   0x3   :  { %v1452_v9 = vld [vmem:[%s3564_s0 + $0x40] sm:$0xff]  ;;  %v1453_v11 = vld [vmem:[%s3564_s0 + $0x48] sm:$0xff]  ;;  %v1454_v14 = vld [vmem:[%s3564_s0 + $0x50] sm:$0xff] }
   0x4   :  { %v359_v6 = vand.u32 %v1411_v4, %v357_v5  ;;  %v1460_v12 = vld [vmem:[%s3564_s0 + $0x80] sm:$0xff]  ;;  %v1461_v15 = vld [vmem:[%s3564_s0 + $0x88] sm:$0xff]  ;;  %v1447_v16 = vld [vmem:[%s3564_s0 + $0x18] sm:$0xff] }
   0x5   :  { %v1455_v17 = vld [vmem:[%s3564_s0 + $0x58] sm:$0xff]  ;;  %v1462_v18 = vld [vmem:[%s3564_s0 + $0x90] sm:$0xff]  ;;  %v1468_v19 = vld [vmem:[%s3564_s0 + $0xc0] sm:$0xff] }
   0x6   :  { %367 = vmatpush.bf16.msra.mxu0 %v359_v6  ;;  %1669 = vmatpush.bf16.msra.mxu1 %v359_v6  ;;  %v1448_v20 = vld [vmem:[%s3564_s0 + $0x20] sm:$0xff]  ;;  %v1463_v22 = vld [vmem:[%s3564_s0 + $0x98] sm:$0xff]  ;;  %v1469_v23 = vld [vmem:[%s3564_s0 + $0xc8] sm:$0xff] }
   0x7   :  { %1670 = vmatpush.bf16.msra.mxu2 %v359_v6  ;;  %1671 = vmatpush.bf16.msra.mxu3 %v359_v6  ;;  %v1456_v21 = vld [vmem:[%s3564_s0 + $0x60] sm:$0xff]  ;;  %v1449_v24 = vld [vmem:[%s3564_s0 + $0x28] sm:$0xff]  ;;  %v1470_v27 = vld [vmem:[%s3564_s0 + $0xd0] sm:$0xff] }
   0x8   :  { %v1457_v25 = vld [vmem:[%s3564_s0 + $0x68] sm:$0xff]  ;;  %v1464_v26 = vld [vmem:[%s3564_s0 + $0xa0] sm:$0xff]  ;;  %v1450_v28 = vld [vmem:[%s3564_s0 + $0x30] sm:$0xff] }
   0x9   :  { %v1458_v29 = vld [vmem:[%s3564_s0 + $0x70] sm:$0xff]  ;;  %v1465_v30 = vld [vmem:[%s3564_s0 + $0xa8] sm:$0xff]  ;;  %v1471_v31 = vld [vmem:[%s3564_s0 + $0xd8] sm:$0xff] }
   0xa   :  { %368 = vmatpush.bf16.msra.mxu0 %v1476_v7  ;;  %1672 = vmatpush.bf16.msra.mxu1 %v1476_v7  ;;  %v1451_v32 = vld [vmem:[%s3564_s0 + $0x38] sm:$0xff]  ;;  %v1466_v34 = vld [vmem:[%s3564_s0 + $0xb0] sm:$0xff]  ;;  %v1472_v35 = vld [vmem:[%s3564_s0 + $0xe0] sm:$0xff] }
   0xb   :  { %1673 = vmatpush.bf16.msra.mxu2 %v1476_v7  ;;  %1674 = vmatpush.bf16.msra.mxu3 %v1476_v7  ;;  %v1459_v33 = vld [vmem:[%s3564_s0 + $0x78] sm:$0xff]  ;;  %v1473_v38 = vld [vmem:[%s3564_s0 + $0xe8] sm:$0xff]  ;;  %v1474_v43 = vld [vmem:[%s3564_s0 + $0xf0] sm:$0xff] }
   0xc   :  { %v1467_v37 = vld [vmem:[%s3564_s0 + $0xb8] sm:$0xff] }
   0xd   :  { %1412 = vmatmul.msk.bf16.vlgmr.msra.gmra.mxu0 %vm257_vm2, %v1444_v8  ;;  %1420 = vmatmul.msk.bf16.vlgmr.msra.gmra.mxu1 %vm257_vm2, %v1452_v9  ;;  %v1475_v48 = vld [vmem:[%s3564_s0 + $0xf8] sm:$0xff] }
   0xe   :  { %1428 = vmatmul.msk.bf16.vlgmr.msra.gmra.mxu2 %vm257_vm2, %v1460_v12  ;;  %1436 = vmatmul.msk.bf16.vlgmr.msra.gmra.mxu3 %vm257_vm2, %v1468_v19 }
  0x1d   :  { %1413 = vmatmul.msk.bf16.gmra.mxu0 %vm257_vm2, %v1445_v10  ;;  %1421 = vmatmul.msk.bf16.gmra.mxu1 %vm257_vm2, %v1453_v11 }
  0x1e   :  { %1429 = vmatmul.msk.bf16.gmra.mxu2 %vm257_vm2, %v1461_v15  ;;  %1437 = vmatmul.msk.bf16.gmra.mxu3 %vm257_vm2, %v1469_v23 }
  0x2d   :  { %1414 = vmatmul.msk.bf16.gmra.mxu0 %vm257_vm2, %v1446_v13  ;;  %1422 = vmatmul.msk.bf16.gmra.mxu1 %vm257_vm2, %v1454_v14 }
  0x2e   :  { %1430 = vmatmul.msk.bf16.gmra.mxu2 %vm257_vm2, %v1462_v18  ;;  %1438 = vmatmul.msk.bf16.gmra.mxu3 %vm257_vm2, %v1470_v27 }
  0x3d   :  { %1415 = vmatmul.msk.bf16.gmra.mxu0 %vm257_vm2, %v1447_v16  ;;  %1423 = vmatmul.msk.bf16.gmra.mxu1 %vm257_vm2, %v1455_v17 }
  0x3e   :  { %1431 = vmatmul.msk.bf16.gmra.mxu2 %vm257_vm2, %v1463_v22  ;;  %1439 = vmatmul.msk.bf16.gmra.mxu3 %vm257_vm2, %v1471_v31 }
  0x4d   :  { %1416 = vmatmul.msk.bf16.gmra.mxu0 %vm257_vm2, %v1448_v20  ;;  %1424 = vmatmul.msk.bf16.gmra.mxu1 %vm257_vm2, %v1456_v21 }
  0x4e   :  { %1432 = vmatmul.msk.bf16.gmra.mxu2 %vm257_vm2, %v1464_v26  ;;  %1440 = vmatmul.msk.bf16.gmra.mxu3 %vm257_vm2, %v1472_v35 }
  0x5d   :  { %1417 = vmatmul.msk.bf16.gmra.mxu0 %vm257_vm2, %v1449_v24  ;;  %1425 = vmatmul.msk.bf16.gmra.mxu1 %vm257_vm2, %v1457_v25 }
  0x5e   :  { %1433 = vmatmul.msk.bf16.gmra.mxu2 %vm257_vm2, %v1465_v30  ;;  %1441 = vmatmul.msk.bf16.gmra.mxu3 %vm257_vm2, %v1473_v38 }
  0x6d   :  { %1418 = vmatmul.msk.bf16.gmra.mxu0 %vm257_vm2, %v1450_v28  ;;  %1426 = vmatmul.msk.bf16.gmra.mxu1 %vm257_vm2, %v1458_v29 }
  0x6e   :  { %1434 = vmatmul.msk.bf16.gmra.mxu2 %vm257_vm2, %v1466_v34  ;;  %1442 = vmatmul.msk.bf16.gmra.mxu3 %vm257_vm2, %v1474_v43 }
  0x7d   :  { %1419 = vmatmul.msk.bf16.gmra.mxu0 %vm257_vm2, %v1451_v32  ;;  %1427 = vmatmul.msk.bf16.gmra.mxu1 %vm257_vm2, %v1459_v33 }
  0x7e   :  { %1435 = vmatmul.msk.bf16.gmra.mxu2 %vm257_vm2, %v1467_v37  ;;  %1443 = vmatmul.msk.bf16.gmra.mxu3 %vm257_vm2, %v1475_v48 }
  0x8a   :  { %v1831_v36 = vpop.f32.mrf.mxu0  ;;  %v1839_v39 = vpop.f32.mrf.mxu1 }
  0x91   :  { %v1864_v49 = vpop.f32.mrf.mxu2  ;;  %v1887_v60 = vpop.f32.mrf.mxu3 }
  0x92   :  { %v1843_v40 = vpop.f32.mrf.mxu0  ;;  %v1845_v41 = vpop.f32.mrf.mxu1  ;;  %3643 = vst [vmem:[#allocation2_spill] sm:$0xff] %v1864_v49 }
  0x93   :  { %3645 = vst [vmem:[#allocation4_spill] sm:$0xff] %v1887_v60  ;;  %v530_v7 = vadd.f32 %v1843_v40, %v1831_v36 }
  0x99   :  { %v1871_v52 = vpop.f32.mrf.mxu2  ;;  %v1895_v0 = vpop.f32.mrf.mxu3 }
  0x9a   :  { %v1847_v42 = vpop.f32.mrf.mxu0  ;;  %v1853_v44 = vpop.f32.mrf.mxu1  ;;  %3644 = vst [vmem:[#allocation3_spill] sm:$0xff] %v1871_v52 }
  0x9b   :  { %v531_v9 = vadd.f32 %v530_v7, %v1847_v42 }
  0xa1   :  { %v1877_v55 = vpop.f32.mrf.mxu2  ;;  %v1903_v4 = vpop.f32.mrf.mxu3 }
  0xa2   :  { %v1855_v45 = vpop.f32.mrf.mxu0  ;;  %v1859_v47 = vpop.f32.mrf.mxu1 }
  0xa3   :  { %v532_v12 = vadd.f32 %v531_v9, %v1855_v45 }
  0xa9   :  { %v1885_v59 = vpop.f32.mrf.mxu2  ;;  %v1916_v11 = vpop.f32.mrf.mxu3 }
  0xaa   :  { %v1857_v46 = vpop.f32.mrf.mxu0  ;;  %v1869_v51 = vpop.f32.mrf.mxu1 }
  0xab   :  { %v533_v13 = vadd.f32 %v532_v12, %v1857_v46 }
  0xb1   :  { %v1893_v63 = vpop.f32.mrf.mxu2  ;;  %v1929_v20 = vpop.f32.mrf.mxu3 }
  0xb2   :  { %v1867_v50 = vpop.f32.mrf.mxu0  ;;  %v1875_v54 = vpop.f32.mrf.mxu1  ;;  %3649 = vst [vmem:[#allocation8_spill] sm:$0xff] %v1929_v20 }
  0xb3   :  { %v534_v14 = vadd.f32 %v533_v13, %v1867_v50 }
  0xb9   :  { %v1901_v3 = vpop.f32.mrf.mxu2  ;;  %v1942_v29 = vpop.f32.mrf.mxu3 }
  0xba   :  { %v1873_v53 = vpop.f32.mrf.mxu0  ;;  %v1881_v57 = vpop.f32.mrf.mxu1  ;;  %3646 = vst [vmem:[#allocation5_spill] sm:$0xff] %v1901_v3 }
  0xbb   :  { %v535_v16 = vadd.f32 %v534_v14, %v1873_v53  ;;  %3650 = vst [vmem:[#allocation9_spill] sm:$0xff] %v1942_v29 }
  0xc1   :  { %v1911_v8 = vpop.f32.mrf.mxu2  ;;  %v1955_v43 = vpop.f32.mrf.mxu3 }
  0xc2   :  { %v1879_v56 = vpop.f32.mrf.mxu0  ;;  %v1891_v62 = vpop.f32.mrf.mxu1  ;;  %3647 = vst [vmem:[#allocation6_spill] sm:$0xff] %v1911_v8 }
  0xc3   :  { %v536_v19 = vadd.f32 %v535_v16, %v1879_v56  ;;  %3651 = vst [vmem:[#allocation10_spill] sm:$0xff] %v1955_v43 }
  0xc9   :  { %v1926_v18 = vpop.f32.mrf.mxu2 }
  0xca   :  { %v1883_v58 = vpop.f32.mrf.mxu0  ;;  %v1899_v2 = vpop.f32.mrf.mxu1  ;;  %3648 = vst [vmem:[#allocation7_spill] sm:$0xff] %v1926_v18 }
  0xcb   :  { %v537_v21 = vadd.f32 %v536_v19, %v1883_v58  ;;  %v1966_v19 = vpop.f32.mrf.mxu3 }
  0xcc   :  { %3653 = vst [vmem:[#allocation12_spill] sm:$0xff] %v1966_v19 }
  0xd1   :  { %v1939_v27 = vpop.f32.mrf.mxu2 }
  0xd2   :  { %v1889_v61 = vpop.f32.mrf.mxu0  ;;  %v1907_v6 = vpop.f32.mrf.mxu1 }
  0xd3   :  { %v538_v22 = vadd.f32 %v537_v21, %v1889_v61 }
  0xd9   :  { %v1952_v37 = vpop.f32.mrf.mxu2 }
  0xda   :  { %v1897_v1 = vpop.f32.mrf.mxu0  ;;  %v1921_v15 = vpop.f32.mrf.mxu1 }
  0xdb   :  { %v539_v23 = vadd.f32 %v538_v22, %v1897_v1 }
  0xe1   :  { %v1963_v14 = vpop.f32.mrf.mxu2 }
  0xe2   :  { %v1905_v5 = vpop.f32.mrf.mxu0  ;;  %v1936_v25 = vpop.f32.mrf.mxu1  ;;  %3652 = vst [vmem:[#allocation11_spill] sm:$0xff] %v1963_v14 }
  0xe3   :  { %v540_v26 = vadd.f32 %v539_v23, %v1905_v5 }
  0xea   :  { %v1914_v10 = vpop.f32.mrf.mxu0  ;;  %v1949_v34 = vpop.f32.mrf.mxu1 }
  0xeb   :  { %v541_v28 = vadd.f32 %v540_v26, %v1914_v10 }
  0xf2   :  { %v1924_v17 = vpop.f32.mrf.mxu0  ;;  %v1960_v12 = vpop.f32.mrf.mxu1 }
  0xf3   :  { %v542_v30 = vadd.f32 %v541_v28, %v1924_v17 }
  0xfa   :  { %v1934_v24 = vpop.f32.mrf.mxu0  ;;  %v1971_v26 = vpop.f32.mrf.mxu1 }
  0xfb   :  { %v543_v31 = vadd.f32 %v542_v30, %v1934_v24  ;;  %3654 = vst [vmem:[#allocation13_spill] sm:$0xff] %v1971_v26  ;;  %v1974_v30 = vpop.f32.mrf.mxu2 }
  0xfc   :  { %3655 = vst [vmem:[#allocation14_spill] sm:$0xff] %v1974_v30 }
 0x102   :  { %v1946_v32 = vpop.f32.mrf.mxu0 }
 0x103   :  { %v544_v33 = vadd.f32 %v543_v31, %v1946_v32 }
 0x105   :  { %v545_v35 = vadd.f32 %v544_v33, %v1839_v39  ;;  %v1977_v33 = vpop.f32.mrf.mxu3 }
 0x106   :  { %3656 = vst [vmem:[#allocation15_spill] sm:$0xff] %v1977_v33 }
 0x107   :  { %v546_v38 = vadd.f32 %v545_v35, %v1845_v41 }
 0x109   :  { %v547_v48 = vadd.f32 %v546_v38, %v1853_v44 }
 0x10b   :  { %v548_v7 = vadd.f32 %v547_v48, %v1859_v47 }
 0x10d   :  { %v549_v9 = vadd.f32 %v548_v7, %v1869_v51  ;;  %v1982_v7 = vpop.f32.mrf.mxu1 }
 0x10f   :  { %v550_v13 = vadd.f32 %v549_v9, %v1875_v54 }
 0x111   :  { %v551_v16 = vadd.f32 %v550_v13, %v1881_v57  ;;  %v1985_v13 = vpop.f32.mrf.mxu2 }
 0x113   :  { %v552_v21 = vadd.f32 %v551_v16, %v1891_v62 }
 0x115   :  { %v553_v22 = vadd.f32 %v552_v21, %v1899_v2  ;;  %v1988_v21 = vpop.f32.mrf.mxu3 }
 0x116   :  { %3657 = vst [vmem:[#allocation16_spill] sm:$0xff] %v1988_v21 }
 0x117   :  { %v554_v23 = vadd.f32 %v553_v22, %v1907_v6 }
 0x119   :  { %v555_v28 = vadd.f32 %v554_v23, %v1921_v15 }
 0x11b   :  { %v556_v31 = vadd.f32 %v555_v28, %v1936_v25 }
 0x11d   :  { %v557_v35 = vadd.f32 %v556_v31, %v1949_v34 }
 0x11f   :  { %v558_v38 = vadd.f32 %v557_v35, %v1960_v12  ;;  %v1994_v35 = vpop.f32.mrf.mxu2 }
 0x121   :  { %v559_v48 = vadd.f32 %v558_v38, %v1971_v26  ;;  %v1997_v26 = vpop.f32.mrf.mxu3 }
 0x122   :  { %3658 = vst [vmem:[#allocation17_spill] sm:$0xff] %v1997_v26 }
 0x123   :  { %v560_v9 = vadd.f32 %v559_v48, %v1982_v7 }
 0x125   :  { %v561_v16 = vadd.f32 %v560_v9, %v1864_v49 }
 0x127   :  { %v562_v22 = vadd.f32 %v561_v16, %v1871_v52  ;;  %v2003_v52 = vpop.f32.mrf.mxu2 }
 0x129   :  { %v563_v23 = vadd.f32 %v562_v22, %v1877_v55 }
 0x12b   :  { %v564_v28 = vadd.f32 %v563_v23, %v1885_v59  ;;  %v2006_v23 = vpop.f32.mrf.mxu3 }
 0x12d   :  { %v565_v31 = vadd.f32 %v564_v28, %v1893_v63 }
 0x12f   :  { %v566_v38 = vadd.f32 %v565_v31, %v1901_v3 }
 0x131   :  { %v567_v48 = vadd.f32 %v566_v38, %v1911_v8  ;;  %v487_v8 = vpop.f32.mrf.mxu2 }
 0x133   :  { %v568_v9 = vadd.f32 %v567_v48, %v1926_v18  ;;  %v2012_v18 = vpop.f32.mrf.mxu3 }
 0x134   :  { %3659 = vst [vmem:[#allocation18_spill] sm:$0xff] %v2012_v18 }
 0x135   :  { %v569_v49 = vadd.f32 %v568_v9, %v1939_v27 }
 0x137   :  { %v570_v16 = vadd.f32 %v569_v49, %v1952_v37 }
 0x139   :  { %v571_v22 = vadd.f32 %v570_v16, %v1963_v14 }
 0x13b   :  { %v572_v28 = vadd.f32 %v571_v22, %v1974_v30  ;;  %v2019_v30 = vpop.f32.mrf.mxu3 }
 0x13d   :  { %v573_v31 = vadd.f32 %v572_v28, %v1985_v13 }
 0x13f   :  { %v574_v3 = vadd.f32 %v573_v31, %v1994_v35 }
 0x141   :  { %v575_v38 = vadd.f32 %v574_v3, %v2003_v52 }
 0x143   :  { %v576_v48 = vadd.f32 %v575_v38, %v487_v8 }
 0x145   :  { %v577_v49 = vadd.f32 %v576_v48, %v1887_v60  ;;  %v2026_v60 = vpop.f32.mrf.mxu3 }
 0x147   :  { %v578_v9 = vadd.f32 %v577_v49, %v1895_v0 }
 0x149   :  { %v579_v16 = vadd.f32 %v578_v9, %v1903_v4 }
 0x14b   :  { %v580_v14 = vadd.f32 %v579_v16, %v1916_v11  ;;  %v1684_v16 = vmov 512.0  }
 0x14c   :  { %1679 = vrcp.f32 %v1684_v16 }
 0x14d   :  { %v581_v22 = vadd.f32 %v580_v14, %v1929_v20 }
 0x14f   :  { %v582_v28 = vadd.f32 %v581_v22, %v1942_v29 }
 0x151   :  { %v583_v3 = vadd.f32 %v582_v28, %v1955_v43  ;;  %v527_v43 = vpop.f32.mrf.mxu3 }
 0x153   :  { %v584_v31 = vadd.f32 %v583_v3, %v1966_v19  ;;  %v1680_v19 = vpop.eup %1679 }
 0x154   :  { %vm604_vm3 = vweird.f32 %v1680_v19 }
 0x155   :  { %v585_v38 = vadd.f32 %v584_v31, %v1977_v33 }
 0x157   :  { %v586_v48 = vadd.f32 %v585_v38, %v1988_v21  ;;  %v600_v38 = vmul.f32 512.0, %v1680_v19 }
 0x159   :  { %v587_v49 = vadd.f32 %v586_v48, %v1997_v26  ;;  %v601_v29 = vsub.f32 1.0, %v600_v38 }
 0x15b   :  { %v588_v9 = vadd.f32 %v587_v49, %v2006_v23  ;;  %v602_v48 = vmul.f32 %v1680_v19, %v601_v29 }
 0x15d   :  { %v589_v14 = vadd.f32 %v588_v9, %v2012_v18  ;;  %v603_v49 = vadd.f32 %v1680_v19, %v602_v48 }
 0x15f   :  { %v590_v22 = vadd.f32 %v589_v14, %v2019_v30  ;;  %v2033_v18 = vsel %vm604_vm3, %v1680_v19, %v603_v49 }
 0x161   :  { %v591_v28 = vadd.f32 %v590_v22, %v2026_v60 }
 0x163   :  { %v592_v3 = vadd.f32 %v591_v28, %v527_v43 }
 0x165   :  { %v593_v31 = vrot.slane %v592_v3, 4 }
 0x167   :  { %v594_v33 = vadd.f32 %v593_v31, %v592_v3 }
 0x169   :  { %v595_v21 = vrot.slane %v594_v33, 2 }
 0x16b   :  { %v596_v20 = vadd.f32 %v595_v21, %v594_v33 }
 0x16d   :  { %v597_v26 = vrot.slane %v596_v20, 1 }
 0x16f   :  { %v598_v9 = vadd.f32 %v597_v26, %v596_v20 }
 0x171   :  { %v2036_v14 = vmul.f32 %v2033_v18, %v598_v9 }
 0x173   :  { %v2039_v16 = vsub.f32 %v487_v8, %v2036_v14  ;;  %v2042_v22 = vsub.f32 %v527_v43, %v2036_v14  ;;  %v2046_v28 = vsub.f32 %v1831_v36, %v2036_v14  ;;  %v2050_v29 = vsub.f32 %v1843_v40, %v2036_v14 }
 0x174   :  { %v2054_v20 = vsub.f32 %v1847_v42, %v2036_v14  ;;  %v2062_v43 = vsub.f32 %v1855_v45, %v2036_v14  ;;  %v2066_v36 = vsub.f32 %v1857_v46, %v2036_v14  ;;  %v2072_v42 = vsub.f32 %v1867_v50, %v2036_v14 }
 0x175   :  { %3660 = vst [vmem:[#allocation19_spill] sm:$0xff] %v2039_v16  ;;  %v671_v19 = vmul.f32 %v2046_v28, %v2046_v28  ;;  %v672_v8 = vmul.f32 %v2050_v29, %v2050_v29  ;;  %v2078_v45 = vsub.f32 %v1873_v53, %v2036_v14  ;;  %v2084_v31 = vsub.f32 %v1879_v56, %v2036_v14 }
 0x176   :  { %v673_v40 = vmul.f32 %v2054_v20, %v2054_v20  ;;  %v674_v33 = vmul.f32 %v2062_v43, %v2062_v43  ;;  %v675_v46 = vmul.f32 %v2066_v36, %v2066_v36  ;;  %v676_v50 = vmul.f32 %v2072_v42, %v2072_v42 }
 0x177   :  { %v735_v26 = vadd.f32 %v672_v8, %v671_v19  ;;  %v2090_v48 = vsub.f32 %v1883_v58, %v2036_v14  ;;  %v677_v53 = vmul.f32 %v2078_v45, %v2078_v45  ;;  %v2096_v9 = vsub.f32 %v1889_v61, %v2036_v14 }
 0x178   :  { %v678_v56 = vmul.f32 %v2084_v31, %v2084_v31  ;;  %v2102_v8 = vsub.f32 %v1897_v1, %v2036_v14 }
 0x179   :  { %v736_v21 = vadd.f32 %v735_v26, %v673_v40  ;;  %v679_v58 = vmul.f32 %v2090_v48, %v2090_v48  ;;  %v2108_v26 = vsub.f32 %v1905_v5, %v2036_v14  ;;  %v680_v61 = vmul.f32 %v2096_v9, %v2096_v9 }
 0x17a   :  { %v681_v1 = vmul.f32 %v2102_v8, %v2102_v8 }
 0x17b   :  { %v737_v3 = vadd.f32 %v736_v21, %v674_v33  ;;  %v2114_v21 = vsub.f32 %v1914_v10, %v2036_v14  ;;  %v682_v5 = vmul.f32 %v2108_v26, %v2108_v26 }
 0x17d   :  { %v738_v38 = vadd.f32 %v737_v3, %v675_v46  ;;  %v2120_v3 = vsub.f32 %v1924_v17, %v2036_v14  ;;  %v683_v10 = vmul.f32 %v2114_v21, %v2114_v21 }
 0x17f   :  { %v739_v49 = vadd.f32 %v738_v38, %v676_v50  ;;  %v2126_v38 = vsub.f32 %v1934_v24, %v2036_v14  ;;  %v684_v17 = vmul.f32 %v2120_v3, %v2120_v3 }
 0x181   :  { %v740_v19 = vadd.f32 %v739_v49, %v677_v53  ;;  %v2132_v49 = vsub.f32 %v1946_v32, %v2036_v14  ;;  %v685_v24 = vmul.f32 %v2126_v38, %v2126_v38 }
 0x183   :  { %v741_v40 = vadd.f32 %v740_v19, %v678_v56  ;;  %v2138_v19 = vsub.f32 %v1839_v39, %v2036_v14  ;;  %v686_v32 = vmul.f32 %v2132_v49, %v2132_v49 }
 0x185   :  { %v742_v33 = vadd.f32 %v741_v40, %v679_v58  ;;  %v2144_v40 = vsub.f32 %v1845_v41, %v2036_v14  ;;  %v687_v39 = vmul.f32 %v2138_v19, %v2138_v19 }
 0x187   :  { %v743_v46 = vadd.f32 %v742_v33, %v680_v61  ;;  %v2150_v33 = vsub.f32 %v1853_v44, %v2036_v14  ;;  %v688_v41 = vmul.f32 %v2144_v40, %v2144_v40 }
 0x189   :  { %v744_v50 = vadd.f32 %v743_v46, %v681_v1  ;;  %v2156_v46 = vsub.f32 %v1859_v47, %v2036_v14  ;;  %v689_v44 = vmul.f32 %v2150_v33, %v2150_v33 }
 0x18b   :  { %v745_v53 = vadd.f32 %v744_v50, %v682_v5  ;;  %v2162_v50 = vsub.f32 %v1869_v51, %v2036_v14  ;;  %v690_v47 = vmul.f32 %v2156_v46, %v2156_v46 }
 0x18d   :  { %v746_v56 = vadd.f32 %v745_v53, %v683_v10  ;;  %v2168_v53 = vsub.f32 %v1875_v54, %v2036_v14  ;;  %v691_v51 = vmul.f32 %v2162_v50, %v2162_v50 }
 0x18f   :  { %v747_v58 = vadd.f32 %v746_v56, %v684_v17  ;;  %v2174_v56 = vsub.f32 %v1881_v57, %v2036_v14  ;;  %v692_v54 = vmul.f32 %v2168_v53, %v2168_v53 }
 0x191   :  { %v748_v61 = vadd.f32 %v747_v58, %v685_v24  ;;  %v2180_v58 = vsub.f32 %v1891_v62, %v2036_v14  ;;  %v693_v57 = vmul.f32 %v2174_v56, %v2174_v56 }
 0x193   :  { %v749_v1 = vadd.f32 %v748_v61, %v686_v32  ;;  %v2186_v61 = vsub.f32 %v1899_v2, %v2036_v14  ;;  %v694_v62 = vmul.f32 %v2180_v58, %v2180_v58 }
 0x195   :  { %v750_v5 = vadd.f32 %v749_v1, %v687_v39  ;;  %v2192_v1 = vsub.f32 %v1907_v6, %v2036_v14  ;;  %v695_v2 = vmul.f32 %v2186_v61, %v2186_v61 }
 0x197   :  { %v751_v10 = vadd.f32 %v750_v5, %v688_v41  ;;  %v2198_v5 = vsub.f32 %v1921_v15, %v2036_v14  ;;  %v696_v6 = vmul.f32 %v2192_v1, %v2192_v1 }
 0x199   :  { %v752_v17 = vadd.f32 %v751_v10, %v689_v44  ;;  %v2204_v10 = vsub.f32 %v1936_v25, %v2036_v14  ;;  %v697_v15 = vmul.f32 %v2198_v5, %v2198_v5 }
 0x19b   :  { %v753_v24 = vadd.f32 %v752_v17, %v690_v47  ;;  %v2210_v17 = vsub.f32 %v1949_v34, %v2036_v14  ;;  %v698_v25 = vmul.f32 %v2204_v10, %v2204_v10 }
 0x19d   :  { %v754_v32 = vadd.f32 %v753_v24, %v691_v51  ;;  %v2216_v24 = vsub.f32 %v1960_v12, %v2036_v14  ;;  %v699_v34 = vmul.f32 %v2210_v17, %v2210_v17 }
 0x19f   :  { %v755_v39 = vadd.f32 %v754_v32, %v692_v54  ;;  %v3661_v32 = vld [vmem:[#allocation13_spill] sm:$0xff]  ;;  %v700_v12 = vmul.f32 %v2216_v24, %v2216_v24 }
 0x1a1   :  { %v756_v41 = vadd.f32 %v755_v39, %v693_v57  ;;  %v2222_v57 = vsub.f32 %v3661_v32, %v2036_v14 }
 0x1a3   :  { %v757_v44 = vadd.f32 %v756_v41, %v694_v62  ;;  %v2228_v62 = vsub.f32 %v1982_v7, %v2036_v14 }
 0x1a5   :  { %v758_v47 = vadd.f32 %v757_v44, %v695_v2  ;;  %v3662_v2 = vld [vmem:[#allocation2_spill] sm:$0xff]  ;;  %v702_v7 = vmul.f32 %v2228_v62, %v2228_v62 }
 0x1a6   :  { %v2234_v44 = vsub.f32 %v3662_v2, %v2036_v14  ;;  %v2258_v2 = vsub.f32 %v1893_v63, %v2036_v14 }
 0x1a7   :  { %v759_v51 = vadd.f32 %v758_v47, %v696_v6  ;;  %v701_v6 = vmul.f32 %v2222_v57, %v2222_v57 }
 0x1a8   :  { %v703_v32 = vmul.f32 %v2234_v44, %v2234_v44  ;;  %v707_v63 = vmul.f32 %v2258_v2, %v2258_v2 }
 0x1a9   :  { %v760_v54 = vadd.f32 %v759_v51, %v697_v15  ;;  %v3663_v15 = vld [vmem:[#allocation3_spill] sm:$0xff] }
 0x1aa   :  { %v2240_v51 = vsub.f32 %v3663_v15, %v2036_v14 }
 0x1ab   :  { %v761_v39 = vadd.f32 %v760_v54, %v698_v25  ;;  %v2246_v54 = vsub.f32 %v1877_v55, %v2036_v14 }
 0x1ac   :  { %3664 = vst [vmem:[#allocation13_spill] sm:$0xff] %v2240_v51 }
 0x1ad   :  { %v762_v41 = vadd.f32 %v761_v39, %v699_v34  ;;  %3665 = vst [vmem:[#allocation2_spill] sm:$0xff] %v2246_v54  ;;  %v2252_v39 = vsub.f32 %v1885_v59, %v2036_v14  ;;  %v705_v55 = vmul.f32 %v2246_v54, %v2246_v54 }
 0x1af   :  { %v763_v47 = vadd.f32 %v762_v41, %v700_v12  ;;  %v704_v12 = vmul.f32 %v2240_v51, %v2240_v51  ;;  %v706_v59 = vmul.f32 %v2252_v39, %v2252_v39 }
 0x1b1   :  { %v764_v25 = vadd.f32 %v763_v47, %v701_v6  ;;  %v3666_v47 = vld [vmem:[#allocation5_spill] sm:$0xff] }
 0x1b2   :  { %v2264_v15 = vsub.f32 %v3666_v47, %v2036_v14  ;;  %v2282_v47 = vsub.f32 %v1939_v27, %v2036_v14 }
 0x1b3   :  { %v765_v34 = vadd.f32 %v764_v25, %v702_v7  ;;  %v3668_v25 = vld [vmem:[#allocation6_spill] sm:$0xff] }
 0x1b4   :  { %3667 = vst [vmem:[#allocation3_spill] sm:$0xff] %v2264_v15  ;;  %v2270_v51 = vsub.f32 %v3668_v25, %v2036_v14  ;;  %v2288_v25 = vsub.f32 %v1952_v37, %v2036_v14  ;;  %v711_v27 = vmul.f32 %v2282_v47, %v2282_v47 }
 0x1b5   :  { %v766_v41 = vadd.f32 %v765_v34, %v703_v32  ;;  %v3670_v34 = vld [vmem:[#allocation7_spill] sm:$0xff] }
 0x1b6   :  { %3669 = vst [vmem:[#allocation5_spill] sm:$0xff] %v2270_v51  ;;  %v2276_v54 = vsub.f32 %v3670_v34, %v2036_v14  ;;  %v3671_v34 = vld [vmem:[#allocation11_spill] sm:$0xff]  ;;  %v712_v37 = vmul.f32 %v2288_v25, %v2288_v25 }
 0x1b7   :  { %v767_v6 = vadd.f32 %v766_v41, %v704_v12  ;;  %v708_v12 = vmul.f32 %v2264_v15, %v2264_v15  ;;  %v2294_v15 = vsub.f32 %v3671_v34, %v2036_v14  ;;  %v2312_v34 = vsub.f32 %v1994_v35, %v2036_v14 }
 0x1b9   :  { %v768_v7 = vadd.f32 %v767_v6, %v705_v55  ;;  %v709_v55 = vmul.f32 %v2270_v51, %v2270_v51 }
 0x1bb   :  { %v769_v32 = vadd.f32 %v768_v7, %v706_v59  ;;  %v710_v59 = vmul.f32 %v2276_v54, %v2276_v54 }
 0x1bd   :  { %v770_v41 = vadd.f32 %v769_v32, %v707_v63  ;;  %v3672_v32 = vld [vmem:[#allocation14_spill] sm:$0xff] }
 0x1be   :  { %v2300_v51 = vsub.f32 %v3672_v32, %v2036_v14  ;;  %v2318_v32 = vsub.f32 %v2003_v52, %v2036_v14  ;;  %v2332_v52 = vsub.f32 %v1895_v0, %v2036_v14 }
 0x1bf   :  { %v771_v6 = vadd.f32 %v770_v41, %v708_v12  ;;  %v2306_v41 = vsub.f32 %v1985_v13, %v2036_v14 }
 0x1c0   :  { %3673 = vst [vmem:[#allocation6_spill] sm:$0xff] %v2300_v51  ;;  %v720_v0 = vmul.f32 %v2332_v52, %v2332_v52 }
 0x1c1   :  { %v772_v7 = vadd.f32 %v771_v6, %v709_v55  ;;  %v713_v55 = vmul.f32 %v2294_v15, %v2294_v15  ;;  %v715_v13 = vmul.f32 %v2306_v41, %v2306_v41  ;;  %3676 = vst [vmem:[#allocation11_spill] sm:$0xff] %v2332_v52 }
 0x1c3   :  { %v773_v63 = vadd.f32 %v772_v7, %v710_v59  ;;  %v714_v59 = vmul.f32 %v2300_v51, %v2300_v51  ;;  %v717_v51 = vmul.f32 %v2318_v32, %v2318_v32 }
 0x1c5   :  { %v774_v12 = vadd.f32 %v773_v63, %v711_v27  ;;  %v716_v63 = vmul.f32 %v2312_v34, %v2312_v34 }
 0x1c7   :  { %v775_v6 = vadd.f32 %v774_v12, %v712_v37  ;;  %v3674_v12 = vld [vmem:[#allocation4_spill] sm:$0xff] }
 0x1c8   :  { %v2326_v35 = vsub.f32 %v3674_v12, %v2036_v14  ;;  %v2344_v12 = vsub.f32 %v1916_v11, %v2036_v14 }
 0x1c9   :  { %v776_v7 = vadd.f32 %v775_v6, %v713_v55  ;;  %v718_v6 = vmul.f32 %v2039_v16, %v2039_v16 }
 0x1ca   :  { %3675 = vst [vmem:[#allocation7_spill] sm:$0xff] %v2326_v35  ;;  %v722_v11 = vmul.f32 %v2344_v12, %v2344_v12 }
 0x1cb   :  { %v777_v27 = vadd.f32 %v776_v7, %v714_v59  ;;  %v2338_v7 = vsub.f32 %v1903_v4, %v2036_v14  ;;  %3678 = vst [vmem:[#allocation4_spill] sm:$0xff] %v2344_v12 }
 0x1cd   :  { %v778_v37 = vadd.f32 %v777_v27, %v715_v13  ;;  %3677 = vst [vmem:[#allocation14_spill] sm:$0xff] %v2338_v7  ;;  %v719_v13 = vmul.f32 %v2326_v35, %v2326_v35  ;;  %v721_v4 = vmul.f32 %v2338_v7, %v2338_v7 }
 0x1cf   :  { %v779_v55 = vadd.f32 %v778_v37, %v716_v63  ;;  %v3679_v37 = vld [vmem:[#allocation8_spill] sm:$0xff] }
 0x1d0   :  { %v2350_v16 = vsub.f32 %v3679_v37, %v2036_v14  ;;  %v3684_v37 = vld [vmem:[#allocation12_spill] sm:$0xff] }
 0x1d1   :  { %v780_v59 = vadd.f32 %v779_v55, %v717_v51  ;;  %v3681_v55 = vld [vmem:[#allocation9_spill] sm:$0xff]  ;;  %v2368_v7 = vsub.f32 %v3684_v37, %v2036_v14 }
 0x1d2   :  { %3680 = vst [vmem:[#allocation8_spill] sm:$0xff] %v2350_v16  ;;  %v2356_v35 = vsub.f32 %v3681_v55, %v2036_v14  ;;  %v3686_v55 = vld [vmem:[#allocation15_spill] sm:$0xff]  ;;  %v3690_v37 = vld [vmem:[#allocation17_spill] sm:$0xff] }
 0x1d3   :  { %v781_v27 = vadd.f32 %v780_v59, %v718_v6  ;;  %v3683_v59 = vld [vmem:[#allocation10_spill] sm:$0xff]  ;;  %v2374_v12 = vsub.f32 %v3686_v55, %v2036_v14  ;;  %v2392_v55 = vsub.f32 %v2006_v23, %v2036_v14 }
 0x1d4   :  { %3682 = vst [vmem:[#allocation9_spill] sm:$0xff] %v2356_v35  ;;  %v2362_v52 = vsub.f32 %v3683_v59, %v2036_v14  ;;  %v3688_v59 = vld [vmem:[#allocation16_spill] sm:$0xff] }
 0x1d5   :  { %v782_v63 = vadd.f32 %v781_v27, %v719_v13  ;;  %v723_v13 = vmul.f32 %v2350_v16, %v2350_v16  ;;  %3685 = vst [vmem:[#allocation10_spill] sm:$0xff] %v2368_v7  ;;  %v2380_v16 = vsub.f32 %v3688_v59, %v2036_v14  ;;  %v3693_v59 = vld [vmem:[#allocation18_spill] sm:$0xff]  ;;  %v730_v23 = vmul.f32 %v2392_v55, %v2392_v55 }
 0x1d6   :  { %3687 = vst [vmem:[#allocation12_spill] sm:$0xff] %v2374_v12 }
 0x1d7   :  { %v783_v51 = vadd.f32 %v782_v63, %v720_v0  ;;  %v724_v0 = vmul.f32 %v2356_v35, %v2356_v35  ;;  %3689 = vst [vmem:[#allocation15_spill] sm:$0xff] %v2380_v16  ;;  %v2386_v35 = vsub.f32 %v3690_v37, %v2036_v14  ;;  %v2404_v37 = vsub.f32 %v2019_v30, %v2036_v14 }
 0x1d8   :  { %3692 = vst [vmem:[#allocation17_spill] sm:$0xff] %v2392_v55  ;;  %v734_v55 = vmul.f32 %v2042_v22, %v2042_v22 }
 0x1d9   :  { %v784_v6 = vadd.f32 %v783_v51, %v721_v4  ;;  %v725_v4 = vmul.f32 %v2362_v52, %v2362_v52  ;;  %3691 = vst [vmem:[#allocation16_spill] sm:$0xff] %v2386_v35 }
 0x1da   :  { %3695 = vst [vmem:[#allocation20_spill] sm:$0xff] %v2404_v37 }
 0x1db   :  { %v785_v27 = vadd.f32 %v784_v6, %v722_v11  ;;  %v726_v11 = vmul.f32 %v2368_v7, %v2368_v7  ;;  %v2398_v7 = vsub.f32 %v3693_v59, %v2036_v14  ;;  %v732_v59 = vmul.f32 %v2404_v37, %v2404_v37 }
 0x1dd   :  { %v786_v63 = vadd.f32 %v785_v27, %v723_v13  ;;  %v727_v13 = vmul.f32 %v2374_v12, %v2374_v12  ;;  %3694 = vst [vmem:[#allocation18_spill] sm:$0xff] %v2398_v7 }
 0x1df   :  { %v787_v51 = vadd.f32 %v786_v63, %v724_v0  ;;  %v728_v0 = vmul.f32 %v2380_v16, %v2380_v16 }
 0x1e1   :  { %v788_v6 = vadd.f32 %v787_v51, %v725_v4  ;;  %v729_v4 = vmul.f32 %v2386_v35, %v2386_v35 }
 0x1e3   :  { %v789_v27 = vadd.f32 %v788_v6, %v726_v11  ;;  %v2410_v6 = vsub.f32 %v2026_v60, %v2036_v14 }
 0x1e5   :  { %v790_v63 = vadd.f32 %v789_v27, %v727_v13  ;;  %3696 = vst [vmem:[#allocation21_spill] sm:$0xff] %v2410_v6  ;;  %v731_v13 = vmul.f32 %v2398_v7, %v2398_v7  ;;  %v733_v30 = vmul.f32 %v2410_v6, %v2410_v6 }
 0x1e7   :  { %v791_v51 = vadd.f32 %v790_v63, %v728_v0 }
 0x1e9   :  { %v792_v11 = vadd.f32 %v791_v51, %v729_v4 }
 0x1eb   :  { %v793_v27 = vadd.f32 %v792_v11, %v730_v23 }
 0x1ed   :  { %v794_v0 = vadd.f32 %v793_v27, %v731_v13 }
 0x1ef   :  { %v795_v63 = vadd.f32 %v794_v0, %v732_v59 }
 0x1f1   :  { %v796_v4 = vadd.f32 %v795_v63, %v733_v30  ;;  %v3699_v30 = vld [vmem:[#allocation3_spill] sm:$0xff]  ;;  %v3700_v63 = vld [vmem:[#allocation5_spill] sm:$0xff] }
 0x1f3   :  { %v797_v51 = vadd.f32 %v796_v4, %v734_v55 }
 0x1f5   :  { %v798_v35 = vrot.slane %v797_v51, 4 }
 0x1f7   :  { %v799_v60 = vadd.f32 %v798_v35, %v797_v51 }
 0x1f9   :  { %v800_v14 = vrot.slane %v799_v60, 2 }
 0x1fb   :  { %v801_v16 = vadd.f32 %v800_v14, %v799_v60  ;;  %v3701_v14 = vld [vmem:[#allocation6_spill] sm:$0xff] }
 0x1fd   :  { %v802_v12 = vrot.slane %v801_v16, 1 }
 0x1ff   :  { %v803_v7 = vadd.f32 %v802_v12, %v801_v16 }
 0x201   :  { %v804_v23 = vmul.f32 %v803_v7, %v2033_v18 }
 0x203   :  { %v805_v11 = vadd.f32 1e-05, %v804_v23 }
 0x205   :  { %1681 = vrsqrt.f32 %v805_v11  ;;  %vm812_vm5 = vweird.f32 %v805_v11 }
 0x20b   :  { %v1682_v13 = vpop.eup %1681 }
 0x20c   :  { %v807_v27 = vmul.f32 %v1682_v13, %v805_v11  ;;  %vm813_vm4 = vweird.f32 %v1682_v13  ;;  %v3702_v11 = vld [vmem:[#allocation19_spill] sm:$0xff] }
 0x20d   :  { %vm814_vm6 = vmor %vm812_vm5, %vm813_vm4 }
 0x20e   :  { %v808_v37 = vmul.f32 %v1682_v13, %v807_v27 }
 0x210   :  { %v809_v6 = vmul.f32 0.5, %v808_v37  ;;  %v3697_v37 = vld [vmem:[#allocation13_spill] sm:$0xff] }
 0x212   :  { %v810_v59 = vsub.f32 1.5, %v809_v6  ;;  %v3698_v6 = vld [vmem:[#allocation2_spill] sm:$0xff] }
 0x214   :  { %v811_v0 = vmul.f32 %v1682_v13, %v810_v59  ;;  %v3704_v59 = vld [vmem:[#allocation11_spill] sm:$0xff] }
 0x216   :  { %v2421_v55 = vsel %vm814_vm6, %v1682_v13, %v811_v0  ;;  %v3703_v13 = vld [vmem:[#allocation7_spill] sm:$0xff]  ;;  %v3705_v0 = vld [vmem:[#allocation14_spill] sm:$0xff] }
 0x217   :  { %v2425_v35 = vmul.f32 %v2421_v55, %v2046_v28  ;;  %v2429_v18 = vmul.f32 %v2421_v55, %v2050_v29  ;;  %v2433_v16 = vmul.f32 %v2421_v55, %v2054_v20  ;;  %v2437_v7 = vmul.f32 %v2421_v55, %v2062_v43 }
 0x218   :  { %v2441_v12 = vmul.f32 %v2421_v55, %v2066_v36  ;;  %v2445_v28 = vmul.f32 %v2421_v55, %v2072_v42  ;;  %v2449_v29 = vmul.f32 %v2421_v55, %v2078_v45  ;;  %v2453_v20 = vmul.f32 %v2421_v55, %v2084_v31 }
 0x219   :  { %v2457_v43 = vmul.f32 %v2421_v55, %v2090_v48  ;;  %v2461_v36 = vmul.f32 %v2421_v55, %v2096_v9  ;;  %v2465_v42 = vmul.f32 %v2421_v55, %v2102_v8  ;;  %v2469_v45 = vmul.f32 %v2421_v55, %v2108_v26 }
 0x21a   :  { %v2473_v31 = vmul.f32 %v2421_v55, %v2114_v21  ;;  %v2477_v48 = vmul.f32 %v2421_v55, %v2120_v3  ;;  %v2481_v9 = vmul.f32 %v2421_v55, %v2126_v38  ;;  %v2485_v8 = vmul.f32 %v2421_v55, %v2132_v49 }
 0x21b   :  { %v2489_v26 = vmul.f32 %v2421_v55, %v2138_v19  ;;  %v2493_v21 = vmul.f32 %v2421_v55, %v2144_v40  ;;  %v2497_v3 = vmul.f32 %v2421_v55, %v2150_v33  ;;  %v2501_v38 = vmul.f32 %v2421_v55, %v2156_v46 }
 0x21c   :  { %v2505_v49 = vmul.f32 %v2421_v55, %v2162_v50  ;;  %v2509_v19 = vmul.f32 %v2421_v55, %v2168_v53  ;;  %v2513_v40 = vmul.f32 %v2421_v55, %v2174_v56  ;;  %v2517_v33 = vmul.f32 %v2421_v55, %v2180_v58 }
 0x21d   :  { %v2521_v46 = vmul.f32 %v2421_v55, %v2186_v61  ;;  %v2525_v50 = vmul.f32 %v2421_v55, %v2192_v1  ;;  %v2529_v53 = vmul.f32 %v2421_v55, %v2198_v5  ;;  %v2533_v56 = vmul.f32 %v2421_v55, %v2204_v10 }
 0x21e   :  { %v2537_v58 = vmul.f32 %v2421_v55, %v2210_v17  ;;  %v2541_v61 = vmul.f32 %v2421_v55, %v2216_v24  ;;  %v2545_v1 = vmul.f32 %v2421_v55, %v2222_v57  ;;  %v2549_v5 = vmul.f32 %v2421_v55, %v2228_v62 }
 0x21f   :  { %v2553_v10 = vmul.f32 %v2421_v55, %v2234_v44  ;;  %v2557_v17 = vmul.f32 %v2421_v55, %v3697_v37  ;;  %v2561_v24 = vmul.f32 %v2421_v55, %v3698_v6  ;;  %v2565_v57 = vmul.f32 %v2421_v55, %v2252_v39  ;;  %v3707_v37 = vld [vmem:[#allocation4_spill] sm:$0xff]  ;;  %v2634_v6 = vld [vmem:[%s3565_s2] ss:$0 sm:$0xff] }
 0x220   :  { %v2569_v62 = vmul.f32 %v2421_v55, %v2258_v2  ;;  %v2573_v44 = vmul.f32 %v2421_v55, %v3699_v30  ;;  %v2577_v4 = vmul.f32 %v2421_v55, %v3700_v63  ;;  %v2581_v51 = vmul.f32 %v2421_v55, %v2276_v54  ;;  %v3709_v30 = vld [vmem:[#allocation8_spill] sm:$0xff] }
 0x221   :  { %v2585_v39 = vmul.f32 %v2421_v55, %v2282_v47  ;;  %v2589_v2 = vmul.f32 %v2421_v55, %v2288_v25  ;;  %v2593_v60 = vmul.f32 %v2421_v55, %v2294_v15  ;;  %v2597_v23 = vmul.f32 %v2421_v55, %v3701_v14  ;;  %v3711_v14 = vld [vmem:[#allocation9_spill] sm:$0xff] }
 0x222   :  { %v2601_v54 = vmul.f32 %v2421_v55, %v2306_v41  ;;  %v2605_v47 = vmul.f32 %v2421_v55, %v2312_v34  ;;  %v2609_v25 = vmul.f32 %v2421_v55, %v2318_v32  ;;  %v2613_v15 = vmul.f32 %v2421_v55, %v3702_v11 }
 0x223   :  { %v2617_v27 = vmul.f32 %v2421_v55, %v3703_v13  ;;  %v2621_v41 = vmul.f32 %v2421_v55, %v3704_v59  ;;  %v2625_v34 = vmul.f32 %v2421_v55, %v3705_v0  ;;  %v2629_v32 = vmul.f32 %v2421_v55, %v3707_v37  ;;  %v3714_v59 = vld [vmem:[#allocation10_spill] sm:$0xff]  ;;  %v3716_v37 = vld [vmem:[#allocation12_spill] sm:$0xff] }
 0x224   :  { %v2638_v63 = vmul.f32 %v2421_v55, %v3709_v30  ;;  %v2642_v11 = vmul.f32 %v2421_v55, %v3711_v14  ;;  %v2646_v13 = vmul.f32 %v2421_v55, %v2362_v52  ;;  %v2650_v0 = vmul.f32 %v2421_v55, %v3714_v59 }
 0x225   :  { %3706 = vst [vmem:[#allocation13_spill] sm:$0xff] %v2625_v34  ;;  %v3718_v34 = vld [vmem:[#allocation15_spill] sm:$0xff] }
 0x226   :  { %3708 = vst [vmem:[#allocation2_spill] sm:$0xff] %v2629_v32  ;;  %v2654_v32 = vmul.f32 %v2421_v55, %v3716_v37  ;;  %v2658_v30 = vmul.f32 %v2421_v55, %v3718_v34 }
 0x227   :  { %3710 = vst [vmem:[#allocation3_spill] sm:$0xff] %v2638_v63  ;;  %v3719_v63 = vld [vmem:[#allocation16_spill] sm:$0xff] }
 0x228   :  { %3712 = vst [vmem:[#allocation5_spill] sm:$0xff] %v2642_v11  ;;  %v2662_v14 = vmul.f32 %v2421_v55, %v3719_v63  ;;  %v3720_v11 = vld [vmem:[#allocation17_spill] sm:$0xff]  ;;  %v2682_v63 = vmul.f32 %v2421_v55, %v2042_v22  ;;  %v2702_v22 = vmul.f32 %v2634_v6, %v2441_v12  ;;  %v2726_v12 = vmul.f32 %v2634_v6, %v2465_v42 }
 0x229   :  { %3713 = vst [vmem:[#allocation6_spill] sm:$0xff] %v2646_v13  ;;  %v2666_v52 = vmul.f32 %v2421_v55, %v3720_v11  ;;  %v3721_v13 = vld [vmem:[#allocation18_spill] sm:$0xff]  ;;  %v2686_v11 = vmul.f32 %v2634_v6, %v2425_v35  ;;  %v2710_v35 = vmul.f32 %v2634_v6, %v2449_v29  ;;  %v2734_v29 = vmul.f32 %v2634_v6, %v2473_v31 }
 0x22a   :  { %3715 = vst [vmem:[#allocation19_spill] sm:$0xff] %v2650_v0  ;;  %v2670_v59 = vmul.f32 %v2421_v55, %v3721_v13  ;;  %v3722_v0 = vld [vmem:[#allocation20_spill] sm:$0xff]  ;;  %v2690_v13 = vmul.f32 %v2634_v6, %v2429_v18  ;;  %v2714_v18 = vmul.f32 %v2634_v6, %v2453_v20  ;;  %v2738_v20 = vmul.f32 %v2634_v6, %v2477_v48 }
 0x22b   :  { %3717 = vst [vmem:[#allocation7_spill] sm:$0xff] %v2654_v32  ;;  %v2674_v37 = vmul.f32 %v2421_v55, %v3722_v0  ;;  %v3723_v32 = vld [vmem:[#allocation21_spill] sm:$0xff]  ;;  %v2694_v0 = vmul.f32 %v2634_v6, %v2433_v16  ;;  %v2718_v16 = vmul.f32 %v2634_v6, %v2457_v43  ;;  %v2742_v43 = vmul.f32 %v2634_v6, %v2481_v9 }
 0x22c   :  { %v2678_v34 = vmul.f32 %v2421_v55, %v3723_v32  ;;  %v2698_v32 = vmul.f32 %v2634_v6, %v2437_v7  ;;  %v2706_v55 = vmul.f32 %v2634_v6, %v2445_v28  ;;  %v2722_v7 = vmul.f32 %v2634_v6, %v2461_v36 }
 0x22d   :  { %v2730_v28 = vmul.f32 %v2634_v6, %v2469_v45  ;;  %v2746_v36 = vmul.f32 %v2634_v6, %v2485_v8  ;;  %v2750_v42 = vmul.f32 %v2634_v6, %v2489_v26  ;;  %v2754_v45 = vmul.f32 %v2634_v6, %v2493_v21 }
 0x22e   :  { %v2758_v31 = vmul.f32 %v2634_v6, %v2497_v3  ;;  %v2762_v48 = vmul.f32 %v2634_v6, %v2501_v38  ;;  %v2766_v9 = vmul.f32 %v2634_v6, %v2505_v49  ;;  %v2770_v8 = vmul.f32 %v2634_v6, %v2509_v19 }
 0x22f   :  { %v2774_v26 = vmul.f32 %v2634_v6, %v2513_v40  ;;  %v2778_v21 = vmul.f32 %v2634_v6, %v2517_v33  ;;  %v2782_v3 = vmul.f32 %v2634_v6, %v2521_v46  ;;  %v2786_v38 = vmul.f32 %v2634_v6, %v2525_v50 }
 0x230   :  { %v2790_v49 = vmul.f32 %v2634_v6, %v2529_v53  ;;  %v2794_v19 = vmul.f32 %v2634_v6, %v2533_v56  ;;  %v2798_v40 = vmul.f32 %v2634_v6, %v2537_v58  ;;  %v2802_v33 = vmul.f32 %v2634_v6, %v2541_v61 }
 0x231   :  { %v2806_v46 = vmul.f32 %v2634_v6, %v2545_v1  ;;  %v2810_v50 = vmul.f32 %v2634_v6, %v2549_v5  ;;  %v2814_v53 = vmul.f32 %v2634_v6, %v2553_v10  ;;  %v2818_v56 = vmul.f32 %v2634_v6, %v2557_v17 }
 0x232   :  { %v2822_v58 = vmul.f32 %v2634_v6, %v2561_v24  ;;  %v2826_v61 = vmul.f32 %v2634_v6, %v2565_v57  ;;  %v2830_v1 = vmul.f32 %v2634_v6, %v2569_v62  ;;  %v2834_v5 = vmul.f32 %v2634_v6, %v2573_v44 }
 0x233   :  { %v2838_v10 = vmul.f32 %v2634_v6, %v2577_v4  ;;  %v2842_v17 = vmul.f32 %v2634_v6, %v2581_v51  ;;  %v2846_v24 = vmul.f32 %v2634_v6, %v2585_v39  ;;  %v2850_v57 = vmul.f32 %v2634_v6, %v2589_v2 }
 0x234   :  { %v2854_v62 = vmul.f32 %v2634_v6, %v2593_v60  ;;  %v2858_v44 = vmul.f32 %v2634_v6, %v2597_v23  ;;  %v2862_v4 = vmul.f32 %v2634_v6, %v2601_v54  ;;  %v2866_v51 = vmul.f32 %v2634_v6, %v2605_v47  ;;  %v3729_v54 = vld [vmem:[#allocation13_spill] sm:$0xff] }
 0x235   :  { %v2870_v39 = vmul.f32 %v2634_v6, %v2609_v25  ;;  %v2874_v2 = vmul.f32 %v2634_v6, %v2613_v15  ;;  %v2878_v60 = vmul.f32 %v2634_v6, %v2617_v27  ;;  %v2882_v23 = vmul.f32 %v2634_v6, %v2621_v41  ;;  %v2895_v15 = vld [vmem:[%s3566_s3] ss:$0 sm:$0xff] }
 0x236   :  { %3724 = vst [vmem:[#allocation11_spill] sm:$0xff] %v2866_v51  ;;  %v2886_v47 = vmul.f32 %v2634_v6, %v3729_v54  ;;  %v3731_v51 = vld [vmem:[#allocation2_spill] sm:$0xff] }
 0x237   :  { %3725 = vst [vmem:[#allocation14_spill] sm:$0xff] %v2870_v39  ;;  %v2890_v25 = vmul.f32 %v2634_v6, %v3731_v51 }
 0x238   :  { %3726 = vst [vmem:[#allocation4_spill] sm:$0xff] %v2874_v2  ;;  %v3733_v2 = vld [vmem:[#allocation3_spill] sm:$0xff] }
 0x239   :  { %3727 = vst [vmem:[#allocation8_spill] sm:$0xff] %v2878_v60  ;;  %v2899_v27 = vmul.f32 %v2634_v6, %v3733_v2  ;;  %v3734_v60 = vld [vmem:[#allocation5_spill] sm:$0xff]  ;;  %v2919_v2 = vmul.f32 %v2634_v6, %v2658_v30  ;;  %v2939_v30 = vmul.f32 %v2634_v6, %v2678_v34  ;;  %v2959_v34 = vadd.f32 %v2895_v15, %v2698_v32 }
 0x23a   :  { %3728 = vst [vmem:[#allocation9_spill] sm:$0xff] %v2882_v23  ;;  %v2903_v41 = vmul.f32 %v2634_v6, %v3734_v60  ;;  %v3735_v23 = vld [vmem:[#allocation6_spill] sm:$0xff]  ;;  %v2923_v60 = vmul.f32 %v2634_v6, %v2662_v14  ;;  %v2943_v14 = vmul.f32 %v2634_v6, %v2682_v63  ;;  %v2967_v63 = vadd.f32 %v2895_v15, %v2706_v55 }
 0x23b   :  { %3730 = vst [vmem:[#allocation10_spill] sm:$0xff] %v2886_v47  ;;  %v2907_v54 = vmul.f32 %v2634_v6, %v3735_v23  ;;  %v3736_v47 = vld [vmem:[#allocation19_spill] sm:$0xff]  ;;  %v2927_v23 = vmul.f32 %v2634_v6, %v2666_v52  ;;  %v2947_v52 = vadd.f32 %v2895_v15, %v2686_v11  ;;  %v2971_v11 = vadd.f32 %v2895_v15, %v2710_v35 }
 0x23c   :  { %3732 = vst [vmem:[#allocation12_spill] sm:$0xff] %v2890_v25  ;;  %v2911_v51 = vmul.f32 %v2634_v6, %v3736_v47  ;;  %v3737_v25 = vld [vmem:[#allocation7_spill] sm:$0xff]  ;;  %v2931_v47 = vmul.f32 %v2634_v6, %v2670_v59  ;;  %v2951_v59 = vadd.f32 %v2895_v15, %v2690_v13  ;;  %v2975_v13 = vadd.f32 %v2895_v15, %v2714_v18 }
 0x23d   :  { %v2915_v39 = vmul.f32 %v2634_v6, %v3737_v25  ;;  %v2935_v25 = vmul.f32 %v2634_v6, %v2674_v37  ;;  %v2955_v37 = vadd.f32 %v2895_v15, %v2694_v0  ;;  %v2963_v6 = vadd.f32 %v2895_v15, %v2702_v22 }
 0x23e   :  { %v2979_v0 = vadd.f32 %v2895_v15, %v2718_v16  ;;  %v2983_v32 = vadd.f32 %v2895_v15, %v2722_v7  ;;  %v2987_v22 = vadd.f32 %v2895_v15, %v2726_v12  ;;  %v2991_v55 = vadd.f32 %v2895_v15, %v2730_v28 }
 0x23f   :  { %v2995_v35 = vadd.f32 %v2895_v15, %v2734_v29  ;;  %v2999_v18 = vadd.f32 %v2895_v15, %v2738_v20  ;;  %v3003_v16 = vadd.f32 %v2895_v15, %v2742_v43  ;;  %v3007_v7 = vadd.f32 %v2895_v15, %v2746_v36 }
 0x240   :  { %v3011_v12 = vadd.f32 %v2895_v15, %v2750_v42  ;;  %v3015_v28 = vadd.f32 %v2895_v15, %v2754_v45  ;;  %v3019_v29 = vadd.f32 %v2895_v15, %v2758_v31  ;;  %v3023_v20 = vadd.f32 %v2895_v15, %v2762_v48 }
 0x241   :  { %v3027_v43 = vadd.f32 %v2895_v15, %v2766_v9  ;;  %v3031_v36 = vadd.f32 %v2895_v15, %v2770_v8  ;;  %v3035_v42 = vadd.f32 %v2895_v15, %v2774_v26  ;;  %v3039_v45 = vadd.f32 %v2895_v15, %v2778_v21 }
 0x242   :  { %3738 = vst [vmem:[#allocation15_spill] sm:$0xff] %v3023_v20  ;;  %v3043_v31 = vadd.f32 %v2895_v15, %v2782_v3  ;;  %v3047_v48 = vadd.f32 %v2895_v15, %v2786_v38  ;;  %v3051_v9 = vadd.f32 %v2895_v15, %v2790_v49  ;;  %v3055_v8 = vadd.f32 %v2895_v15, %v2794_v19 }
 0x243   :  { %3739 = vst [vmem:[#allocation16_spill] sm:$0xff] %v3031_v36  ;;  %v3059_v26 = vadd.f32 %v2895_v15, %v2798_v40  ;;  %v3063_v21 = vadd.f32 %v2895_v15, %v2802_v33  ;;  %v3067_v3 = vadd.f32 %v2895_v15, %v2806_v46  ;;  %v3071_v38 = vadd.f32 %v2895_v15, %v2810_v50 }
 0x244   :  { %3740 = vst [vmem:[#allocation17_spill] sm:$0xff] %v3035_v42  ;;  %v3075_v49 = vadd.f32 %v2895_v15, %v2814_v53  ;;  %v3079_v19 = vadd.f32 %v2895_v15, %v2818_v56  ;;  %v3083_v40 = vadd.f32 %v2895_v15, %v2822_v58  ;;  %v3087_v33 = vadd.f32 %v2895_v15, %v2826_v61 }
 0x245   :  { %3741 = vst [vmem:[#allocation18_spill] sm:$0xff] %v3043_v31  ;;  %v3091_v46 = vadd.f32 %v2895_v15, %v2830_v1  ;;  %v3095_v50 = vadd.f32 %v2895_v15, %v2834_v5  ;;  %v3099_v53 = vadd.f32 %v2895_v15, %v2838_v10  ;;  %v3103_v56 = vadd.f32 %v2895_v15, %v2842_v17  ;;  %v3757_v17 = vld [vmem:[#allocation11_spill] sm:$0xff] }
 0x246   :  { %3742 = vst [vmem:[#allocation20_spill] sm:$0xff] %v3047_v48  ;;  %v3107_v58 = vadd.f32 %v2895_v15, %v2846_v24  ;;  %v3111_v61 = vadd.f32 %v2895_v15, %v2850_v57  ;;  %v3115_v1 = vadd.f32 %v2895_v15, %v2854_v62  ;;  %v3119_v5 = vadd.f32 %v2895_v15, %v2858_v44 }
 0x247   :  { %3743 = vst [vmem:[#allocation21_spill] sm:$0xff] %v3055_v8  ;;  %v3123_v10 = vadd.f32 %v2895_v15, %v2862_v4  ;;  %v3127_v24 = vadd.f32 %v2895_v15, %v3757_v17 }
 0x248   :  { %3744 = vst [vmem:[#allocation13_spill] sm:$0xff] %v3059_v26 }
 0x249   :  { %3745 = vst [vmem:[#allocation2_spill] sm:$0xff] %v3067_v3 }
 0x24a   :  { %3746 = vst [vmem:[#allocation3_spill] sm:$0xff] %v3071_v38 }
 0x24b   :  { %3747 = vst [vmem:[#allocation5_spill] sm:$0xff] %v3079_v19 }
 0x24c   :  { %3748 = vst [vmem:[#allocation6_spill] sm:$0xff] %v3083_v40 }
 0x24d   :  { %3749 = vst [vmem:[#allocation19_spill] sm:$0xff] %v3091_v46 }
 0x24e   :  { %3750 = vst [vmem:[#allocation7_spill] sm:$0xff] %v3095_v50 }
 0x24f   :  { %3751 = vst [vmem:[#allocation22_spill] sm:$0xff] %v3103_v56 }
 0x250   :  { %3752 = vst [vmem:[#allocation23_spill] sm:$0xff] %v3107_v58  ;;  %v3759_v58 = vld [vmem:[#allocation14_spill] sm:$0xff] }
 0x251   :  { %3753 = vst [vmem:[#allocation24_spill] sm:$0xff] %v3111_v61  ;;  %v3131_v57 = vadd.f32 %v2895_v15, %v3759_v58  ;;  %v3761_v61 = vld [vmem:[#allocation4_spill] sm:$0xff] }
 0x252   :  { %3754 = vst [vmem:[#allocation25_spill] sm:$0xff] %v3115_v1  ;;  %v3135_v62 = vadd.f32 %v2895_v15, %v3761_v61  ;;  %v3763_v1 = vld [vmem:[#allocation8_spill] sm:$0xff]  ;;  %v3155_v61 = vadd.f32 %v2895_v15, %v2899_v27  ;;  %v3175_v27 = vadd.f32 %v2895_v15, %v2919_v2  ;;  %v1017_v2 = vmul.f32 0.1, %v2951_v59 }
 0x253   :  { %3755 = vst [vmem:[#allocation26_spill] sm:$0xff] %v3119_v5  ;;  %v3139_v44 = vadd.f32 %v2895_v15, %v3763_v1  ;;  %v3765_v5 = vld [vmem:[#allocation9_spill] sm:$0xff]  ;;  %v3159_v1 = vadd.f32 %v2895_v15, %v2903_v41  ;;  %v3179_v41 = vadd.f32 %v2895_v15, %v2923_v60  ;;  %v3199_v60 = vadd.f32 %v2895_v15, %v2939_v30 }
 0x254   :  { %3756 = vst [vmem:[#allocation27_spill] sm:$0xff] %v3123_v10  ;;  %v3143_v4 = vadd.f32 %v2895_v15, %v3765_v5  ;;  %v3767_v10 = vld [vmem:[#allocation10_spill] sm:$0xff]  ;;  %v3163_v5 = vadd.f32 %v2895_v15, %v2907_v54  ;;  %v3186_v54 = vadd.f32 %v2895_v15, %v2927_v23  ;;  %v1020_v23 = vmul.f32 0.1, %v2963_v6 }
 0x255   :  { %3758 = vst [vmem:[#allocation11_spill] sm:$0xff] %v3127_v24  ;;  %v3147_v17 = vadd.f32 %v2895_v15, %v3767_v10  ;;  %v3769_v24 = vld [vmem:[#allocation12_spill] sm:$0xff]  ;;  %v3167_v10 = vadd.f32 %v2895_v15, %v2911_v51  ;;  %v3190_v51 = vadd.f32 %v2895_v15, %v2931_v47  ;;  %v3206_v47 = vadd.f32 %v2895_v15, %v2943_v14 }
 0x256   :  { %3760 = vst [vmem:[#allocation14_spill] sm:$0xff] %v3131_v57  ;;  %v3151_v58 = vadd.f32 %v2895_v15, %v3769_v24  ;;  %v3171_v24 = vadd.f32 %v2895_v15, %v2915_v39  ;;  %v3194_v39 = vadd.f32 %v2895_v15, %v2935_v25  ;;  %v1022_v25 = vmul.f32 0.1, %v2971_v11 }
 0x257   :  { %3762 = vst [vmem:[#allocation4_spill] sm:$0xff] %v3135_v62  ;;  %v1025_v30 = vmul.f32 0.1, %v2983_v32  ;;  %v3222_v15 = vmul.f32 0.1, %v2995_v35 }
 0x258   :  { %3764 = vst [vmem:[#allocation8_spill] sm:$0xff] %v3139_v44  ;;  %v3225_v14 = vmul.f32 0.1, %v2999_v18  ;;  %v3252_v44 = vmul.f32 0.1, %v3031_v36 }
 0x259   :  { %3766 = vst [vmem:[#allocation9_spill] sm:$0xff] %v3143_v4  ;;  %v3245_v4 = vmul.f32 0.1, %v3023_v20  ;;  %v3255_v62 = vmul.f32 0.1, %v3035_v42 }
 0x25a   :  { %3768 = vst [vmem:[#allocation10_spill] sm:$0xff] %v3147_v17  ;;  %v3242_v17 = vmul.f32 0.1, %v3019_v29  ;;  %v3262_v57 = vmul.f32 0.1, %v3043_v31 }
 0x25b   :  { %3770 = vst [vmem:[#allocation12_spill] sm:$0xff] %v3151_v58  ;;  %v3235_v58 = vmul.f32 0.1, %v3011_v12  ;;  %v3265_v20 = vmul.f32 0.1, %v3047_v48 }
 0x25c   :  { %3771 = vst [vmem:[#allocation28_spill] sm:$0xff] %v3155_v61  ;;  %v3232_v61 = vmul.f32 0.1, %v3007_v7  ;;  %v3272_v36 = vmul.f32 0.1, %v3055_v8 }
 0x25d   :  { %3772 = vst [vmem:[#allocation29_spill] sm:$0xff] %v3159_v1  ;;  %v3182_v1 = vmul.f32 0.1, %v2947_v52  ;;  %v3275_v42 = vmul.f32 0.1, %v3059_v26 }
 0x25e   :  { %3773 = vst [vmem:[#allocation30_spill] sm:$0xff] %v3163_v5  ;;  %v3229_v5 = vmul.f32 0.1, %v3003_v16  ;;  %v3282_v31 = vmul.f32 0.1, %v3067_v3 }
 0x25f   :  { %3774 = vst [vmem:[#allocation31_spill] sm:$0xff] %v3167_v10  ;;  %v3219_v10 = vmul.f32 0.1, %v2991_v55  ;;  %v3285_v48 = vmul.f32 0.1, %v3071_v38 }
 0x260   :  { %3775 = vst [vmem:[#allocation32_spill] sm:$0xff] %v3171_v24  ;;  %v1080_v24 = vmax.f32 %v2947_v52, %v3182_v1  ;;  %v3239_v1 = vmul.f32 0.1, %v3015_v28  ;;  %v3292_v8 = vmul.f32 0.1, %v3079_v19 }
 0x261   :  { %3776 = vst [vmem:[#allocation33_spill] sm:$0xff] %v3175_v27  ;;  %v1019_v27 = vmul.f32 0.1, %v2959_v34  ;;  %v3295_v26 = vmul.f32 0.1, %v3083_v40  ;;  %v3786_v40 = vld [vmem:[#allocation23_spill] sm:$0xff] }
 0x262   :  { %3777 = vst [vmem:[#allocation34_spill] sm:$0xff] %v3179_v41  ;;  %v1018_v41 = vmul.f32 0.1, %v2955_v37  ;;  %v3302_v3 = vmul.f32 0.1, %v3091_v46 }
 0x263   :  { %3778 = vst [vmem:[#allocation35_spill] sm:$0xff] %v3186_v54  ;;  %v1024_v54 = vmul.f32 0.1, %v2979_v0  ;;  %v3305_v38 = vmul.f32 0.1, %v3095_v50 }
 0x264   :  { %3779 = vst [vmem:[#allocation36_spill] sm:$0xff] %v3190_v51  ;;  %v1021_v51 = vmul.f32 0.1, %v2967_v63  ;;  %v1082_v52 = vmax.f32 %v2955_v37, %v1018_v41  ;;  %v1084_v37 = vmax.f32 %v2963_v6, %v1020_v23  ;;  %v3259_v41 = vmul.f32 0.1, %v3039_v45 }
 0x265   :  { %3780 = vst [vmem:[#allocation37_spill] sm:$0xff] %v3194_v39  ;;  %v1023_v39 = vmul.f32 0.1, %v2975_v13  ;;  %v1086_v6 = vmax.f32 %v2971_v11, %v1022_v25  ;;  %v3279_v23 = vmul.f32 0.1, %v3063_v21  ;;  %v1088_v11 = vmax.f32 %v2979_v0, %v1024_v54  ;;  %v3788_v54 = vld [vmem:[#allocation24_spill] sm:$0xff] }
 0x266   :  { %3781 = vst [vmem:[#allocation38_spill] sm:$0xff] %v3199_v60  ;;  %v3214_v60 = vmul.f32 0.1, %v2987_v22  ;;  %v3299_v25 = vmul.f32 0.1, %v3087_v33 }
 0x267   :  { %3782 = vst [vmem:[#allocation39_spill] sm:$0xff] %v3206_v47  ;;  %v1081_v47 = vmax.f32 %v2951_v59, %v1017_v2  ;;  %v1083_v59 = vmax.f32 %v2959_v34, %v1019_v27  ;;  %v3249_v2 = vmul.f32 0.1, %v3027_v43  ;;  %v1085_v34 = vmax.f32 %v2967_v63, %v1021_v51 }
 0x268   :  { %v3269_v27 = vmul.f32 0.1, %v3051_v9  ;;  %v1087_v63 = vmax.f32 %v2975_v13, %v1023_v39  ;;  %v3289_v51 = vmul.f32 0.1, %v3075_v49  ;;  %3783 = vst [vmem:[#allocation40_spill] sm:$0xff] %v3295_v26  ;;  %v1089_v13 = vmax.f32 %v2983_v32, %v1025_v30 }
 0x269   :  { %3784 = vst [vmem:[#allocation41_spill] sm:$0xff] %v3302_v3  ;;  %v3309_v39 = vmul.f32 0.1, %v3099_v53  ;;  %v3312_v19 = vmul.f32 0.1, %v3103_v56  ;;  %v1090_v0 = vmax.f32 %v2987_v22, %v3214_v60  ;;  %v3789_v3 = vld [vmem:[#allocation25_spill] sm:$0xff]  ;;  %v1091_v30 = vmax.f32 %v2991_v55, %v3219_v10 }
 0x26a   :  { %3785 = vst [vmem:[#allocation42_spill] sm:$0xff] %v3305_v38  ;;  %v3315_v26 = vmul.f32 0.1, %v3786_v40  ;;  %v3320_v46 = vmul.f32 0.1, %v3788_v54  ;;  %v3791_v38 = vld [vmem:[#allocation26_spill] sm:$0xff]  ;;  %v1092_v56 = vmax.f32 %v2995_v35, %v3222_v15  ;;  %v1093_v40 = vmax.f32 %v2999_v18, %v3225_v14 }
 0x26b   :  { %v3323_v50 = vmul.f32 0.1, %v3789_v3  ;;  %v3326_v32 = vmul.f32 0.1, %v3791_v38  ;;  %v1486_v22 = vpack.c.bf16 %v1083_v59, %v1082_v52  ;;  %v1094_v60 = vmax.f32 %v3003_v16, %v3229_v5  ;;  %v3794_v16 = vld [vmem:[#allocation11_spill] sm:$0xff]  ;;  %v3799_v15 = vld [vmem:[#allocation17_spill] sm:$0xff] }
 0x26c   :  { %3787 = vst [vmem:[#allocation43_spill] sm:$0xff] %v3315_v26  ;;  %v1481_v26 = vpack.c.bf16 %v1081_v47, %v1080_v24  ;;  %v1095_v3 = vmax.f32 %v3007_v7, %v3232_v61  ;;  %v1496_v38 = vpack.c.bf16 %v1087_v63, %v1086_v6  ;;  %v1096_v55 = vmax.f32 %v3011_v12, %v3235_v58  ;;  %v3795_v61 = vld [vmem:[#allocation15_spill] sm:$0xff]  ;;  %v3797_v24 = vld [vmem:[#allocation16_spill] sm:$0xff] }
 0x26d   :  { %3790 = vst [vmem:[#allocation44_spill] sm:$0xff] %v3323_v50  ;;  %v1491_v50 = vpack.c.bf16 %v1085_v34, %v1084_v37  ;;  %v1097_v35 = vmax.f32 %v3015_v28, %v3239_v1  ;;  %v1501_v18 = vpack.c.bf16 %v1089_v13, %v1088_v11  ;;  %v3349_v5 = vmul.f32 0.1, %v3794_v16  ;;  %v3796_v28 = vld [vmem:[#allocation14_spill] sm:$0xff]  ;;  %v3806_v34 = vld [vmem:[#allocation13_spill] sm:$0xff] }
 0x26e   :  { %3792 = vst [vmem:[#allocation45_spill] sm:$0xff] %v3326_v32  ;;  %v3793_v32 = vld [vmem:[#allocation27_spill] sm:$0xff]  ;;  %v1098_v7 = vmax.f32 %v3019_v29, %v3242_v17  ;;  %v1099_v10 = vmax.f32 %v3795_v61, %v3245_v4  ;;  %v1506_v12 = vpack.c.bf16 %v1091_v30, %v1090_v0  ;;  %v3359_v58 = vmul.f32 0.1, %v3796_v28  ;;  %v3798_v4 = vld [vmem:[#allocation4_spill] sm:$0xff]  ;;  %v3808_v11 = vld [vmem:[#allocation2_spill] sm:$0xff] }
 0x26f   :  { %v3339_v54 = vmul.f32 0.1, %v3793_v32  ;;  %1482 = vst [vmem:[%s3567_s4] sm:$0xff] %v1481_v26   ;;  %v1100_v26 = vmax.f32 %v3027_v43, %v3249_v2  ;;  %v1101_v47 = vmax.f32 %v3797_v24, %v3252_v44  ;;  %v1511_v29 = vpack.c.bf16 %v1093_v40, %v1092_v56  ;;  %v3800_v44 = vld [vmem:[#allocation8_spill] sm:$0xff]  ;;  %v3809_v0 = vld [vmem:[#allocation3_spill] sm:$0xff] }
 0x270   :  { %1638 = vst [vmem:[%s3567_s4 + $0x8] sm:$0xff] %v1486_v22   ;;  %v3369_v17 = vmul.f32 0.1, %v3798_v4  ;;  %v1102_v14 = vmax.f32 %v3799_v15, %v3255_v62  ;;  %v1103_v52 = vmax.f32 %v3039_v45, %v3259_v41  ;;  %v1516_v43 = vpack.c.bf16 %v1095_v3, %v1094_v60  ;;  %v3802_v56 = vld [vmem:[#allocation20_spill] sm:$0xff]  ;;  %v3803_v45 = vld [vmem:[#allocation9_spill] sm:$0xff] }
 0x271   :  { %1639 = vst [vmem:[%s3567_s4 + $0x10] sm:$0xff] %v1491_v50   ;;  %v3379_v1 = vmul.f32 0.1, %v3800_v44  ;;  %v3801_v50 = vld [vmem:[#allocation18_spill] sm:$0xff]  ;;  %v1105_v59 = vmax.f32 %v3802_v56, %v3265_v20  ;;  %v1521_v62 = vpack.c.bf16 %v1097_v35, %v1096_v55  ;;  %v3389_v2 = vmul.f32 0.1, %v3803_v45 }
 0x272   :  { %1640 = vst [vmem:[%s3567_s4 + $0x18] sm:$0xff] %v1496_v38   ;;  %v1104_v40 = vmax.f32 %v3801_v50, %v3262_v57  ;;  %v1106_v3 = vmax.f32 %v3051_v9, %v3269_v27  ;;  %v3804_v38 = vld [vmem:[#allocation21_spill] sm:$0xff]  ;;  %v1526_v57 = vpack.c.bf16 %v1099_v10, %v1098_v7  ;;  %v3805_v20 = vld [vmem:[#allocation10_spill] sm:$0xff]  ;;  %v1108_v6 = vmax.f32 %v3806_v34, %v3275_v42  ;;  %v3822_v56 = vld [vmem:[#allocation32_spill] sm:$0xff] }
 0x273   :  { %1641 = vst [vmem:[%s3567_s4 + $0x20] sm:$0xff] %v1501_v18   ;;  %v1107_v37 = vmax.f32 %v3804_v38, %v3272_v36  ;;  %v3399_v41 = vmul.f32 0.1, %v3805_v20  ;;  %v1109_v63 = vmax.f32 %v3063_v21, %v3279_v23  ;;  %v1531_v9 = vpack.c.bf16 %v1101_v47, %v1100_v26  ;;  %v3807_v36 = vld [vmem:[#allocation12_spill] sm:$0xff]  ;;  %v3811_v60 = vld [vmem:[#allocation5_spill] sm:$0xff]  ;;  %v3814_v7 = vld [vmem:[#allocation6_spill] sm:$0xff] }
 0x274   :  { %1642 = vst [vmem:[%s3567_s4 + $0x28] sm:$0xff] %v1506_v12   ;;  %v3409_v27 = vmul.f32 0.1, %v3807_v36  ;;  %v1110_v13 = vmax.f32 %v3808_v11, %v3282_v31  ;;  %v1111_v30 = vmax.f32 %v3809_v0, %v3285_v48  ;;  %v1536_v42 = vpack.c.bf16 %v1103_v52, %v1102_v14  ;;  %v3810_v21 = vld [vmem:[#allocation28_spill] sm:$0xff]  ;;  %v3812_v48 = vld [vmem:[#allocation29_spill] sm:$0xff]  ;;  %v3817_v26 = vld [vmem:[#allocation19_spill] sm:$0xff] }
 0x275   :  { %1643 = vst [vmem:[%s3567_s4 + $0x30] sm:$0xff] %v1511_v29   ;;  %v3419_v23 = vmul.f32 0.1, %v3810_v21  ;;  %v1112_v22 = vmax.f32 %v3075_v49, %v3289_v51  ;;  %v1113_v55 = vmax.f32 %v3811_v60, %v3292_v8  ;;  %v1541_v31 = vpack.c.bf16 %v1105_v59, %v1104_v40  ;;  %v3813_v18 = vld [vmem:[#allocation40_spill] sm:$0xff]  ;;  %v3815_v8 = vld [vmem:[#allocation30_spill] sm:$0xff]  ;;  %v3816_v12 = vld [vmem:[#allocation41_spill] sm:$0xff] }
 0x276   :  { %1644 = vst [vmem:[%s3567_s4 + $0x38] sm:$0xff] %v1516_v43   ;;  %v3429_v35 = vmul.f32 0.1, %v3812_v48  ;;  %v1114_v61 = vmax.f32 %v3814_v7, %v3813_v18  ;;  %v1115_v10 = vmax.f32 %v3087_v33, %v3299_v25  ;;  %v1546_v49 = vpack.c.bf16 %v1107_v37, %v1106_v3  ;;  %v3818_v47 = vld [vmem:[#allocation42_spill] sm:$0xff]  ;;  %v3819_v29 = vld [vmem:[#allocation7_spill] sm:$0xff]  ;;  %v3825_v37 = vld [vmem:[#allocation24_spill] sm:$0xff] }
 0x277   :  { %1645 = vst [vmem:[%s3567_s4 + $0x40] sm:$0xff] %v1521_v62   ;;  %v3439_v51 = vmul.f32 0.1, %v3815_v8  ;;  %v1116_v24 = vmax.f32 %v3817_v26, %v3816_v12  ;;  %v1117_v15 = vmax.f32 %v3819_v29, %v3818_v47  ;;  %v1551_v14 = vpack.c.bf16 %v1109_v63, %v1108_v6  ;;  %v3820_v33 = vld [vmem:[#allocation31_spill] sm:$0xff]  ;;  %v3821_v43 = vld [vmem:[#allocation22_spill] sm:$0xff]  ;;  %v3827_v34 = vld [vmem:[#allocation44_spill] sm:$0xff] }
 0x278   :  { %1646 = vst [vmem:[%s3567_s4 + $0x48] sm:$0xff] %v1526_v57   ;;  %v1071_v25 = vmul.f32 0.1, %v3820_v33  ;;  %v1118_v52 = vmax.f32 %v3099_v53, %v3309_v39  ;;  %v1119_v50 = vmax.f32 %v3821_v43, %v3312_v19  ;;  %v1556_v40 = vpack.c.bf16 %v1111_v30, %v1110_v13  ;;  %v3823_v62 = vld [vmem:[#allocation43_spill] sm:$0xff]  ;;  %v3826_v39 = vld [vmem:[#allocation33_spill] sm:$0xff]  ;;  %v3830_v11 = vld [vmem:[#allocation26_spill] sm:$0xff] }
 0x279   :  { %1647 = vst [vmem:[%s3567_s4 + $0x50] sm:$0xff] %v1531_v9   ;;  %v1072_v59 = vmul.f32 0.1, %v3822_v56  ;;  %v3824_v3 = vld [vmem:[#allocation23_spill] sm:$0xff]  ;;  %v1121_v57 = vmax.f32 %v3825_v37, %v3320_v46  ;;  %v1561_v53 = vpack.c.bf16 %v1113_v55, %v1112_v22  ;;  %v1073_v19 = vmul.f32 0.1, %v3826_v39 }
 0x27a   :  { %1648 = vst [vmem:[%s3567_s4 + $0x58] sm:$0xff] %v1536_v42   ;;  %v1120_v38 = vmax.f32 %v3824_v3, %v3823_v62  ;;  %v3828_v6 = vld [vmem:[#allocation25_spill] sm:$0xff]  ;;  %v1566_v0 = vpack.c.bf16 %v1115_v10, %v1114_v61  ;;  %v3831_v30 = vld [vmem:[#allocation34_spill] sm:$0xff]  ;;  %v1124_v42 = vmax.f32 %v3793_v32, %v3339_v54  ;;  %v1125_v22 = vmax.f32 %v3794_v16, %v3349_v5  ;;  %v3832_v55 = vld [vmem:[#allocation35_spill] sm:$0xff] }
 0x27b   :  { %1649 = vst [vmem:[%s3567_s4 + $0x60] sm:$0xff] %v1541_v31   ;;  %v1122_v63 = vmax.f32 %v3828_v6, %v3827_v34  ;;  %v3829_v9 = vld [vmem:[#allocation45_spill] sm:$0xff]  ;;  %v1074_v46 = vmul.f32 0.1, %v3831_v30  ;;  %v1571_v60 = vpack.c.bf16 %v1117_v15, %v1116_v24  ;;  %v1075_v31 = vmul.f32 0.1, %v3832_v55 }
 0x27c   :  { %v1123_v13 = vmax.f32 %v3830_v11, %v3829_v9  ;;  %1650 = vst [vmem:[%s3567_s4 + $0x68] sm:$0xff] %v1546_v49   ;;  %v1126_v18 = vmax.f32 %v3796_v28, %v3359_v58  ;;  %v1127_v7 = vmax.f32 %v3798_v4, %v3369_v17  ;;  %v1576_v54 = vpack.c.bf16 %v1119_v50, %v1118_v52  ;;  %v3833_v32 = vld [vmem:[#allocation36_spill] sm:$0xff]  ;;  %v3834_v58 = vld [vmem:[#allocation37_spill] sm:$0xff] }
 0x27d   :  { %1651 = vst [vmem:[%s3567_s4 + $0x70] sm:$0xff] %v1551_v14   ;;  %v1076_v16 = vmul.f32 0.1, %v3833_v32  ;;  %v1128_v5 = vmax.f32 %v3800_v44, %v3379_v1  ;;  %v1129_v61 = vmax.f32 %v3803_v45, %v3389_v2  ;;  %v1581_v28 = vpack.c.bf16 %v1121_v57, %v1120_v38  ;;  %v3835_v1 = vld [vmem:[#allocation38_spill] sm:$0xff] }
 0x27e   :  { %1652 = vst [vmem:[%s3567_s4 + $0x78] sm:$0xff] %v1556_v40   ;;  %v1077_v4 = vmul.f32 0.1, %v3834_v58  ;;  %v1130_v17 = vmax.f32 %v3805_v20, %v3399_v41  ;;  %v1131_v10 = vmax.f32 %v3807_v36, %v3409_v27  ;;  %v1586_v44 = vpack.c.bf16 %v1123_v13, %v1122_v63  ;;  %v3836_v41 = vld [vmem:[#allocation39_spill] sm:$0xff] }
 0x27f   :  { %1653 = vst [vmem:[%s3567_s4 + $0x80] sm:$0xff] %v1561_v53   ;;  %v1078_v45 = vmul.f32 0.1, %v3835_v1  ;;  %v1132_v2 = vmax.f32 %v3810_v21, %v3419_v23  ;;  %v1133_v49 = vmax.f32 %v3812_v48, %v3429_v35  ;;  %v1591_v20 = vpack.c.bf16 %v1125_v22, %v1124_v42 }
 0x280   :  { %1654 = vst [vmem:[%s3567_s4 + $0x88] sm:$0xff] %v1566_v0   ;;  %v1079_v36 = vmul.f32 0.1, %v3836_v41  ;;  %v1134_v27 = vmax.f32 %v3815_v8, %v3439_v51  ;;  %v1135_v12 = vmax.f32 %v3820_v33, %v1071_v25  ;;  %v1596_v21 = vpack.c.bf16 %v1127_v7, %v1126_v18 }
 0x281   :  { %1655 = vst [vmem:[%s3567_s4 + $0x90] sm:$0xff] %v1571_v60   ;;  %v1136_v23 = vmax.f32 %v3822_v56, %v1072_v59  ;;  %v1137_v48 = vmax.f32 %v3826_v39, %v1073_v19  ;;  %v1601_v35 = vpack.c.bf16 %v1129_v61, %v1128_v5  ;;  %v1138_v26 = vmax.f32 %v3831_v30, %v1074_v46 }
 0x282   :  { %1656 = vst [vmem:[%s3567_s4 + $0x98] sm:$0xff] %v1576_v54   ;;  %v1139_v8 = vmax.f32 %v3832_v55, %v1075_v31  ;;  %v1606_v51 = vpack.c.bf16 %v1131_v10, %v1130_v17  ;;  %v1140_v24 = vmax.f32 %v3833_v32, %v1076_v16  ;;  %v1141_v47 = vmax.f32 %v3834_v58, %v1077_v4 }
 0x283   :  { %1657 = vst [vmem:[%s3567_s4 + $0xa0] sm:$0xff] %v1581_v28   ;;  %v1611_v29 = vpack.c.bf16 %v1133_v49, %v1132_v2  ;;  %v1142_v15 = vmax.f32 %v3835_v1, %v1078_v45  ;;  %v1143_v14 = vmax.f32 %v3836_v41, %v1079_v36  ;;  %v1616_v33 = vpack.c.bf16 %v1135_v12, %v1134_v27 }
 0x284   :  { %1658 = vst [vmem:[%s3567_s4 + $0xa8] sm:$0xff] %v1586_v44   ;;  %v1621_v25 = vpack.c.bf16 %v1137_v48, %v1136_v23  ;;  %v1626_v52 = vpack.c.bf16 %v1139_v8, %v1138_v26  ;;  %v1631_v43 = vpack.c.bf16 %v1141_v47, %v1140_v24 }
 0x285   :  { %1659 = vst [vmem:[%s3567_s4 + $0xb0] sm:$0xff] %v1591_v20   ;;  %v1636_v50 = vpack.c.bf16 %v1143_v14, %v1142_v15 }
 0x286   :  { %1660 = vst [vmem:[%s3567_s4 + $0xb8] sm:$0xff] %v1596_v21  }
 0x287   :  { %1661 = vst [vmem:[%s3567_s4 + $0xc0] sm:$0xff] %v1601_v35  }
 0x288   :  { %1662 = vst [vmem:[%s3567_s4 + $0xc8] sm:$0xff] %v1606_v51  }
 0x289   :  { %1663 = vst [vmem:[%s3567_s4 + $0xd0] sm:$0xff] %v1611_v29  }
 0x28a   :  { %1664 = vst [vmem:[%s3567_s4 + $0xd8] sm:$0xff] %v1616_v33  }
 0x28b   :  { %1665 = vst [vmem:[%s3567_s4 + $0xe0] sm:$0xff] %v1621_v25  }
 0x28c   :  { %1666 = vst [vmem:[%s3567_s4 + $0xe8] sm:$0xff] %v1626_v52  }
 0x28d   :  { %1667 = vst [vmem:[%s3567_s4 + $0xf0] sm:$0xff] %v1631_v43  }
 0x28e   :  { %1668 = vst [vmem:[%s3567_s4 + $0xf8] sm:$0xff] %v1636_v50  }

// kernel: darknet_forward.9
= control target key start
LH: loop header
LB: loop body
LE: loop exit
PB: predicated region body
PF: predicated region fallthrough
CT: control target
= control target key end

     0   :  { %vm178_vm0 = vcmask 130048   ;;  %s932_s1 = inlined_call_operand.vmem [shape: bf16[144,128], index: 1, kind: input, shape index: {}]   ;;  %s933_s0 = inlined_call_operand.vmem [shape: bf16[128,144], index: 0, kind: input, shape index: {}]   ;;  %s934_s2 = inlined_call_operand.vmem [shape: f32[1,128], index: 2, kind: input, shape index: {}]   ;;  %s935_s3 = inlined_call_operand.vmem [shape: f32[1,128], index: 3, kind: input, shape index: {}]   ;;  %s936_s4 = inlined_call_operand.vmem [shape: bf16[128,128], index: 4, kind: output, shape index: {}]  }
   0x1   :  { %v650_v0 = vld [vmem:[%s932_s1 + $0x38] sm:$0xff]  ;;  %v651_v1 = vld [vmem:[%s932_s1 + $0x40] sm:$0xff]  ;;  %v523_v3 = vld [vmem:[%s933_s0 + $0x8] sm:$0xf0] }
   0x2   :  { %v627_v2 = vld [vmem:[%s933_s0 + $0x4] sm:$0xf]  ;;  %203 = vmatpush.bf16.msra.mxu0 %v650_v0  ;;  %259 = vmatpush.bf16.msra.mxu1 %v651_v1  ;;  %v649_v5 = vld [vmem:[%s932_s1 + $0x30] sm:$0xff]  ;;  %v648_v6 = vld [vmem:[%s932_s1 + $0x28] sm:$0xff] }
   0x3   :  { %v526_v4 = vor.u32 %v627_v2, %v523_v3  ;;  %699 = vmatpush.bf16.msra.mxu2 %v650_v0  ;;  %707 = vmatpush.bf16.msra.mxu3 %v651_v1  ;;  %v647_v7 = vld [vmem:[%s932_s1 + $0x20] sm:$0xff]  ;;  %v646_v8 = vld [vmem:[%s932_s1 + $0x18] sm:$0xff]  ;;  %v629_v9 = vld [vmem:[%s933_s0 + $0x14] sm:$0xf] }
   0x4   :  { %v531_v10 = vld [vmem:[%s933_s0 + $0x18] sm:$0xf0]  ;;  %v637_v11 = vld [vmem:[%s933_s0 + $0x54] sm:$0xf]  ;;  %v644_v16 = vld [vmem:[%s932_s1 + $0x8] sm:$0xff] }
   0x5   :  { %619 = vmatmul.msk.bf16.vlgmr.msra.gmra.mxu1 %vm178_vm0, %v526_v4  ;;  %v534_v12 = vor.u32 %v629_v9, %v531_v10  ;;  %v563_v13 = vld [vmem:[%s933_s0 + $0x58] sm:$0xf0]  ;;  %v645_v14 = vld [vmem:[%s932_s1 + $0x10] sm:$0xff]  ;;  %v643_v17 = vld [vmem:[%s932_s1] sm:$0xff] }
   0x6   :  { %204 = vmatpush.bf16.msra.mxu0 %v649_v5  ;;  %v566_v15 = vor.u32 %v637_v11, %v563_v13  ;;  %v521_v18 = vld [vmem:[%s933_s0] sm:$0xf]  ;;  %v628_v19 = vld [vmem:[%s933_s0 + $0x4] sm:$0xf0]  ;;  %v631_v24 = vld [vmem:[%s933_s0 + $0x24] sm:$0xf] }
   0x7   :  { %700 = vmatpush.bf16.msra.mxu2 %v649_v5  ;;  %v553_v20 = vld [vmem:[%s933_s0 + $0x40] sm:$0xf]  ;;  %v636_v21 = vld [vmem:[%s933_s0 + $0x44] sm:$0xf0]  ;;  %v522_v22 = vor.u32 %v628_v19, %v521_v18  ;;  %v539_v25 = vld [vmem:[%s933_s0 + $0x28] sm:$0xf0] }
   0x8   :  { %624 = vmatmul.msk.bf16.vlgmr.msra.gmra.mxu3 %vm178_vm0, %v566_v15  ;;  %v554_v23 = vor.u32 %v636_v21, %v553_v20  ;;  %v639_v26 = vld [vmem:[%s933_s0 + $0x64] sm:$0xf]  ;;  %v542_v27 = vor.u32 %v631_v24, %v539_v25  ;;  %v571_v28 = vld [vmem:[%s933_s0 + $0x68] sm:$0xf0]  ;;  %v529_v30 = vld [vmem:[%s933_s0 + $0x10] sm:$0xf] }
   0x9   :  { %v574_v29 = vor.u32 %v639_v26, %v571_v28  ;;  %v630_v31 = vld [vmem:[%s933_s0 + $0x14] sm:$0xf0]  ;;  %v561_v32 = vld [vmem:[%s933_s0 + $0x50] sm:$0xf]  ;;  %v633_v36 = vld [vmem:[%s933_s0 + $0x34] sm:$0xf] }
   0xa   :  { %205 = vmatpush.bf16.msra.mxu0 %v648_v6  ;;  %v638_v33 = vld [vmem:[%s933_s0 + $0x54] sm:$0xf0]  ;;  %v530_v34 = vor.u32 %v630_v31, %v529_v30  ;;  %v547_v37 = vld [vmem:[%s933_s0 + $0x38] sm:$0xf0]  ;;  %v641_v38 = vld [vmem:[%s933_s0 + $0x74] sm:$0xf] }
   0xb   :  { %701 = vmatpush.bf16.msra.mxu2 %v648_v6  ;;  %v562_v35 = vor.u32 %v638_v33, %v561_v32  ;;  %v550_v39 = vor.u32 %v633_v36, %v547_v37  ;;  %v579_v40 = vld [vmem:[%s933_s0 + $0x78] sm:$0xf0]  ;;  %v537_v42 = vld [vmem:[%s933_s0 + $0x20] sm:$0xf]  ;;  %v632_v43 = vld [vmem:[%s933_s0 + $0x24] sm:$0xf0] }
   0xc   :  { %v582_v41 = vor.u32 %v641_v38, %v579_v40  ;;  %v569_v44 = vld [vmem:[%s933_s0 + $0x60] sm:$0xf]  ;;  %v640_v45 = vld [vmem:[%s933_s0 + $0x64] sm:$0xf0]  ;;  %v538_v46 = vor.u32 %v632_v43, %v537_v42  ;;  %v635_v48 = vld [vmem:[%s933_s0 + $0x44] sm:$0xf] }
   0xd   :  { %v570_v47 = vor.u32 %v640_v45, %v569_v44  ;;  %v555_v49 = vld [vmem:[%s933_s0 + $0x48] sm:$0xf0]  ;;  %v545_v51 = vld [vmem:[%s933_s0 + $0x30] sm:$0xf]  ;;  %v634_v52 = vld [vmem:[%s933_s0 + $0x34] sm:$0xf0] }
   0xe   :  { %206 = vmatpush.bf16.msra.mxu0 %v647_v7  ;;  %v558_v50 = vor.u32 %v635_v48, %v555_v49  ;;  %v577_v53 = vld [vmem:[%s933_s0 + $0x70] sm:$0xf]  ;;  %v642_v54 = vld [vmem:[%s933_s0 + $0x74] sm:$0xf0]  ;;  %v546_v55 = vor.u32 %v634_v52, %v545_v51 }
   0xf   :  { %702 = vmatpush.bf16.msra.mxu2 %v647_v7  ;;  %v578_v56 = vor.u32 %v642_v54, %v577_v53 }
  0x12   :  { %207 = vmatpush.bf16.msra.mxu0 %v646_v8 }
  0x13   :  { %703 = vmatpush.bf16.msra.mxu2 %v646_v8 }
  0x15   :  { %620 = vmatmul.msk.bf16.gmra.mxu1 %vm178_vm0, %v534_v12 }
  0x16   :  { %208 = vmatpush.bf16.msra.mxu0 %v645_v14 }
  0x17   :  { %704 = vmatpush.bf16.msra.mxu2 %v645_v14 }
  0x18   :  { %625 = vmatmul.msk.bf16.gmra.mxu3 %vm178_vm0, %v574_v29 }
  0x1a   :  { %209 = vmatpush.bf16.msra.mxu0 %v644_v16 }
  0x1b   :  { %705 = vmatpush.bf16.msra.mxu2 %v644_v16 }
  0x1e   :  { %210 = vmatpush.bf16.msra.mxu0 %v643_v17 }
  0x1f   :  { %706 = vmatpush.bf16.msra.mxu2 %v643_v17 }
  0x21   :  { %211 = vmatmul.bf16.vlgmr.msra.gmra.mxu0 %v522_v22 }
  0x22   :  { %231 = vmatmul.bf16.vlgmr.msra.gmra.mxu2 %v554_v23 }
  0x25   :  { %621 = vmatmul.msk.bf16.gmra.mxu1 %vm178_vm0, %v542_v27 }
  0x28   :  { %626 = vmatmul.msk.bf16.gmra.mxu3 %vm178_vm0, %v582_v41  ;;  %v715_v41 = vmov 128.0  }
  0x29   :  { %711 = vrcp.f32 %v715_v41 }
  0x31   :  { %216 = vmatmul.bf16.gmra.mxu0 %v530_v34 }
  0x32   :  { %236 = vmatmul.bf16.gmra.mxu2 %v562_v35 }
  0x35   :  { %622 = vmatmul.msk.bf16.gmra.mxu1 %vm178_vm0, %v550_v39 }
  0x41   :  { %221 = vmatmul.bf16.gmra.mxu0 %v538_v46  ;;  %v712_v46 = vpop.eup %711 }
  0x42   :  { %241 = vmatmul.bf16.gmra.mxu2 %v570_v47  ;;  %v323_v53 = vmul.f32 128.0, %v712_v46  ;;  %vm327_vm1 = vweird.f32 %v712_v46 }
  0x45   :  { %623 = vmatmul.msk.bf16.gmra.mxu1 %vm178_vm0, %v558_v50 }
  0x51   :  { %226 = vmatmul.bf16.gmra.mxu0 %v546_v55 }
  0x52   :  { %246 = vmatmul.bf16.gmra.mxu2 %v578_v56 }
  0x82   :  { %v261_v57 = vpop.f32.mrf.mxu1 }
  0x8a   :  { %v263_v58 = vpop.f32.mrf.mxu1 }
  0x8b   :  { %v286_v4 = vpop.f32.mrf.mxu3 }
  0x92   :  { %v266_v59 = vpop.f32.mrf.mxu1 }
  0x93   :  { %v288_v8 = vpop.f32.mrf.mxu3 }
  0x9a   :  { %v268_v60 = vpop.f32.mrf.mxu1 }
  0x9b   :  { %v291_v12 = vpop.f32.mrf.mxu3 }
  0x9e   :  { %v212_v61 = vpop.f32.mrf.mxu0 }
  0x9f   :  { %v262_v16 = vadd.f32 %v261_v57, %v212_v61 }
  0xa2   :  { %v271_v63 = vpop.f32.mrf.mxu1 }
  0xa3   :  { %v293_v25 = vpop.f32.mrf.mxu3 }
  0xa5   :  { %v232_v62 = vpop.f32.mrf.mxu2 }
  0xa6   :  { %v214_v0 = vpop.f32.mrf.mxu0 }
  0xa7   :  { %v264_v15 = vadd.f32 %v263_v58, %v214_v0  ;;  %v324_v58 = vsub.f32 1.0, %v323_v53 }
  0xa9   :  { %v301_v18 = vadd.f32 %v264_v15, %v262_v16  ;;  %v325_v61 = vmul.f32 %v712_v46, %v324_v58 }
  0xaa   :  { %v273_v3 = vpop.f32.mrf.mxu1 }
  0xab   :  { %v296_v38 = vpop.f32.mrf.mxu3  ;;  %v326_v0 = vadd.f32 %v712_v46, %v325_v61 }
  0xad   :  { %v234_v1 = vpop.f32.mrf.mxu2 }
  0xae   :  { %v217_v2 = vpop.f32.mrf.mxu0 }
  0xaf   :  { %v267_v17 = vadd.f32 %v266_v59, %v217_v2 }
  0xb1   :  { %v302_v22 = vadd.f32 %v301_v18, %v267_v17 }
  0xb2   :  { %v276_v7 = vpop.f32.mrf.mxu1 }
  0xb3   :  { %v298_v52 = vpop.f32.mrf.mxu3 }
  0xb5   :  { %v237_v5 = vpop.f32.mrf.mxu2 }
  0xb6   :  { %v219_v6 = vpop.f32.mrf.mxu0  ;;  %v287_v42 = vadd.f32 %v286_v4, %v237_v5 }
  0xb7   :  { %v269_v19 = vadd.f32 %v268_v60, %v219_v6 }
  0xb9   :  { %v303_v26 = vadd.f32 %v302_v22, %v269_v19 }
  0xba   :  { %v278_v11 = vpop.f32.mrf.mxu1 }
  0xbd   :  { %v239_v9 = vpop.f32.mrf.mxu2 }
  0xbe   :  { %v222_v10 = vpop.f32.mrf.mxu0  ;;  %v289_v44 = vadd.f32 %v288_v8, %v239_v9 }
  0xbf   :  { %v272_v23 = vadd.f32 %v271_v63, %v222_v10 }
  0xc1   :  { %v304_v28 = vadd.f32 %v303_v26, %v272_v23 }
  0xc2   :  { %v281_v20 = vpop.f32.mrf.mxu1 }
  0xc3   :  { %v282_v35 = vadd.f32 %v281_v20, %v232_v62 }
  0xc5   :  { %v242_v14 = vpop.f32.mrf.mxu2 }
  0xc6   :  { %v224_v13 = vpop.f32.mrf.mxu0  ;;  %v292_v47 = vadd.f32 %v291_v12, %v242_v14 }
  0xc7   :  { %v274_v27 = vadd.f32 %v273_v3, %v224_v13  ;;  %v328_v3 = vsel %vm327_vm1, %v712_v46, %v326_v0 }
  0xc9   :  { %v305_v30 = vadd.f32 %v304_v28, %v274_v27 }
  0xca   :  { %v283_v34 = vpop.f32.mrf.mxu1 }
  0xcb   :  { %v284_v39 = vadd.f32 %v283_v34, %v234_v1 }
  0xcd   :  { %v244_v24 = vpop.f32.mrf.mxu2 }
  0xce   :  { %v227_v21 = vpop.f32.mrf.mxu0  ;;  %v294_v49 = vadd.f32 %v293_v25, %v244_v24 }
  0xcf   :  { %v277_v29 = vadd.f32 %v276_v7, %v227_v21 }
  0xd1   :  { %v306_v32 = vadd.f32 %v305_v30, %v277_v29 }
  0xd5   :  { %v247_v37 = vpop.f32.mrf.mxu2 }
  0xd6   :  { %v229_v31 = vpop.f32.mrf.mxu0  ;;  %v297_v54 = vadd.f32 %v296_v38, %v247_v37 }
  0xd7   :  { %v279_v33 = vadd.f32 %v278_v11, %v229_v31 }
  0xd9   :  { %v307_v36 = vadd.f32 %v306_v32, %v279_v33 }
  0xdb   :  { %v308_v40 = vadd.f32 %v307_v36, %v282_v35 }
  0xdd   :  { %v309_v43 = vadd.f32 %v308_v40, %v284_v39  ;;  %v249_v51 = vpop.f32.mrf.mxu2 }
  0xde   :  { %v299_v57 = vadd.f32 %v298_v52, %v249_v51 }
  0xdf   :  { %v310_v45 = vadd.f32 %v309_v43, %v287_v42 }
  0xe1   :  { %v311_v48 = vadd.f32 %v310_v45, %v289_v44 }
  0xe3   :  { %v312_v50 = vadd.f32 %v311_v48, %v292_v47 }
  0xe5   :  { %v313_v55 = vadd.f32 %v312_v50, %v294_v49 }
  0xe7   :  { %v314_v56 = vadd.f32 %v313_v55, %v297_v54 }
  0xe9   :  { %v315_v59 = vadd.f32 %v314_v56, %v299_v57 }
  0xeb   :  { %v316_v60 = vrot.slane %v315_v59, 4 }
  0xed   :  { %v317_v62 = vadd.f32 %v316_v60, %v315_v59 }
  0xef   :  { %v318_v63 = vrot.slane %v317_v62, 2 }
  0xf1   :  { %v319_v1 = vadd.f32 %v318_v63, %v317_v62 }
  0xf3   :  { %v320_v2 = vrot.slane %v319_v1, 1 }
  0xf5   :  { %v321_v4 = vadd.f32 %v320_v2, %v319_v1 }
  0xf7   :  { %v329_v5 = vmul.f32 %v328_v3, %v321_v4 }
  0xf9   :  { %v872_v6 = vsub.f32 %v262_v16, %v329_v5  ;;  %v874_v7 = vsub.f32 %v264_v15, %v329_v5  ;;  %v876_v8 = vsub.f32 %v267_v17, %v329_v5  ;;  %v882_v11 = vsub.f32 %v269_v19, %v329_v5 }
  0xfa   :  { %v884_v12 = vsub.f32 %v272_v23, %v329_v5  ;;  %v888_v16 = vsub.f32 %v274_v27, %v329_v5  ;;  %v336_v18 = vsub.f32 %v277_v29, %v329_v5  ;;  %v337_v22 = vsub.f32 %v279_v33, %v329_v5 }
  0xfb   :  { %v346_v9 = vmul.f32 %v872_v6, %v872_v6  ;;  %v347_v10 = vmul.f32 %v874_v7, %v874_v7  ;;  %v348_v13 = vmul.f32 %v876_v8, %v876_v8  ;;  %v349_v15 = vmul.f32 %v882_v11, %v882_v11 }
  0xfc   :  { %v350_v20 = vmul.f32 %v884_v12, %v884_v12  ;;  %v351_v19 = vmul.f32 %v888_v16, %v888_v16  ;;  %v338_v24 = vsub.f32 %v282_v35, %v329_v5  ;;  %v352_v25 = vmul.f32 %v336_v18, %v336_v18 }
  0xfd   :  { %v362_v14 = vadd.f32 %v347_v10, %v346_v9  ;;  %v339_v28 = vsub.f32 %v284_v39, %v329_v5  ;;  %v353_v27 = vmul.f32 %v337_v22, %v337_v22  ;;  %v340_v31 = vsub.f32 %v287_v42, %v329_v5 }
  0xfe   :  { %v354_v32 = vmul.f32 %v338_v24, %v338_v24  ;;  %v341_v36 = vsub.f32 %v289_v44, %v329_v5  ;;  %v342_v38 = vsub.f32 %v292_v47, %v329_v5  ;;  %v343_v33 = vsub.f32 %v294_v49, %v329_v5 }
  0xff   :  { %v363_v17 = vadd.f32 %v362_v14, %v348_v13  ;;  %v355_v29 = vmul.f32 %v339_v28, %v339_v28  ;;  %v356_v40 = vmul.f32 %v340_v31, %v340_v31  ;;  %v344_v46 = vsub.f32 %v297_v54, %v329_v5 }
 0x100   :  { %v357_v43 = vmul.f32 %v341_v36, %v341_v36  ;;  %v358_v48 = vmul.f32 %v342_v38, %v342_v38  ;;  %v345_v50 = vsub.f32 %v299_v57, %v329_v5  ;;  %v359_v51 = vmul.f32 %v343_v33, %v343_v33 }
 0x101   :  { %v364_v21 = vadd.f32 %v363_v17, %v349_v15  ;;  %v360_v52 = vmul.f32 %v344_v46, %v344_v46 }
 0x102   :  { %v361_v42 = vmul.f32 %v345_v50, %v345_v50 }
 0x103   :  { %v365_v23 = vadd.f32 %v364_v21, %v350_v20 }
 0x105   :  { %v366_v26 = vadd.f32 %v365_v23, %v351_v19 }
 0x107   :  { %v367_v30 = vadd.f32 %v366_v26, %v352_v25 }
 0x109   :  { %v368_v34 = vadd.f32 %v367_v30, %v353_v27 }
 0x10b   :  { %v369_v37 = vadd.f32 %v368_v34, %v354_v32 }
 0x10d   :  { %v370_v41 = vadd.f32 %v369_v37, %v355_v29 }
 0x10f   :  { %v371_v45 = vadd.f32 %v370_v41, %v356_v40 }
 0x111   :  { %v372_v35 = vadd.f32 %v371_v45, %v357_v43 }
 0x113   :  { %v373_v39 = vadd.f32 %v372_v35, %v358_v48 }
 0x115   :  { %v374_v53 = vadd.f32 %v373_v39, %v359_v51 }
 0x117   :  { %v375_v55 = vadd.f32 %v374_v53, %v360_v52 }
 0x119   :  { %v376_v56 = vadd.f32 %v375_v55, %v361_v42 }
 0x11b   :  { %v377_v44 = vrot.slane %v376_v56, 4 }
 0x11d   :  { %v378_v58 = vadd.f32 %v377_v44, %v376_v56 }
 0x11f   :  { %v379_v59 = vrot.slane %v378_v58, 2 }
 0x121   :  { %v380_v47 = vadd.f32 %v379_v59, %v378_v58 }
 0x123   :  { %v381_v60 = vrot.slane %v380_v47, 1 }
 0x125   :  { %v382_v61 = vadd.f32 %v381_v60, %v380_v47 }
 0x127   :  { %v383_v49 = vmul.f32 %v382_v61, %v328_v3  ;;  %v709_v3 = vld [vmem:[%s934_s2] ss:$0 sm:$0xff] }
 0x129   :  { %v384_v62 = vadd.f32 1e-05, %v383_v49 }
 0x12b   :  { %713 = vrsqrt.f32 %v384_v62  ;;  %vm391_vm3 = vweird.f32 %v384_v62 }
 0x131   :  { %v714_v54 = vpop.eup %713 }
 0x132   :  { %v386_v63 = vmul.f32 %v714_v54, %v384_v62  ;;  %vm392_vm2 = vweird.f32 %v714_v54 }
 0x133   :  { %vm393_vm4 = vmor %vm391_vm3, %vm392_vm2 }
 0x134   :  { %v387_v0 = vmul.f32 %v714_v54, %v386_v63 }
 0x136   :  { %v388_v57 = vmul.f32 0.5, %v387_v0 }
 0x138   :  { %v389_v1 = vsub.f32 1.5, %v388_v57 }
 0x13a   :  { %v390_v2 = vmul.f32 %v714_v54, %v389_v1 }
 0x13c   :  { %v394_v4 = vsel %vm393_vm4, %v714_v54, %v390_v2 }
 0x13d   :  { %v395_v5 = vmul.f32 %v394_v4, %v872_v6  ;;  %v396_v9 = vmul.f32 %v394_v4, %v874_v7  ;;  %v397_v10 = vmul.f32 %v394_v4, %v876_v8  ;;  %v398_v13 = vmul.f32 %v394_v4, %v882_v11  ;;  %v710_v11 = vld [vmem:[%s935_s3] ss:$0 sm:$0xff] }
 0x13e   :  { %v399_v14 = vmul.f32 %v394_v4, %v884_v12  ;;  %v400_v15 = vmul.f32 %v394_v4, %v888_v16  ;;  %v401_v17 = vmul.f32 %v394_v4, %v336_v18  ;;  %v402_v20 = vmul.f32 %v394_v4, %v337_v22 }
 0x13f   :  { %v403_v21 = vmul.f32 %v394_v4, %v338_v24  ;;  %v404_v19 = vmul.f32 %v394_v4, %v339_v28  ;;  %v405_v23 = vmul.f32 %v394_v4, %v340_v31  ;;  %v406_v6 = vmul.f32 %v394_v4, %v341_v36 }
 0x140   :  { %v407_v25 = vmul.f32 %v394_v4, %v342_v38  ;;  %v408_v7 = vmul.f32 %v394_v4, %v343_v33  ;;  %v409_v26 = vmul.f32 %v394_v4, %v344_v46  ;;  %v415_v8 = vmul.f32 %v709_v3, %v395_v5 }
 0x141   :  { %v416_v27 = vmul.f32 %v709_v3, %v396_v9  ;;  %v417_v30 = vmul.f32 %v709_v3, %v397_v10  ;;  %v410_v32 = vmul.f32 %v394_v4, %v345_v50  ;;  %v418_v12 = vmul.f32 %v709_v3, %v398_v13 }
 0x142   :  { %v419_v34 = vmul.f32 %v709_v3, %v399_v14  ;;  %v420_v16 = vmul.f32 %v709_v3, %v400_v15  ;;  %v421_v18 = vmul.f32 %v709_v3, %v401_v17  ;;  %v422_v22 = vmul.f32 %v709_v3, %v402_v20 }
 0x143   :  { %v423_v24 = vmul.f32 %v709_v3, %v403_v21  ;;  %v424_v28 = vmul.f32 %v709_v3, %v404_v19  ;;  %v425_v31 = vmul.f32 %v709_v3, %v405_v23  ;;  %v426_v36 = vmul.f32 %v709_v3, %v406_v6 }
 0x144   :  { %v427_v29 = vmul.f32 %v709_v3, %v407_v25  ;;  %v428_v37 = vmul.f32 %v709_v3, %v408_v7  ;;  %v429_v38 = vmul.f32 %v709_v3, %v409_v26  ;;  %v435_v40 = vadd.f32 %v710_v11, %v415_v8 }
 0x145   :  { %v436_v41 = vadd.f32 %v710_v11, %v416_v27  ;;  %v437_v33 = vadd.f32 %v710_v11, %v417_v30  ;;  %v430_v43 = vmul.f32 %v709_v3, %v410_v32  ;;  %v438_v45 = vadd.f32 %v710_v11, %v418_v12 }
 0x146   :  { %v439_v46 = vadd.f32 %v710_v11, %v419_v34  ;;  %v440_v48 = vadd.f32 %v710_v11, %v420_v16  ;;  %v441_v35 = vadd.f32 %v710_v11, %v421_v18  ;;  %v442_v50 = vadd.f32 %v710_v11, %v422_v22 }
 0x147   :  { %v443_v51 = vadd.f32 %v710_v11, %v423_v24  ;;  %v444_v39 = vadd.f32 %v710_v11, %v424_v28  ;;  %v445_v52 = vadd.f32 %v710_v11, %v425_v31  ;;  %v446_v53 = vadd.f32 %v710_v11, %v426_v36 }
 0x148   :  { %v447_v42 = vadd.f32 %v710_v11, %v427_v29  ;;  %v448_v55 = vadd.f32 %v710_v11, %v428_v37  ;;  %v449_v56 = vadd.f32 %v710_v11, %v429_v38  ;;  %v451_v44 = vmul.f32 0.1, %v435_v40 }
 0x149   :  { %v452_v58 = vmul.f32 0.1, %v436_v41  ;;  %v453_v59 = vmul.f32 0.1, %v437_v33  ;;  %v450_v47 = vadd.f32 %v710_v11, %v430_v43  ;;  %v454_v60 = vmul.f32 0.1, %v438_v45 }
 0x14a   :  { %v455_v61 = vmul.f32 0.1, %v439_v46  ;;  %v456_v49 = vmul.f32 0.1, %v440_v48  ;;  %v457_v62 = vmul.f32 0.1, %v441_v35  ;;  %v467_v0 = vmax.f32 %v435_v40, %v451_v44 }
 0x14b   :  { %v458_v54 = vmul.f32 0.1, %v442_v50  ;;  %v459_v63 = vmul.f32 0.1, %v443_v51  ;;  %v460_v57 = vmul.f32 0.1, %v444_v39  ;;  %v468_v4 = vmax.f32 %v436_v41, %v452_v58 }
 0x14c   :  { %v461_v1 = vmul.f32 0.1, %v445_v52  ;;  %v462_v2 = vmul.f32 0.1, %v446_v53  ;;  %v463_v5 = vmul.f32 0.1, %v447_v42  ;;  %v469_v3 = vmax.f32 %v437_v33, %v453_v59 }
 0x14d   :  { %v464_v9 = vmul.f32 0.1, %v448_v55  ;;  %v465_v10 = vmul.f32 0.1, %v449_v56  ;;  %v466_v13 = vmul.f32 0.1, %v450_v47  ;;  %v470_v14 = vmax.f32 %v438_v45, %v454_v60 }
 0x14e   :  { %v471_v15 = vmax.f32 %v439_v46, %v455_v61  ;;  %v472_v17 = vmax.f32 %v440_v48, %v456_v49  ;;  %v473_v20 = vmax.f32 %v441_v35, %v457_v62  ;;  %v474_v21 = vmax.f32 %v442_v50, %v458_v54 }
 0x14f   :  { %v475_v19 = vmax.f32 %v443_v51, %v459_v63  ;;  %v476_v23 = vmax.f32 %v444_v39, %v460_v57  ;;  %v477_v6 = vmax.f32 %v445_v52, %v461_v1  ;;  %v478_v25 = vmax.f32 %v446_v53, %v462_v2 }
 0x150   :  { %v479_v7 = vmax.f32 %v447_v42, %v463_v5  ;;  %v480_v26 = vmax.f32 %v448_v55, %v464_v9  ;;  %v655_v8 = vpack.c.bf16 %v468_v4, %v467_v0  ;;  %v660_v27 = vpack.c.bf16 %v470_v14, %v469_v3 }
 0x151   :  { %v481_v30 = vmax.f32 %v449_v56, %v465_v10  ;;  %v482_v11 = vmax.f32 %v450_v47, %v466_v13  ;;  %v665_v32 = vpack.c.bf16 %v472_v17, %v471_v15  ;;  %v670_v12 = vpack.c.bf16 %v474_v21, %v473_v20 }
 0x152   :  { %656 = vst [vmem:[%s936_s4] sm:$0xff] %v655_v8   ;;  %v675_v34 = vpack.c.bf16 %v476_v23, %v475_v19  ;;  %v680_v16 = vpack.c.bf16 %v478_v25, %v477_v6  ;;  %v685_v18 = vpack.c.bf16 %v480_v26, %v479_v7 }
 0x153   :  { %692 = vst [vmem:[%s936_s4 + $0x8] sm:$0xff] %v660_v27   ;;  %v690_v22 = vpack.c.bf16 %v482_v11, %v481_v30 }
 0x154   :  { %693 = vst [vmem:[%s936_s4 + $0x10] sm:$0xff] %v665_v32  }
 0x155   :  { %694 = vst [vmem:[%s936_s4 + $0x18] sm:$0xff] %v670_v12  }
 0x156   :  { %695 = vst [vmem:[%s936_s4 + $0x20] sm:$0xff] %v675_v34  }
 0x157   :  { %696 = vst [vmem:[%s936_s4 + $0x28] sm:$0xff] %v680_v16  }
 0x158   :  { %697 = vst [vmem:[%s936_s4 + $0x30] sm:$0xff] %v685_v18  }
 0x159   :  { %698 = vst [vmem:[%s936_s4 + $0x38] sm:$0xff] %v690_v22  }

// kernel: darknet_forward.10
= control target key start
LH: loop header
LB: loop body
LE: loop exit
PB: predicated region body
PF: predicated region fallthrough
CT: control target
= control target key end

     0   :  { %vm90_vm0 = vcmask 261120   ;;  %v500_v31 = vmov 128.0   ;;  %s632_s1 = inlined_call_operand.vmem [shape: bf16[32,128], index: 1, kind: input, shape index: {}]   ;;  %s633_s0 = inlined_call_operand.vmem [shape: bf16[128,32], index: 0, kind: input, shape index: {}]   ;;  %s634_s2 = inlined_call_operand.vmem [shape: f32[1,128], index: 2, kind: input, shape index: {}]   ;;  %s635_s3 = inlined_call_operand.vmem [shape: f32[1,128], index: 3, kind: input, shape index: {}]   ;;  %s636_s4 = inlined_call_operand.vmem [shape: bf16[128,128], index: 4, kind: output, shape index: {}]  }
   0x1   :  { %v439_v0 = vld [vmem:[%s632_s1 + $0x8] sm:$0xff]  ;;  %v438_v1 = vld [vmem:[%s632_s1] sm:$0xff]  ;;  %v432_v3 = vld [vmem:[%s633_s0 + $0x10] sm:$0xff]  ;;  %496 = vrcp.f32 %v500_v31 }
   0x2   :  { %121 = vmatpush.bf16.msra.mxu0 %v439_v0  ;;  %487 = vmatpush.bf16.msra.mxu1 %v439_v0  ;;  %v430_v2 = vld [vmem:[%s633_s0] sm:$0xff]  ;;  %v436_v5 = vld [vmem:[%s633_s0 + $0x30] sm:$0xff]  ;;  %v431_v6 = vld [vmem:[%s633_s0 + $0x8] sm:$0xff] }
   0x3   :  { %488 = vmatpush.bf16.msra.mxu2 %v439_v0  ;;  %489 = vmatpush.bf16.msra.mxu3 %v439_v0  ;;  %v434_v4 = vld [vmem:[%s633_s0 + $0x20] sm:$0xff]  ;;  %v433_v7 = vld [vmem:[%s633_s0 + $0x18] sm:$0xff]  ;;  %v435_v8 = vld [vmem:[%s633_s0 + $0x28] sm:$0xff] }
   0x4   :  { %v437_v9 = vld [vmem:[%s633_s0 + $0x38] sm:$0xff] }
   0x6   :  { %122 = vmatpush.bf16.msra.mxu0 %v438_v1  ;;  %490 = vmatpush.bf16.msra.mxu1 %v438_v1 }
   0x7   :  { %491 = vmatpush.bf16.msra.mxu2 %v438_v1  ;;  %492 = vmatpush.bf16.msra.mxu3 %v438_v1  ;;  %v497_v36 = vpop.eup %496 }
   0x8   :  { %v186_v39 = vmul.f32 128.0, %v497_v36  ;;  %vm190_vm1 = vweird.f32 %v497_v36 }
   0x9   :  { %422 = vmatmul.msk.bf16.vlgmr.msra.gmra.mxu0 %vm90_vm0, %v430_v2  ;;  %424 = vmatmul.msk.bf16.vlgmr.msra.gmra.mxu1 %vm90_vm0, %v432_v3 }
   0xa   :  { %426 = vmatmul.msk.bf16.vlgmr.msra.gmra.mxu2 %vm90_vm0, %v434_v4  ;;  %428 = vmatmul.msk.bf16.vlgmr.msra.gmra.mxu3 %vm90_vm0, %v436_v5  ;;  %v187_v43 = vsub.f32 1.0, %v186_v39 }
   0xc   :  { %v188_v46 = vmul.f32 %v497_v36, %v187_v43 }
   0xe   :  { %v189_v49 = vadd.f32 %v497_v36, %v188_v46 }
  0x10   :  { %v191_v52 = vsel %vm190_vm1, %v497_v36, %v189_v49 }
  0x19   :  { %423 = vmatmul.msk.bf16.gmra.mxu0 %vm90_vm0, %v431_v6  ;;  %425 = vmatmul.msk.bf16.gmra.mxu1 %vm90_vm0, %v433_v7 }
  0x1a   :  { %427 = vmatmul.msk.bf16.gmra.mxu2 %vm90_vm0, %v435_v8  ;;  %429 = vmatmul.msk.bf16.gmra.mxu3 %vm90_vm0, %v437_v9 }
  0x86   :  { %v124_v10 = vpop.f32.mrf.mxu0  ;;  %v134_v11 = vpop.f32.mrf.mxu1 }
  0x8d   :  { %v144_v13 = vpop.f32.mrf.mxu2  ;;  %v564_v16 = vpop.f32.mrf.mxu3 }
  0x8e   :  { %v126_v12 = vpop.f32.mrf.mxu0  ;;  %v136_v14 = vpop.f32.mrf.mxu1 }
  0x8f   :  { %v164_v18 = vadd.f32 %v126_v12, %v124_v10 }
  0x95   :  { %v146_v17 = vpop.f32.mrf.mxu2  ;;  %v566_v24 = vpop.f32.mrf.mxu3 }
  0x96   :  { %v129_v15 = vpop.f32.mrf.mxu0  ;;  %v139_v19 = vpop.f32.mrf.mxu1 }
  0x97   :  { %v165_v20 = vadd.f32 %v164_v18, %v129_v15 }
  0x9d   :  { %v149_v26 = vpop.f32.mrf.mxu2  ;;  %v159_v33 = vpop.f32.mrf.mxu3 }
  0x9e   :  { %v131_v21 = vpop.f32.mrf.mxu0  ;;  %v141_v28 = vpop.f32.mrf.mxu1 }
  0x9f   :  { %v166_v22 = vadd.f32 %v165_v20, %v131_v21 }
  0xa1   :  { %v167_v23 = vadd.f32 %v166_v22, %v134_v11 }
  0xa3   :  { %v168_v25 = vadd.f32 %v167_v23, %v136_v14 }
  0xa5   :  { %v169_v27 = vadd.f32 %v168_v25, %v139_v19  ;;  %v151_v35 = vpop.f32.mrf.mxu2  ;;  %v161_v42 = vpop.f32.mrf.mxu3 }
  0xa7   :  { %v170_v29 = vadd.f32 %v169_v27, %v141_v28 }
  0xa9   :  { %v171_v30 = vadd.f32 %v170_v29, %v144_v13 }
  0xab   :  { %v172_v32 = vadd.f32 %v171_v30, %v146_v17 }
  0xad   :  { %v173_v34 = vadd.f32 %v172_v32, %v149_v26 }
  0xaf   :  { %v174_v37 = vadd.f32 %v173_v34, %v151_v35 }
  0xb1   :  { %v175_v38 = vadd.f32 %v174_v37, %v564_v16 }
  0xb3   :  { %v176_v40 = vadd.f32 %v175_v38, %v566_v24 }
  0xb5   :  { %v177_v41 = vadd.f32 %v176_v40, %v159_v33 }
  0xb7   :  { %v178_v44 = vadd.f32 %v177_v41, %v161_v42 }
  0xb9   :  { %v179_v45 = vrot.slane %v178_v44, 4 }
  0xbb   :  { %v180_v47 = vadd.f32 %v179_v45, %v178_v44 }
  0xbd   :  { %v181_v48 = vrot.slane %v180_v47, 2 }
  0xbf   :  { %v182_v50 = vadd.f32 %v181_v48, %v180_v47 }
  0xc1   :  { %v183_v51 = vrot.slane %v182_v50, 1 }
  0xc3   :  { %v184_v53 = vadd.f32 %v183_v51, %v182_v50 }
  0xc5   :  { %v192_v54 = vmul.f32 %v191_v52, %v184_v53 }
  0xc7   :  { %v570_v55 = vsub.f32 %v124_v10, %v192_v54  ;;  %v572_v56 = vsub.f32 %v126_v12, %v192_v54  ;;  %v574_v57 = vsub.f32 %v129_v15, %v192_v54  ;;  %v580_v60 = vsub.f32 %v131_v21, %v192_v54 }
  0xc8   :  { %v582_v61 = vsub.f32 %v134_v11, %v192_v54  ;;  %v586_v0 = vsub.f32 %v136_v14, %v192_v54  ;;  %v199_v3 = vsub.f32 %v139_v19, %v192_v54  ;;  %v200_v6 = vsub.f32 %v141_v28, %v192_v54 }
  0xc9   :  { %v209_v58 = vmul.f32 %v570_v55, %v570_v55  ;;  %v210_v59 = vmul.f32 %v572_v56, %v572_v56  ;;  %v211_v62 = vmul.f32 %v574_v57, %v574_v57  ;;  %v212_v1 = vmul.f32 %v580_v60, %v580_v60 }
  0xca   :  { %v213_v4 = vmul.f32 %v582_v61, %v582_v61  ;;  %v214_v7 = vmul.f32 %v586_v0, %v586_v0  ;;  %v201_v9 = vsub.f32 %v144_v13, %v192_v54  ;;  %v215_v10 = vmul.f32 %v199_v3, %v199_v3 }
  0xcb   :  { %v225_v63 = vadd.f32 %v210_v59, %v209_v58  ;;  %v202_v12 = vsub.f32 %v146_v17, %v192_v54  ;;  %v216_v14 = vmul.f32 %v200_v6, %v200_v6  ;;  %v203_v18 = vsub.f32 %v149_v26, %v192_v54 }
  0xcc   :  { %v217_v20 = vmul.f32 %v201_v9, %v201_v9  ;;  %v204_v22 = vsub.f32 %v151_v35, %v192_v54  ;;  %v205_v25 = vsub.f32 %v564_v16, %v192_v54  ;;  %v206_v29 = vsub.f32 %v566_v24, %v192_v54 }
  0xcd   :  { %v226_v2 = vadd.f32 %v225_v63, %v211_v62  ;;  %v218_v19 = vmul.f32 %v202_v12, %v202_v12  ;;  %v219_v27 = vmul.f32 %v203_v18, %v203_v18  ;;  %v207_v13 = vsub.f32 %v159_v33, %v192_v54 }
  0xce   :  { %v220_v30 = vmul.f32 %v204_v22, %v204_v22  ;;  %v221_v32 = vmul.f32 %v205_v25, %v205_v25  ;;  %v208_v17 = vsub.f32 %v161_v42, %v192_v54  ;;  %v222_v36 = vmul.f32 %v206_v29, %v206_v29 }
  0xcf   :  { %v227_v5 = vadd.f32 %v226_v2, %v212_v1  ;;  %v223_v26 = vmul.f32 %v207_v13, %v207_v13 }
  0xd0   :  { %v224_v39 = vmul.f32 %v208_v17, %v208_v17 }
  0xd1   :  { %v228_v8 = vadd.f32 %v227_v5, %v213_v4 }
  0xd3   :  { %v229_v11 = vadd.f32 %v228_v8, %v214_v7 }
  0xd5   :  { %v230_v15 = vadd.f32 %v229_v11, %v215_v10 }
  0xd7   :  { %v231_v21 = vadd.f32 %v230_v15, %v216_v14 }
  0xd9   :  { %v232_v23 = vadd.f32 %v231_v21, %v217_v20 }
  0xdb   :  { %v233_v28 = vadd.f32 %v232_v23, %v218_v19 }
  0xdd   :  { %v234_v31 = vadd.f32 %v233_v28, %v219_v27 }
  0xdf   :  { %v235_v34 = vadd.f32 %v234_v31, %v220_v30 }
  0xe1   :  { %v236_v37 = vadd.f32 %v235_v34, %v221_v32 }
  0xe3   :  { %v237_v38 = vadd.f32 %v236_v37, %v222_v36 }
  0xe5   :  { %v238_v35 = vadd.f32 %v237_v38, %v223_v26 }
  0xe7   :  { %v239_v40 = vadd.f32 %v238_v35, %v224_v39 }
  0xe9   :  { %v240_v41 = vrot.slane %v239_v40, 4 }
  0xeb   :  { %v241_v43 = vadd.f32 %v240_v41, %v239_v40 }
  0xed   :  { %v242_v16 = vrot.slane %v241_v43, 2 }
  0xef   :  { %v243_v44 = vadd.f32 %v242_v16, %v241_v43 }
  0xf1   :  { %v244_v45 = vrot.slane %v243_v44, 1 }
  0xf3   :  { %v245_v46 = vadd.f32 %v244_v45, %v243_v44 }
  0xf5   :  { %v246_v24 = vmul.f32 %v245_v46, %v191_v52  ;;  %v494_v52 = vld [vmem:[%s634_s2] ss:$0 sm:$0xff] }
  0xf7   :  { %v247_v47 = vadd.f32 1e-05, %v246_v24 }
  0xf9   :  { %498 = vrsqrt.f32 %v247_v47  ;;  %vm254_vm3 = vweird.f32 %v247_v47 }
  0xff   :  { %v499_v33 = vpop.eup %498 }
 0x100   :  { %v249_v48 = vmul.f32 %v499_v33, %v247_v47  ;;  %vm255_vm2 = vweird.f32 %v499_v33 }
 0x101   :  { %vm256_vm4 = vmor %vm254_vm3, %vm255_vm2 }
 0x102   :  { %v250_v49 = vmul.f32 %v499_v33, %v249_v48 }
 0x104   :  { %v251_v42 = vmul.f32 0.5, %v250_v49 }
 0x106   :  { %v252_v50 = vsub.f32 1.5, %v251_v42 }
 0x108   :  { %v253_v51 = vmul.f32 %v499_v33, %v252_v50 }
 0x10a   :  { %v257_v53 = vsel %vm256_vm4, %v499_v33, %v253_v51 }
 0x10b   :  { %v258_v54 = vmul.f32 %v257_v53, %v570_v55  ;;  %v259_v58 = vmul.f32 %v257_v53, %v572_v56  ;;  %v260_v59 = vmul.f32 %v257_v53, %v574_v57  ;;  %v261_v62 = vmul.f32 %v257_v53, %v580_v60  ;;  %v495_v60 = vld [vmem:[%s635_s3] ss:$0 sm:$0xff] }
 0x10c   :  { %v262_v63 = vmul.f32 %v257_v53, %v582_v61  ;;  %v263_v1 = vmul.f32 %v257_v53, %v586_v0  ;;  %v264_v2 = vmul.f32 %v257_v53, %v199_v3  ;;  %v265_v4 = vmul.f32 %v257_v53, %v200_v6 }
 0x10d   :  { %v266_v5 = vmul.f32 %v257_v53, %v201_v9  ;;  %v267_v7 = vmul.f32 %v257_v53, %v202_v12  ;;  %v268_v8 = vmul.f32 %v257_v53, %v203_v18  ;;  %v269_v55 = vmul.f32 %v257_v53, %v204_v22 }
 0x10e   :  { %v270_v10 = vmul.f32 %v257_v53, %v205_v25  ;;  %v271_v56 = vmul.f32 %v257_v53, %v206_v29  ;;  %v272_v11 = vmul.f32 %v257_v53, %v207_v13  ;;  %v278_v57 = vmul.f32 %v494_v52, %v258_v54 }
 0x10f   :  { %v279_v14 = vmul.f32 %v494_v52, %v259_v58  ;;  %v280_v15 = vmul.f32 %v494_v52, %v260_v59  ;;  %v273_v20 = vmul.f32 %v257_v53, %v208_v17  ;;  %v281_v61 = vmul.f32 %v494_v52, %v261_v62 }
 0x110   :  { %v282_v21 = vmul.f32 %v494_v52, %v262_v63  ;;  %v283_v0 = vmul.f32 %v494_v52, %v263_v1  ;;  %v284_v3 = vmul.f32 %v494_v52, %v264_v2  ;;  %v285_v6 = vmul.f32 %v494_v52, %v265_v4 }
 0x111   :  { %v286_v9 = vmul.f32 %v494_v52, %v266_v5  ;;  %v287_v12 = vmul.f32 %v494_v52, %v267_v7  ;;  %v288_v18 = vmul.f32 %v494_v52, %v268_v8  ;;  %v289_v22 = vmul.f32 %v494_v52, %v269_v55 }
 0x112   :  { %v290_v19 = vmul.f32 %v494_v52, %v270_v10  ;;  %v291_v23 = vmul.f32 %v494_v52, %v271_v56  ;;  %v292_v25 = vmul.f32 %v494_v52, %v272_v11  ;;  %v298_v27 = vadd.f32 %v495_v60, %v278_v57 }
 0x113   :  { %v299_v28 = vadd.f32 %v495_v60, %v279_v14  ;;  %v300_v29 = vadd.f32 %v495_v60, %v280_v15  ;;  %v293_v30 = vmul.f32 %v494_v52, %v273_v20  ;;  %v301_v31 = vadd.f32 %v495_v60, %v281_v61 }
 0x114   :  { %v302_v13 = vadd.f32 %v495_v60, %v282_v21  ;;  %v303_v32 = vadd.f32 %v495_v60, %v283_v0  ;;  %v304_v34 = vadd.f32 %v495_v60, %v284_v3  ;;  %v305_v17 = vadd.f32 %v495_v60, %v285_v6 }
 0x115   :  { %v306_v36 = vadd.f32 %v495_v60, %v286_v9  ;;  %v307_v37 = vadd.f32 %v495_v60, %v287_v12  ;;  %v308_v26 = vadd.f32 %v495_v60, %v288_v18  ;;  %v309_v38 = vadd.f32 %v495_v60, %v289_v22 }
 0x116   :  { %v310_v39 = vadd.f32 %v495_v60, %v290_v19  ;;  %v311_v35 = vadd.f32 %v495_v60, %v291_v23  ;;  %v312_v40 = vadd.f32 %v495_v60, %v292_v25  ;;  %v314_v41 = vmul.f32 0.1, %v298_v27 }
 0x117   :  { %v315_v43 = vmul.f32 0.1, %v299_v28  ;;  %v316_v16 = vmul.f32 0.1, %v300_v29  ;;  %v313_v44 = vadd.f32 %v495_v60, %v293_v30  ;;  %v317_v45 = vmul.f32 0.1, %v301_v31 }
 0x118   :  { %v318_v46 = vmul.f32 0.1, %v302_v13  ;;  %v319_v24 = vmul.f32 0.1, %v303_v32  ;;  %v320_v47 = vmul.f32 0.1, %v304_v34  ;;  %v330_v49 = vmax.f32 %v298_v27, %v314_v41 }
 0x119   :  { %v321_v33 = vmul.f32 0.1, %v305_v17  ;;  %v322_v48 = vmul.f32 0.1, %v306_v36  ;;  %v323_v42 = vmul.f32 0.1, %v307_v37  ;;  %v331_v53 = vmax.f32 %v299_v28, %v315_v43 }
 0x11a   :  { %v324_v50 = vmul.f32 0.1, %v308_v26  ;;  %v325_v51 = vmul.f32 0.1, %v309_v38  ;;  %v326_v54 = vmul.f32 0.1, %v310_v39  ;;  %v332_v52 = vmax.f32 %v300_v29, %v316_v16 }
 0x11b   :  { %v327_v58 = vmul.f32 0.1, %v311_v35  ;;  %v328_v59 = vmul.f32 0.1, %v312_v40  ;;  %v329_v62 = vmul.f32 0.1, %v313_v44  ;;  %v333_v63 = vmax.f32 %v301_v31, %v317_v45 }
 0x11c   :  { %v334_v1 = vmax.f32 %v302_v13, %v318_v46  ;;  %v335_v2 = vmax.f32 %v303_v32, %v319_v24  ;;  %v336_v4 = vmax.f32 %v304_v34, %v320_v47  ;;  %v337_v5 = vmax.f32 %v305_v17, %v321_v33 }
 0x11d   :  { %v338_v7 = vmax.f32 %v306_v36, %v322_v48  ;;  %v339_v8 = vmax.f32 %v307_v37, %v323_v42  ;;  %v340_v55 = vmax.f32 %v308_v26, %v324_v50  ;;  %v341_v10 = vmax.f32 %v309_v38, %v325_v51 }
 0x11e   :  { %v342_v56 = vmax.f32 %v310_v39, %v326_v54  ;;  %v343_v11 = vmax.f32 %v311_v35, %v327_v58  ;;  %v443_v57 = vpack.c.bf16 %v331_v53, %v330_v49  ;;  %v448_v14 = vpack.c.bf16 %v333_v63, %v332_v52 }
 0x11f   :  { %v344_v15 = vmax.f32 %v312_v40, %v328_v59  ;;  %v345_v60 = vmax.f32 %v313_v44, %v329_v62  ;;  %v453_v20 = vpack.c.bf16 %v335_v2, %v334_v1  ;;  %v458_v61 = vpack.c.bf16 %v337_v5, %v336_v4 }
 0x120   :  { %444 = vst [vmem:[%s636_s4] sm:$0xff] %v443_v57   ;;  %v463_v21 = vpack.c.bf16 %v339_v8, %v338_v7  ;;  %v468_v0 = vpack.c.bf16 %v341_v10, %v340_v55  ;;  %v473_v3 = vpack.c.bf16 %v343_v11, %v342_v56 }
 0x121   :  { %480 = vst [vmem:[%s636_s4 + $0x8] sm:$0xff] %v448_v14   ;;  %v478_v6 = vpack.c.bf16 %v345_v60, %v344_v15 }
 0x122   :  { %481 = vst [vmem:[%s636_s4 + $0x10] sm:$0xff] %v453_v20  }
 0x123   :  { %482 = vst [vmem:[%s636_s4 + $0x18] sm:$0xff] %v458_v61  }
 0x124   :  { %483 = vst [vmem:[%s636_s4 + $0x20] sm:$0xff] %v463_v21  }
 0x125   :  { %484 = vst [vmem:[%s636_s4 + $0x28] sm:$0xff] %v468_v0  }
 0x126   :  { %485 = vst [vmem:[%s636_s4 + $0x30] sm:$0xff] %v473_v3  }
 0x127   :  { %486 = vst [vmem:[%s636_s4 + $0x38] sm:$0xff] %v478_v6  }

// kernel: darknet_forward.11
= control target key start
LH: loop header
LB: loop body
LE: loop exit
PB: predicated region body
PF: predicated region fallthrough
CT: control target
= control target key end

     0   :  { %vm181_vm0 = vcmask 130048   ;;  %s1165_s1 = inlined_call_operand.vmem [shape: bf16[144,128], index: 1, kind: input, shape index: {}]   ;;  %s1166_s0 = inlined_call_operand.vmem [shape: bf16[128,144], index: 0, kind: input, shape index: {}]   ;;  %s1167_s2 = inlined_call_operand.vmem [shape: f32[1,128], index: 2, kind: input, shape index: {}]   ;;  %s1168_s3 = inlined_call_operand.vmem [shape: f32[1,128], index: 3, kind: input, shape index: {}]   ;;  %s1169_s4 = inlined_call_operand.vmem [shape: bf16[128,128], index: 4, kind: input, shape index: {}]   ;;  %s1170_s5 = inlined_call_operand.vmem [shape: bf16[128,128], index: 5, kind: output, shape index: {}]  }
   0x1   :  { %v701_v0 = vld [vmem:[%s1165_s1 + $0x38] sm:$0xff]  ;;  %v702_v1 = vld [vmem:[%s1165_s1 + $0x40] sm:$0xff]  ;;  %v574_v3 = vld [vmem:[%s1166_s0 + $0x8] sm:$0xf0] }
   0x2   :  { %v678_v2 = vld [vmem:[%s1166_s0 + $0x4] sm:$0xf]  ;;  %206 = vmatpush.bf16.msra.mxu0 %v701_v0  ;;  %262 = vmatpush.bf16.msra.mxu1 %v702_v1  ;;  %v700_v5 = vld [vmem:[%s1165_s1 + $0x30] sm:$0xff]  ;;  %v699_v6 = vld [vmem:[%s1165_s1 + $0x28] sm:$0xff] }
   0x3   :  { %v577_v4 = vor.u32 %v678_v2, %v574_v3  ;;  %789 = vmatpush.bf16.msra.mxu2 %v701_v0  ;;  %797 = vmatpush.bf16.msra.mxu3 %v702_v1  ;;  %v698_v7 = vld [vmem:[%s1165_s1 + $0x20] sm:$0xff]  ;;  %v697_v8 = vld [vmem:[%s1165_s1 + $0x18] sm:$0xff]  ;;  %v680_v9 = vld [vmem:[%s1166_s0 + $0x14] sm:$0xf] }
   0x4   :  { %v582_v10 = vld [vmem:[%s1166_s0 + $0x18] sm:$0xf0]  ;;  %v688_v11 = vld [vmem:[%s1166_s0 + $0x54] sm:$0xf]  ;;  %v695_v16 = vld [vmem:[%s1165_s1 + $0x8] sm:$0xff] }
   0x5   :  { %670 = vmatmul.msk.bf16.vlgmr.msra.gmra.mxu1 %vm181_vm0, %v577_v4  ;;  %v585_v12 = vor.u32 %v680_v9, %v582_v10  ;;  %v614_v13 = vld [vmem:[%s1166_s0 + $0x58] sm:$0xf0]  ;;  %v696_v14 = vld [vmem:[%s1165_s1 + $0x10] sm:$0xff]  ;;  %v694_v17 = vld [vmem:[%s1165_s1] sm:$0xff] }
   0x6   :  { %207 = vmatpush.bf16.msra.mxu0 %v700_v5  ;;  %v617_v15 = vor.u32 %v688_v11, %v614_v13  ;;  %v572_v18 = vld [vmem:[%s1166_s0] sm:$0xf]  ;;  %v679_v19 = vld [vmem:[%s1166_s0 + $0x4] sm:$0xf0]  ;;  %v682_v24 = vld [vmem:[%s1166_s0 + $0x24] sm:$0xf] }
   0x7   :  { %790 = vmatpush.bf16.msra.mxu2 %v700_v5  ;;  %v604_v20 = vld [vmem:[%s1166_s0 + $0x40] sm:$0xf]  ;;  %v687_v21 = vld [vmem:[%s1166_s0 + $0x44] sm:$0xf0]  ;;  %v573_v22 = vor.u32 %v679_v19, %v572_v18  ;;  %v590_v25 = vld [vmem:[%s1166_s0 + $0x28] sm:$0xf0] }
   0x8   :  { %675 = vmatmul.msk.bf16.vlgmr.msra.gmra.mxu3 %vm181_vm0, %v617_v15  ;;  %v605_v23 = vor.u32 %v687_v21, %v604_v20  ;;  %v690_v26 = vld [vmem:[%s1166_s0 + $0x64] sm:$0xf]  ;;  %v593_v27 = vor.u32 %v682_v24, %v590_v25  ;;  %v622_v28 = vld [vmem:[%s1166_s0 + $0x68] sm:$0xf0]  ;;  %v580_v30 = vld [vmem:[%s1166_s0 + $0x10] sm:$0xf] }
   0x9   :  { %v625_v29 = vor.u32 %v690_v26, %v622_v28  ;;  %v681_v31 = vld [vmem:[%s1166_s0 + $0x14] sm:$0xf0]  ;;  %v612_v32 = vld [vmem:[%s1166_s0 + $0x50] sm:$0xf]  ;;  %v684_v36 = vld [vmem:[%s1166_s0 + $0x34] sm:$0xf] }
   0xa   :  { %208 = vmatpush.bf16.msra.mxu0 %v699_v6  ;;  %v689_v33 = vld [vmem:[%s1166_s0 + $0x54] sm:$0xf0]  ;;  %v581_v34 = vor.u32 %v681_v31, %v580_v30  ;;  %v598_v37 = vld [vmem:[%s1166_s0 + $0x38] sm:$0xf0]  ;;  %v692_v38 = vld [vmem:[%s1166_s0 + $0x74] sm:$0xf] }
   0xb   :  { %791 = vmatpush.bf16.msra.mxu2 %v699_v6  ;;  %v613_v35 = vor.u32 %v689_v33, %v612_v32  ;;  %v601_v39 = vor.u32 %v684_v36, %v598_v37  ;;  %v630_v40 = vld [vmem:[%s1166_s0 + $0x78] sm:$0xf0]  ;;  %v588_v42 = vld [vmem:[%s1166_s0 + $0x20] sm:$0xf]  ;;  %v683_v43 = vld [vmem:[%s1166_s0 + $0x24] sm:$0xf0] }
   0xc   :  { %v633_v41 = vor.u32 %v692_v38, %v630_v40  ;;  %v620_v44 = vld [vmem:[%s1166_s0 + $0x60] sm:$0xf]  ;;  %v691_v45 = vld [vmem:[%s1166_s0 + $0x64] sm:$0xf0]  ;;  %v589_v46 = vor.u32 %v683_v43, %v588_v42  ;;  %v686_v48 = vld [vmem:[%s1166_s0 + $0x44] sm:$0xf] }
   0xd   :  { %v621_v47 = vor.u32 %v691_v45, %v620_v44  ;;  %v606_v49 = vld [vmem:[%s1166_s0 + $0x48] sm:$0xf0]  ;;  %v596_v51 = vld [vmem:[%s1166_s0 + $0x30] sm:$0xf]  ;;  %v685_v52 = vld [vmem:[%s1166_s0 + $0x34] sm:$0xf0] }
   0xe   :  { %209 = vmatpush.bf16.msra.mxu0 %v698_v7  ;;  %v609_v50 = vor.u32 %v686_v48, %v606_v49  ;;  %v628_v53 = vld [vmem:[%s1166_s0 + $0x70] sm:$0xf]  ;;  %v693_v54 = vld [vmem:[%s1166_s0 + $0x74] sm:$0xf0]  ;;  %v597_v55 = vor.u32 %v685_v52, %v596_v51 }
   0xf   :  { %792 = vmatpush.bf16.msra.mxu2 %v698_v7  ;;  %v629_v56 = vor.u32 %v693_v54, %v628_v53 }
  0x12   :  { %210 = vmatpush.bf16.msra.mxu0 %v697_v8 }
  0x13   :  { %793 = vmatpush.bf16.msra.mxu2 %v697_v8 }
  0x15   :  { %671 = vmatmul.msk.bf16.gmra.mxu1 %vm181_vm0, %v585_v12 }
  0x16   :  { %211 = vmatpush.bf16.msra.mxu0 %v696_v14 }
  0x17   :  { %794 = vmatpush.bf16.msra.mxu2 %v696_v14 }
  0x18   :  { %676 = vmatmul.msk.bf16.gmra.mxu3 %vm181_vm0, %v625_v29 }
  0x1a   :  { %212 = vmatpush.bf16.msra.mxu0 %v695_v16 }
  0x1b   :  { %795 = vmatpush.bf16.msra.mxu2 %v695_v16 }
  0x1e   :  { %213 = vmatpush.bf16.msra.mxu0 %v694_v17 }
  0x1f   :  { %796 = vmatpush.bf16.msra.mxu2 %v694_v17 }
  0x21   :  { %214 = vmatmul.bf16.vlgmr.msra.gmra.mxu0 %v573_v22 }
  0x22   :  { %234 = vmatmul.bf16.vlgmr.msra.gmra.mxu2 %v605_v23 }
  0x25   :  { %672 = vmatmul.msk.bf16.gmra.mxu1 %vm181_vm0, %v593_v27 }
  0x28   :  { %677 = vmatmul.msk.bf16.gmra.mxu3 %vm181_vm0, %v633_v41  ;;  %v805_v41 = vmov 128.0  }
  0x29   :  { %801 = vrcp.f32 %v805_v41 }
  0x31   :  { %219 = vmatmul.bf16.gmra.mxu0 %v581_v34 }
  0x32   :  { %239 = vmatmul.bf16.gmra.mxu2 %v613_v35 }
  0x35   :  { %673 = vmatmul.msk.bf16.gmra.mxu1 %vm181_vm0, %v601_v39 }
  0x41   :  { %224 = vmatmul.bf16.gmra.mxu0 %v589_v46  ;;  %v802_v46 = vpop.eup %801 }
  0x42   :  { %244 = vmatmul.bf16.gmra.mxu2 %v621_v47  ;;  %v326_v53 = vmul.f32 128.0, %v802_v46  ;;  %vm330_vm1 = vweird.f32 %v802_v46 }
  0x45   :  { %674 = vmatmul.msk.bf16.gmra.mxu1 %vm181_vm0, %v609_v50 }
  0x51   :  { %229 = vmatmul.bf16.gmra.mxu0 %v597_v55 }
  0x52   :  { %249 = vmatmul.bf16.gmra.mxu2 %v629_v56 }
  0x82   :  { %v264_v57 = vpop.f32.mrf.mxu1 }
  0x8a   :  { %v266_v58 = vpop.f32.mrf.mxu1 }
  0x8b   :  { %v289_v4 = vpop.f32.mrf.mxu3 }
  0x92   :  { %v269_v59 = vpop.f32.mrf.mxu1 }
  0x93   :  { %v291_v8 = vpop.f32.mrf.mxu3 }
  0x9a   :  { %v271_v60 = vpop.f32.mrf.mxu1 }
  0x9b   :  { %v294_v12 = vpop.f32.mrf.mxu3 }
  0x9e   :  { %v215_v61 = vpop.f32.mrf.mxu0 }
  0x9f   :  { %v265_v16 = vadd.f32 %v264_v57, %v215_v61 }
  0xa2   :  { %v274_v63 = vpop.f32.mrf.mxu1 }
  0xa3   :  { %v296_v25 = vpop.f32.mrf.mxu3 }
  0xa5   :  { %v235_v62 = vpop.f32.mrf.mxu2 }
  0xa6   :  { %v217_v0 = vpop.f32.mrf.mxu0 }
  0xa7   :  { %v267_v15 = vadd.f32 %v266_v58, %v217_v0  ;;  %v327_v58 = vsub.f32 1.0, %v326_v53 }
  0xa9   :  { %v304_v18 = vadd.f32 %v267_v15, %v265_v16  ;;  %v328_v61 = vmul.f32 %v802_v46, %v327_v58 }
  0xaa   :  { %v276_v3 = vpop.f32.mrf.mxu1 }
  0xab   :  { %v299_v38 = vpop.f32.mrf.mxu3  ;;  %v329_v0 = vadd.f32 %v802_v46, %v328_v61 }
  0xad   :  { %v237_v1 = vpop.f32.mrf.mxu2 }
  0xae   :  { %v220_v2 = vpop.f32.mrf.mxu0 }
  0xaf   :  { %v270_v17 = vadd.f32 %v269_v59, %v220_v2 }
  0xb1   :  { %v305_v22 = vadd.f32 %v304_v18, %v270_v17 }
  0xb2   :  { %v279_v7 = vpop.f32.mrf.mxu1 }
  0xb3   :  { %v301_v52 = vpop.f32.mrf.mxu3 }
  0xb5   :  { %v240_v5 = vpop.f32.mrf.mxu2 }
  0xb6   :  { %v222_v6 = vpop.f32.mrf.mxu0  ;;  %v290_v42 = vadd.f32 %v289_v4, %v240_v5 }
  0xb7   :  { %v272_v19 = vadd.f32 %v271_v60, %v222_v6 }
  0xb9   :  { %v306_v26 = vadd.f32 %v305_v22, %v272_v19 }
  0xba   :  { %v281_v11 = vpop.f32.mrf.mxu1 }
  0xbd   :  { %v242_v9 = vpop.f32.mrf.mxu2 }
  0xbe   :  { %v225_v10 = vpop.f32.mrf.mxu0  ;;  %v292_v44 = vadd.f32 %v291_v8, %v242_v9 }
  0xbf   :  { %v275_v23 = vadd.f32 %v274_v63, %v225_v10 }
  0xc1   :  { %v307_v28 = vadd.f32 %v306_v26, %v275_v23 }
  0xc2   :  { %v284_v20 = vpop.f32.mrf.mxu1 }
  0xc3   :  { %v285_v35 = vadd.f32 %v284_v20, %v235_v62 }
  0xc5   :  { %v245_v14 = vpop.f32.mrf.mxu2 }
  0xc6   :  { %v227_v13 = vpop.f32.mrf.mxu0  ;;  %v295_v47 = vadd.f32 %v294_v12, %v245_v14 }
  0xc7   :  { %v277_v27 = vadd.f32 %v276_v3, %v227_v13  ;;  %v331_v3 = vsel %vm330_vm1, %v802_v46, %v329_v0 }
  0xc9   :  { %v308_v30 = vadd.f32 %v307_v28, %v277_v27 }
  0xca   :  { %v286_v34 = vpop.f32.mrf.mxu1 }
  0xcb   :  { %v287_v39 = vadd.f32 %v286_v34, %v237_v1 }
  0xcd   :  { %v247_v24 = vpop.f32.mrf.mxu2 }
  0xce   :  { %v230_v21 = vpop.f32.mrf.mxu0  ;;  %v297_v49 = vadd.f32 %v296_v25, %v247_v24 }
  0xcf   :  { %v280_v29 = vadd.f32 %v279_v7, %v230_v21 }
  0xd1   :  { %v309_v32 = vadd.f32 %v308_v30, %v280_v29 }
  0xd5   :  { %v250_v37 = vpop.f32.mrf.mxu2 }
  0xd6   :  { %v232_v31 = vpop.f32.mrf.mxu0  ;;  %v300_v54 = vadd.f32 %v299_v38, %v250_v37 }
  0xd7   :  { %v282_v33 = vadd.f32 %v281_v11, %v232_v31 }
  0xd9   :  { %v310_v36 = vadd.f32 %v309_v32, %v282_v33 }
  0xdb   :  { %v311_v40 = vadd.f32 %v310_v36, %v285_v35 }
  0xdd   :  { %v312_v43 = vadd.f32 %v311_v40, %v287_v39  ;;  %v252_v51 = vpop.f32.mrf.mxu2 }
  0xde   :  { %v302_v57 = vadd.f32 %v301_v52, %v252_v51 }
  0xdf   :  { %v313_v45 = vadd.f32 %v312_v43, %v290_v42 }
  0xe1   :  { %v314_v48 = vadd.f32 %v313_v45, %v292_v44 }
  0xe3   :  { %v315_v50 = vadd.f32 %v314_v48, %v295_v47 }
  0xe5   :  { %v316_v55 = vadd.f32 %v315_v50, %v297_v49 }
  0xe7   :  { %v317_v56 = vadd.f32 %v316_v55, %v300_v54 }
  0xe9   :  { %v318_v59 = vadd.f32 %v317_v56, %v302_v57 }
  0xeb   :  { %v319_v60 = vrot.slane %v318_v59, 4 }
  0xed   :  { %v320_v62 = vadd.f32 %v319_v60, %v318_v59 }
  0xef   :  { %v321_v63 = vrot.slane %v320_v62, 2 }
  0xf1   :  { %v322_v1 = vadd.f32 %v321_v63, %v320_v62 }
  0xf3   :  { %v323_v2 = vrot.slane %v322_v1, 1 }
  0xf5   :  { %v324_v4 = vadd.f32 %v323_v2, %v322_v1  ;;  %v1034_v1 = vld [vmem:[%s1169_s4] sm:$0xff]   ;;  %v1039_v2 = vld [vmem:[%s1169_s4 + $0x8] sm:$0xff]  }
  0xf7   :  { %v332_v5 = vmul.f32 %v331_v3, %v324_v4  ;;  %v1049_v4 = vld [vmem:[%s1169_s4 + $0x18] sm:$0xff]  }
  0xf9   :  { %v967_v6 = vsub.f32 %v265_v16, %v332_v5  ;;  %v969_v7 = vsub.f32 %v267_v15, %v332_v5  ;;  %v971_v8 = vsub.f32 %v270_v17, %v332_v5  ;;  %v977_v11 = vsub.f32 %v272_v19, %v332_v5 }
  0xfa   :  { %v979_v12 = vsub.f32 %v275_v23, %v332_v5  ;;  %v983_v16 = vsub.f32 %v277_v27, %v332_v5  ;;  %v987_v18 = vsub.f32 %v280_v29, %v332_v5  ;;  %v991_v19 = vsub.f32 %v282_v33, %v332_v5 }
  0xfb   :  { %v349_v9 = vmul.f32 %v967_v6, %v967_v6  ;;  %v350_v10 = vmul.f32 %v969_v7, %v969_v7  ;;  %v351_v13 = vmul.f32 %v971_v8, %v971_v8  ;;  %v352_v15 = vmul.f32 %v977_v11, %v977_v11 }
  0xfc   :  { %v353_v20 = vmul.f32 %v979_v12, %v979_v12  ;;  %v354_v22 = vmul.f32 %v983_v16, %v983_v16  ;;  %v995_v24 = vsub.f32 %v285_v35, %v332_v5  ;;  %v355_v25 = vmul.f32 %v987_v18, %v987_v18 }
  0xfd   :  { %v365_v14 = vadd.f32 %v350_v10, %v349_v9  ;;  %v999_v27 = vsub.f32 %v287_v39, %v332_v5  ;;  %v356_v28 = vmul.f32 %v991_v19, %v991_v19  ;;  %v1003_v30 = vsub.f32 %v290_v42, %v332_v5  ;;  %v1054_v9 = vld [vmem:[%s1169_s4 + $0x20] sm:$0xff]   ;;  %v1059_v10 = vld [vmem:[%s1169_s4 + $0x28] sm:$0xff]  }
  0xfe   :  { %v357_v31 = vmul.f32 %v995_v24, %v995_v24  ;;  %v1007_v33 = vsub.f32 %v292_v44, %v332_v5  ;;  %v1011_v36 = vsub.f32 %v295_v47, %v332_v5  ;;  %v1015_v39 = vsub.f32 %v297_v49, %v332_v5 }
  0xff   :  { %v366_v17 = vadd.f32 %v365_v14, %v351_v13  ;;  %v358_v34 = vmul.f32 %v999_v27, %v999_v27  ;;  %v359_v37 = vmul.f32 %v1003_v30, %v1003_v30  ;;  %v1019_v42 = vsub.f32 %v300_v54, %v332_v5 }
 0x100   :  { %v360_v40 = vmul.f32 %v1007_v33, %v1007_v33  ;;  %v361_v43 = vmul.f32 %v1011_v36, %v1011_v36  ;;  %v1023_v45 = vsub.f32 %v302_v57, %v332_v5  ;;  %v362_v46 = vmul.f32 %v1015_v39, %v1015_v39 }
 0x101   :  { %v367_v21 = vadd.f32 %v366_v17, %v352_v15  ;;  %v363_v48 = vmul.f32 %v1019_v42, %v1019_v42  ;;  %v705_v13 = vunpack.c.l.bf16 %v1034_v1  ;;  %v706_v14 = vunpack.c.h.bf16 %v1034_v1 }
 0x102   :  { %v364_v50 = vmul.f32 %v1023_v45, %v1023_v45  ;;  %v709_v15 = vunpack.c.l.bf16 %v1039_v2  ;;  %v710_v17 = vunpack.c.h.bf16 %v1039_v2  ;;  %v1171_v2 = vunpack.c.l.bf16 %v1059_v10 }
 0x103   :  { %v368_v23 = vadd.f32 %v367_v21, %v353_v20  ;;  %v1068_v20 = vld [vmem:[%s1169_s4 + $0x30] sm:$0xff]  }
 0x105   :  { %v369_v26 = vadd.f32 %v368_v23, %v354_v22 }
 0x107   :  { %v370_v29 = vadd.f32 %v369_v26, %v355_v25  ;;  %v717_v25 = vunpack.c.l.bf16 %v1049_v4  ;;  %v1076_v26 = vld [vmem:[%s1169_s4 + $0x38] sm:$0xff]  }
 0x109   :  { %v371_v32 = vadd.f32 %v370_v29, %v356_v28  ;;  %v718_v28 = vunpack.c.h.bf16 %v1049_v4  ;;  %v721_v29 = vunpack.c.l.bf16 %v1054_v9 }
 0x10b   :  { %v372_v35 = vadd.f32 %v371_v32, %v357_v31  ;;  %v722_v31 = vunpack.c.h.bf16 %v1054_v9  ;;  %v1176_v9 = vunpack.c.h.bf16 %v1076_v26 }
 0x10d   :  { %v373_v38 = vadd.f32 %v372_v35, %v358_v34 }
 0x10f   :  { %v374_v41 = vadd.f32 %v373_v38, %v359_v37 }
 0x111   :  { %v375_v44 = vadd.f32 %v374_v41, %v360_v40 }
 0x113   :  { %v376_v47 = vadd.f32 %v375_v44, %v361_v43  ;;  %v799_v44 = vld [vmem:[%s1167_s2] ss:$0 sm:$0xff] }
 0x115   :  { %v377_v49 = vadd.f32 %v376_v47, %v362_v46 }
 0x117   :  { %v378_v51 = vadd.f32 %v377_v49, %v363_v48 }
 0x119   :  { %v379_v52 = vadd.f32 %v378_v51, %v364_v50 }
 0x11b   :  { %v380_v53 = vrot.slane %v379_v52, 4 }
 0x11d   :  { %v381_v54 = vadd.f32 %v380_v53, %v379_v52 }
 0x11f   :  { %v382_v55 = vrot.slane %v381_v54, 2 }
 0x121   :  { %v383_v56 = vadd.f32 %v382_v55, %v381_v54 }
 0x123   :  { %v384_v58 = vrot.slane %v383_v56, 1 }
 0x125   :  { %v385_v57 = vadd.f32 %v384_v58, %v383_v56 }
 0x127   :  { %v386_v59 = vmul.f32 %v385_v57, %v331_v3  ;;  %v1044_v3 = vld [vmem:[%s1169_s4 + $0x10] sm:$0xff]  }
 0x128   :  { %v713_v22 = vunpack.c.l.bf16 %v1044_v3  ;;  %v714_v23 = vunpack.c.h.bf16 %v1044_v3  ;;  %v1173_v3 = vunpack.c.l.bf16 %v1068_v20 }
 0x129   :  { %v387_v60 = vadd.f32 1e-05, %v386_v59 }
 0x12b   :  { %803 = vrsqrt.f32 %v387_v60  ;;  %vm394_vm2 = vweird.f32 %v387_v60 }
 0x131   :  { %v804_v61 = vpop.eup %803 }
 0x132   :  { %v389_v62 = vmul.f32 %v804_v61, %v387_v60  ;;  %vm395_vm3 = vweird.f32 %v804_v61 }
 0x133   :  { %vm396_vm4 = vmor %vm394_vm2, %vm395_vm3 }
 0x134   :  { %v390_v63 = vmul.f32 %v804_v61, %v389_v62 }
 0x136   :  { %v391_v0 = vmul.f32 0.5, %v390_v63 }
 0x138   :  { %v392_v5 = vsub.f32 1.5, %v391_v0 }
 0x13a   :  { %v393_v21 = vmul.f32 %v804_v61, %v392_v5 }
 0x13c   :  { %v397_v34 = vsel %vm396_vm4, %v804_v61, %v393_v21 }
 0x13d   :  { %v398_v40 = vmul.f32 %v397_v34, %v967_v6  ;;  %v399_v41 = vmul.f32 %v397_v34, %v969_v7  ;;  %v400_v43 = vmul.f32 %v397_v34, %v971_v8  ;;  %v401_v47 = vmul.f32 %v397_v34, %v977_v11 }
 0x13e   :  { %v402_v48 = vmul.f32 %v397_v34, %v979_v12  ;;  %v403_v49 = vmul.f32 %v397_v34, %v983_v16  ;;  %v404_v6 = vmul.f32 %v397_v34, %v987_v18  ;;  %v405_v7 = vmul.f32 %v397_v34, %v991_v19  ;;  %v800_v18 = vld [vmem:[%s1168_s3] ss:$0 sm:$0xff] }
 0x13f   :  { %v406_v8 = vmul.f32 %v397_v34, %v995_v24  ;;  %v407_v51 = vmul.f32 %v397_v34, %v999_v27  ;;  %v408_v52 = vmul.f32 %v397_v34, %v1003_v30  ;;  %v409_v53 = vmul.f32 %v397_v34, %v1007_v33 }
 0x140   :  { %v410_v11 = vmul.f32 %v397_v34, %v1011_v36  ;;  %v411_v12 = vmul.f32 %v397_v34, %v1015_v39  ;;  %v412_v16 = vmul.f32 %v397_v34, %v1019_v42  ;;  %v418_v54 = vmul.f32 %v799_v44, %v398_v40 }
 0x141   :  { %v419_v55 = vmul.f32 %v799_v44, %v399_v41  ;;  %v420_v56 = vmul.f32 %v799_v44, %v400_v43  ;;  %v413_v19 = vmul.f32 %v397_v34, %v1023_v45  ;;  %v421_v24 = vmul.f32 %v799_v44, %v401_v47 }
 0x142   :  { %v422_v27 = vmul.f32 %v799_v44, %v402_v48  ;;  %v423_v30 = vmul.f32 %v799_v44, %v403_v49  ;;  %v424_v58 = vmul.f32 %v799_v44, %v404_v6  ;;  %v425_v33 = vmul.f32 %v799_v44, %v405_v7 }
 0x143   :  { %v426_v57 = vmul.f32 %v799_v44, %v406_v8  ;;  %v427_v36 = vmul.f32 %v799_v44, %v407_v51  ;;  %v428_v59 = vmul.f32 %v799_v44, %v408_v52  ;;  %v429_v39 = vmul.f32 %v799_v44, %v409_v53 }
 0x144   :  { %v430_v60 = vmul.f32 %v799_v44, %v410_v11  ;;  %v431_v42 = vmul.f32 %v799_v44, %v411_v12  ;;  %v432_v61 = vmul.f32 %v799_v44, %v412_v16  ;;  %v438_v62 = vadd.f32 %v800_v18, %v418_v54 }
 0x145   :  { %v439_v63 = vadd.f32 %v800_v18, %v419_v55  ;;  %v440_v0 = vadd.f32 %v800_v18, %v420_v56  ;;  %v433_v5 = vmul.f32 %v799_v44, %v413_v19  ;;  %v441_v21 = vadd.f32 %v800_v18, %v421_v24 }
 0x146   :  { %v442_v40 = vadd.f32 %v800_v18, %v422_v27  ;;  %v443_v41 = vadd.f32 %v800_v18, %v423_v30  ;;  %v444_v45 = vadd.f32 %v800_v18, %v424_v58  ;;  %v445_v34 = vadd.f32 %v800_v18, %v425_v33 }
 0x147   :  { %v446_v43 = vadd.f32 %v800_v18, %v426_v57  ;;  %v447_v47 = vadd.f32 %v800_v18, %v427_v36  ;;  %v448_v48 = vadd.f32 %v800_v18, %v428_v59  ;;  %v449_v49 = vadd.f32 %v800_v18, %v429_v39 }
 0x148   :  { %v450_v6 = vadd.f32 %v800_v18, %v430_v60  ;;  %v451_v7 = vadd.f32 %v800_v18, %v431_v42  ;;  %v452_v8 = vadd.f32 %v800_v18, %v432_v61  ;;  %v454_v51 = vmul.f32 0.1, %v438_v62 }
 0x149   :  { %v455_v52 = vmul.f32 0.1, %v439_v63  ;;  %v456_v53 = vmul.f32 0.1, %v440_v0  ;;  %v453_v11 = vadd.f32 %v800_v18, %v433_v5  ;;  %v457_v12 = vmul.f32 0.1, %v441_v21 }
 0x14a   :  { %v458_v16 = vmul.f32 0.1, %v442_v40  ;;  %v459_v54 = vmul.f32 0.1, %v443_v41  ;;  %v460_v44 = vmul.f32 0.1, %v444_v45  ;;  %v470_v19 = vmax.f32 %v438_v62, %v454_v51 }
 0x14b   :  { %v461_v55 = vmul.f32 0.1, %v445_v34  ;;  %v462_v56 = vmul.f32 0.1, %v446_v43  ;;  %v463_v24 = vmul.f32 0.1, %v447_v47  ;;  %v471_v58 = vmax.f32 %v439_v63, %v455_v52 }
 0x14c   :  { %v464_v27 = vmul.f32 0.1, %v448_v48  ;;  %v465_v30 = vmul.f32 0.1, %v449_v49  ;;  %v466_v33 = vmul.f32 0.1, %v450_v6  ;;  %v472_v59 = vmax.f32 %v440_v0, %v456_v53 }
 0x14d   :  { %v467_v57 = vmul.f32 0.1, %v451_v7  ;;  %v468_v36 = vmul.f32 0.1, %v452_v8  ;;  %v469_v39 = vmul.f32 0.1, %v453_v11  ;;  %v473_v60 = vmax.f32 %v441_v21, %v457_v12 }
 0x14e   :  { %v474_v42 = vmax.f32 %v442_v40, %v458_v16  ;;  %v475_v61 = vmax.f32 %v443_v41, %v459_v54  ;;  %v476_v18 = vmax.f32 %v444_v45, %v460_v44  ;;  %v477_v5 = vmax.f32 %v445_v34, %v461_v55 }
 0x14f   :  { %v478_v50 = vmax.f32 %v446_v43, %v462_v56  ;;  %v479_v46 = vmax.f32 %v447_v47, %v463_v24  ;;  %v480_v38 = vmax.f32 %v448_v48, %v464_v27  ;;  %v481_v37 = vmax.f32 %v449_v49, %v465_v30 }
 0x150   :  { %v482_v35 = vmax.f32 %v450_v6, %v466_v33  ;;  %v483_v62 = vmax.f32 %v451_v7, %v467_v57  ;;  %v484_v51 = vmax.f32 %v452_v8, %v468_v36  ;;  %v485_v32 = vmax.f32 %v453_v11, %v469_v39 }
 0x151   :  { %v518_v63 = vadd.f32 %v705_v13, %v470_v19  ;;  %v519_v0 = vadd.f32 %v706_v14, %v471_v58  ;;  %v520_v21 = vadd.f32 %v709_v15, %v472_v59  ;;  %v521_v40 = vadd.f32 %v710_v17, %v473_v60 }
 0x152   :  { %v522_v41 = vadd.f32 %v713_v22, %v474_v42  ;;  %v523_v45 = vadd.f32 %v714_v23, %v475_v61  ;;  %v524_v34 = vadd.f32 %v717_v25, %v476_v18  ;;  %v525_v13 = vadd.f32 %v718_v28, %v477_v5 }
 0x153   :  { %v526_v1 = vadd.f32 %v721_v29, %v478_v50  ;;  %v527_v14 = vadd.f32 %v722_v31, %v479_v46  ;;  %v528_v15 = vadd.f32 %v1171_v2, %v480_v38  ;;  %v1172_v17 = vunpack.c.h.bf16 %v1059_v10 }
 0x154   :  { %v530_v23 = vadd.f32 %v1173_v3, %v482_v35  ;;  %v1174_v25 = vunpack.c.h.bf16 %v1068_v20  ;;  %v738_v4 = vpack.c.bf16 %v519_v0, %v518_v63  ;;  %v743_v28 = vpack.c.bf16 %v521_v40, %v520_v21 }
 0x155   :  { %v529_v22 = vadd.f32 %v1172_v17, %v481_v37  ;;  %v1175_v47 = vunpack.c.l.bf16 %v1076_v26  ;;  %v533_v31 = vadd.f32 %v1176_v9, %v485_v32  ;;  %v748_v46 = vpack.c.bf16 %v523_v45, %v522_v41 }
 0x156   :  { %v531_v43 = vadd.f32 %v1174_v25, %v483_v62  ;;  %v753_v50 = vpack.c.bf16 %v525_v13, %v524_v34  ;;  %739 = vst [vmem:[%s1170_s5] sm:$0xff] %v738_v4   ;;  %v758_v10 = vpack.c.bf16 %v527_v14, %v526_v1 }
 0x157   :  { %v532_v29 = vadd.f32 %v1175_v47, %v484_v51  ;;  %782 = vst [vmem:[%s1170_s5 + $0x8] sm:$0xff] %v743_v28   ;;  %v763_v20 = vpack.c.bf16 %v529_v22, %v528_v15 }
 0x158   :  { %783 = vst [vmem:[%s1170_s5 + $0x10] sm:$0xff] %v748_v46   ;;  %v768_v35 = vpack.c.bf16 %v531_v43, %v530_v23 }
 0x159   :  { %784 = vst [vmem:[%s1170_s5 + $0x18] sm:$0xff] %v753_v50   ;;  %v773_v26 = vpack.c.bf16 %v533_v31, %v532_v29 }
 0x15a   :  { %785 = vst [vmem:[%s1170_s5 + $0x20] sm:$0xff] %v758_v10  }
 0x15b   :  { %786 = vst [vmem:[%s1170_s5 + $0x28] sm:$0xff] %v763_v20  }
 0x15c   :  { %787 = vst [vmem:[%s1170_s5 + $0x30] sm:$0xff] %v768_v35  }
 0x15d   :  { %788 = vst [vmem:[%s1170_s5 + $0x38] sm:$0xff] %v773_v26  }

// kernel: darknet_forward.14
= control target key start
LH: loop header
LB: loop body
LE: loop exit
PB: predicated region body
PF: predicated region fallthrough
CT: control target
= control target key end

     0   :  { %s523_s12 = smov 0   ;;  %s644_s0 = inlined_call_operand.vmem [shape: bf16[16,8], index: 0, kind: input, shape index: {}]   ;;  %s645_s1 = inlined_call_operand.vmem [shape: bf16[16,128], index: 1, kind: input, shape index: {}]   ;;  %s646_s2 = inlined_call_operand.vmem [shape: bf16[128,256], index: 2, kind: input, shape index: {}]   ;;  %s647_s3 = inlined_call_operand.vmem [shape: bf16[32,256], index: 3, kind: output, shape index: {}]  }
   0x1 LB: > { %s529_s13 = sadd.s32 4294967295, %s501_s12   ;;  %p393_p0 = scmp.ge.s32.totalorder %s501_s12, 1  ;;  %s501_s12 = sphi %s523_s12, %s13_s12  }
   0x2   : > { %p136_p1 = scmp.lt.s32.totalorder %s501_s12, 3 }
   0x4   : > { %p137_p2 = pnand %p393_p0, %p136_p1 }
   0x5   : > { %p160_p3 = scmp.lt.s32.totalorder (!%p137_p2), %s529_s13, 1  ;;  %s395_s8 = sshll.u32 (!%p137_p2), %s529_s13, 1 }
   0x6   : > { %140 = sbr.rel (%p137_p2) target bundleno = 300 (0x12c), region = 32  ;;  %p165_p4 = scmp.lt.s32.totalorder (!%p137_p2), %s395_s8, 3 }
   0xb   : > { %v461_v0 = vld [vmem:[%s646_s2 + $0x70] sm:$0xf]  ;;  %v486_v1 = vld [vmem:[%s646_s2 + $0x74] sm:$0xf0]  ;;  %v485_v2 = vld [vmem:[%s646_s2 + $0x74] sm:$0xf] }
   0xc   : > { %v463_v3 = vld [vmem:[%s646_s2 + $0x78] sm:$0xf0]  ;;  %s161_s22 = scalar_select %p160_p3, %s529_s13, 1  ;;  %v462_v4 = vor.u32 %v486_v1, %v461_v0  ;;  %v453_v6 = vld [vmem:[%s646_s2 + $0x60] sm:$0xf]  ;;  %vm184_vm0 = vcmask 1043456  }
   0xd   : > { %v466_v5 = vor.u32 %v485_v2, %v463_v3  ;;  %v484_v7 = vld [vmem:[%s646_s2 + $0x64] sm:$0xf0]  ;;  %v483_v8 = vld [vmem:[%s646_s2 + $0x64] sm:$0xf]  ;;  %v455_v9 = vld [vmem:[%s646_s2 + $0x68] sm:$0xf0] }
   0xe   : > { %s394_s4 = sshll.u32 %s161_s22, 2  ;;  %299 = vmatpush.bf16.msra.mxu1 %v462_v4  ;;  %v454_v10 = vor.u32 %v484_v7, %v453_v6  ;;  %v458_v11 = vor.u32 %v483_v8, %v455_v9  ;;  %v445_v12 = vld [vmem:[%s646_s2 + $0x50] sm:$0xf]  ;;  %v482_v13 = vld [vmem:[%s646_s2 + $0x54] sm:$0xf0]  ;;  %v470_v18 = vld [vmem:[%s644_s0] sm:$0xff] }
   0xf   : > { %313 = vmatpush.bf16.msra.mxu2 %v466_v5  ;;  %s163_s7 = scalar_lea.vmem %s645_s1, %s394_s4  ;;  %v481_v15 = vld [vmem:[%s646_s2 + $0x54] sm:$0xf]  ;;  %v447_v16 = vld [vmem:[%s646_s2 + $0x58] sm:$0xf0]  ;;  %vm180_vm1 = vcmask 64512   ;;  %v446_v19 = vor.u32 %v482_v13, %v445_v12  ;;  %s649_s8 = smov (!%p165_p4, %s395_s8), 3 }
  0x10   : > { %v174_v14 = vld [vmem:[%s163_s7] sm:$0xf]  ;;  %v450_v20 = vor.u32 %v481_v15, %v447_v16  ;;  %v480_v22 = vld [vmem:[%s646_s2 + $0x44] sm:$0xf0]  ;;  %v479_v23 = vld [vmem:[%s646_s2 + $0x44] sm:$0xf] }
  0x11   : > { %v186_v17 = vsel %vm184_vm0, %v174_v14, 0  ;;  %v437_v21 = vld [vmem:[%s646_s2 + $0x40] sm:$0xf]  ;;  %v439_v24 = vld [vmem:[%s646_s2 + $0x48] sm:$0xf0]  ;;  %s469_s9 = sshll.u32 %s649_s8, 3 }
  0x12   : > { %195 = vmatpush.bf16.msra.mxu0 %v186_v17  ;;  %300 = vmatpush.bf16.msra.mxu1 %v454_v10  ;;  %v438_v25 = vor.u32 %v480_v22, %v437_v21  ;;  %v442_v26 = vor.u32 %v479_v23, %v439_v24  ;;  %v429_v27 = vld [vmem:[%s646_s2 + $0x30] sm:$0xf]  ;;  %v478_v28 = vld [vmem:[%s646_s2 + $0x34] sm:$0xf0]  ;;  %v477_v29 = vld [vmem:[%s646_s2 + $0x34] sm:$0xf]  ;;  %s169_s14 = scalar_lea.vmem %s647_s3, %s469_s9 }
  0x13   : > { %314 = vmatpush.bf16.msra.mxu2 %v458_v11  ;;  %v431_v30 = vld [vmem:[%s646_s2 + $0x38] sm:$0xf0]  ;;  %v430_v31 = vor.u32 %v478_v28, %v429_v27  ;;  %v421_v33 = vld [vmem:[%s646_s2 + $0x20] sm:$0xf]  ;;  %v476_v34 = vld [vmem:[%s646_s2 + $0x24] sm:$0xf0] }
  0x14   : > { %v434_v32 = vor.u32 %v477_v29, %v431_v30  ;;  %v475_v35 = vld [vmem:[%s646_s2 + $0x24] sm:$0xf]  ;;  %v422_v36 = vor.u32 %v476_v34, %v421_v33  ;;  %v423_v37 = vld [vmem:[%s646_s2 + $0x28] sm:$0xf0]  ;;  %v413_v39 = vld [vmem:[%s646_s2 + $0x10] sm:$0xf] }
  0x15   : > { %402 = vmatmul.msk.bf16.vlgmr.msra.gmra.mxu0 %vm180_vm1, %v470_v18  ;;  %v426_v38 = vor.u32 %v475_v35, %v423_v37  ;;  %v474_v40 = vld [vmem:[%s646_s2 + $0x14] sm:$0xf0]  ;;  %v473_v41 = vld [vmem:[%s646_s2 + $0x14] sm:$0xf]  ;;  %v415_v43 = vld [vmem:[%s646_s2 + $0x18] sm:$0xf0] }
  0x16   : > { %301 = vmatpush.bf16.msra.mxu1 %v446_v19  ;;  %v414_v42 = vor.u32 %v474_v40, %v413_v39  ;;  %v418_v44 = vor.u32 %v473_v41, %v415_v43  ;;  %v405_v45 = vld [vmem:[%s646_s2] sm:$0xf]  ;;  %v472_v46 = vld [vmem:[%s646_s2 + $0x4] sm:$0xf0]  ;;  %v471_v47 = vld [vmem:[%s646_s2 + $0x4] sm:$0xf] }
  0x17   : > { %315 = vmatpush.bf16.msra.mxu2 %v450_v20  ;;  %v406_v48 = vor.u32 %v472_v46, %v405_v45  ;;  %v407_v49 = vld [vmem:[%s646_s2 + $0x8] sm:$0xf0] }
  0x18   : > { %v410_v50 = vor.u32 %v471_v47, %v407_v49 }
  0x1a   : > { %302 = vmatpush.bf16.msra.mxu1 %v438_v25 }
  0x1b   : > { %316 = vmatpush.bf16.msra.mxu2 %v442_v26 }
  0x1e   : > { %303 = vmatpush.bf16.msra.mxu1 %v430_v31 }
  0x1f   : > { %317 = vmatpush.bf16.msra.mxu2 %v434_v32 }
  0x22   : > { %304 = vmatpush.bf16.msra.mxu1 %v422_v36 }
  0x23   : > { %318 = vmatpush.bf16.msra.mxu2 %v426_v38 }
  0x26   : > { %305 = vmatpush.bf16.msra.mxu1 %v414_v42 }
  0x27   : > { %319 = vmatpush.bf16.msra.mxu2 %v418_v44 }
  0x2a   : > { %306 = vmatpush.bf16.msra.mxu1 %v406_v48 }
  0x2b   : > { %320 = vmatpush.bf16.msra.mxu2 %v410_v50 }
  0x92   : > { %v197_v51 = vpop.f32.mrf.mxu0 }
  0x9a   : > { %v199_v52 = vpop.f32.mrf.mxu0 }
  0x9b   : > { %v202_v53 = vpack.c.bf16 %v199_v52, %v197_v51 }
  0x9d   : > { %307 = vmatmul.bf16.vlgmr.msra.gmra.mxu1 %v202_v53  ;;  %321 = vmatmul.bf16.vlgmr.msra.gmra.mxu2 %v202_v53 }
 0x11a   : > { %v308_v54 = vpop.f32.mrf.mxu1 }
 0x120   : > { %v322_v55 = vpop.f32.mrf.mxu2 }
 0x121   : > { %v327_v56 = vpack.c.bf16 %v322_v55, %v308_v54 }
 0x122   : > { %v310_v57 = vpop.f32.mrf.mxu1 }
 0x123   : > { %329 = vst [vmem:[%s169_s14] sm:$0xff] %v327_v56 }
 0x128   : > { %v324_v58 = vpop.f32.mrf.mxu2 }
 0x129   : > { %v328_v59 = vpack.c.bf16 %v324_v58, %v310_v57 }
 0x12b   : > { %330 = vst [vmem:[%s169_s14 + $0x8] sm:$0xff] %v328_v59 }
 0x12c PF: > { %s13_s12 = sadd.s32 1, %s501_s12  }
 0x12d   : > { %p10_p5 = scmp.ge.s32.totalorder %s13_s12, 4  }
 0x12f   :  { %12 = sbr.rel (!%p10_p5) target bundleno = 1 (0x1), region = 62 }

// kernel: darknet_forward.12
= control target key start
LH: loop header
LB: loop body
LE: loop exit
PB: predicated region body
PF: predicated region fallthrough
CT: control target
= control target key end

     0   :  { %s657_s12 = smov 0   ;;  %s892_s0 = inlined_call_operand.vmem [shape: bf16[128,32], index: 0, kind: input, shape index: {}]   ;;  %s893_s1 = inlined_call_operand.vmem [shape: bf16[32,128], index: 1, kind: input, shape index: {}]   ;;  %s894_s2 = inlined_call_operand.vmem [shape: f32[8,128], index: 2, kind: input, shape index: {}]   ;;  %s895_s3 = inlined_call_operand.vmem [shape: f32[128,128], index: 3, kind: output, shape index: {}]  }
   0x1 LB: > { %s527_s13 = sadd.s32 4294967295, %s632_s12   ;;  %p531_p0 = scmp.ge.s32.totalorder %s632_s12, 1  ;;  %s632_s12 = sphi %s657_s12, %s13_s12  }
   0x2   : > { %p138_p1 = scmp.lt.s32.totalorder %s632_s12, 3 }
   0x4   : > { %p139_p2 = pnand %p531_p0, %p138_p1 }
   0x5   : > { %s532_s16 = sshll.u32 (!%p139_p2), %s527_s13, 3  ;;  %s564_s23 = sshll.u32 (!%p139_p2), %s527_s13, 6 }
   0x6   : > { %142 = sbr.rel (%p139_p2) target bundleno = 193 (0xc1), region = 32  ;;  %p163_p3 = scmp.lt.s32.totalorder (!%p139_p2), %s532_s16, 15 }
   0xb   : > { %v572_v0 = vld [vmem:[%s893_s1 + $0x8] sm:$0xff]  ;;  %v571_v1 = vld [vmem:[%s893_s1] sm:$0xff]  ;;  %s899_s16 = smov (!%p163_p3, %s532_s16), 15  ;;  %vm221_vm0 = vcmask 261120   ;;  %v634_v6 = vmov 64.0   ;;  %v316_v8 = vlaneseq  ;;  %v635_v12 = vmov 8.0  }
   0xc   : > { %240 = vmatpush.bf16.msra.mxu0 %v572_v0  ;;  %573 = vmatpush.bf16.msra.mxu1 %v572_v0  ;;  %s533_s19 = sshll.u32 %s899_s16, 2  ;;  %590 = vrcp.f32 %v634_v6  ;;  %v325_v14 = vstv %s564_s23  ;;  %v700_v49 = vld [vmem:[%s894_s2] sm:$0xff]  ;;  %s535_s26 = sshll.u32 %s899_s16, 3 }
   0xd   : > { %574 = vmatpush.bf16.msra.mxu2 %v572_v0  ;;  %575 = vmatpush.bf16.msra.mxu3 %v572_v0  ;;  %s166_s22 = scalar_lea.vmem %s892_s0, %s533_s19  ;;  %v317_v10 = vshrl.u32 %v316_v8, 7  ;;  %592 = vrcp.f32 %v635_v12  ;;  %v711_v56 = vperm.slane %v700_v49, 0  ;;  %vm303_vm3 = vcmp.ne.f32.partialorder %v700_v49, 0.0  ;;  %s832_s29 = scalar_lea.vmem %s895_s3, %s535_s26 }
   0xe   : > { %v567_v2 = vld [vmem:[%s166_s22] sm:$0xff]  ;;  %v568_v3 = vld [vmem:[%s166_s22 + $0x8] sm:$0xff]  ;;  %v569_v4 = vld [vmem:[%s166_s22 + $0x10] sm:$0xff] }
   0xf   : > { %v570_v5 = vld [vmem:[%s166_s22 + $0x18] sm:$0xff]  ;;  %v319_v13 = vadd.s32 16, %v317_v10  ;;  %v326_v16 = vadd.s32 %v325_v14, %v317_v10  ;;  %v321_v24 = vadd.s32 32, %v317_v10  ;;  %v323_v28 = vadd.s32 48, %v317_v10 }
  0x10   : > { %241 = vmatpush.bf16.msra.mxu0 %v571_v1  ;;  %576 = vmatpush.bf16.msra.mxu1 %v571_v1  ;;  %v318_v34 = vadd.s32 8, %v317_v10  ;;  %v320_v37 = vadd.s32 24, %v317_v10  ;;  %v322_v43 = vadd.s32 40, %v317_v10  ;;  %v324_v51 = vadd.s32 56, %v317_v10 }
  0x11   : > { %577 = vmatpush.bf16.msra.mxu2 %v571_v1  ;;  %578 = vmatpush.bf16.msra.mxu3 %v571_v1  ;;  %v328_v18 = vadd.s32 %v325_v14, %v319_v13  ;;  %v334_v20 = vcvt.s32.f32 %v326_v16  ;;  %v330_v29 = vadd.s32 %v325_v14, %v321_v24  ;;  %v332_v33 = vadd.s32 %v325_v14, %v323_v28 }
  0x12   : > { %v591_v7 = vpop.eup %590  ;;  %v685_v41 = vadd.s32 %v325_v14, %v318_v34  ;;  %v690_v45 = vadd.s32 %v325_v14, %v320_v37  ;;  %v703_v53 = vadd.s32 %v325_v14, %v322_v43  ;;  %v718_v60 = vadd.s32 %v325_v14, %v324_v51 }
  0x13   : > { %560 = vmatmul.msk.bf16.vlgmr.msra.gmra.mxu0 %vm221_vm0, %v567_v2  ;;  %561 = vmatmul.msk.bf16.vlgmr.msra.gmra.mxu1 %vm221_vm0, %v568_v3  ;;  %v343_v9 = vmul.f32 64.0, %v591_v7  ;;  %v593_v19 = vpop.eup %592  ;;  %vm347_vm1 = vweird.f32 %v591_v7  ;;  %v336_v23 = vcvt.s32.f32 %v328_v18  ;;  %v338_v35 = vcvt.s32.f32 %v330_v29 }
  0x14   : > { %562 = vmatmul.msk.bf16.vlgmr.msra.gmra.mxu2 %vm221_vm0, %v569_v4  ;;  %563 = vmatmul.msk.bf16.vlgmr.msra.gmra.mxu3 %vm221_vm0, %v570_v5  ;;  %v382_v22 = vmul.f32 8.0, %v593_v19  ;;  %v340_v40 = vcvt.s32.f32 %v332_v33  ;;  %vm386_vm2 = vweird.f32 %v593_v19  ;;  %v335_v50 = vcvt.s32.f32 %v685_v41 }
  0x15   : > { %v344_v11 = vsub.f32 1.0, %v343_v9  ;;  %v337_v55 = vcvt.s32.f32 %v690_v45  ;;  %v339_v62 = vcvt.s32.f32 %v703_v53  ;;  %v341_v8 = vcvt.s32.f32 %v718_v60 }
  0x16   : > { %v383_v26 = vsub.f32 1.0, %v382_v22  ;;  %v636_v14 = vmov 0  }
  0x17   : > { %v345_v15 = vmul.f32 %v591_v7, %v344_v11 }
  0x18   : > { %v384_v31 = vmul.f32 %v593_v19, %v383_v26 }
  0x19   : > { %v346_v17 = vadd.f32 %v591_v7, %v345_v15  ;;  %v304_v15 = vsel %vm303_vm3, 1, %v636_v14 }
  0x1a   : > { %v385_v38 = vadd.f32 %v593_v19, %v384_v31  ;;  %v305_v26 = vperm.slane %v304_v15, 1 }
  0x1b   : > { %v681_v21 = vsel %vm347_vm1, %v591_v7, %v346_v17 }
  0x1c   : > { %v349_v25 = vmul.f32 %v681_v21, %v334_v20  ;;  %v351_v27 = vmul.f32 %v681_v21, %v336_v23  ;;  %v353_v42 = vmul.f32 %v681_v21, %v338_v35  ;;  %v692_v46 = vsel %vm386_vm2, %v593_v19, %v385_v38 }
  0x1d   : > { %v355_v48 = vmul.f32 %v681_v21, %v340_v40  ;;  %v350_v59 = vmul.f32 %v681_v21, %v335_v50  ;;  %v352_v2 = vmul.f32 %v681_v21, %v337_v55  ;;  %v354_v12 = vmul.f32 %v681_v21, %v339_v62 }
  0x1e   : > { %v357_v30 = vfloor.f32 %v349_v25  ;;  %v359_v32 = vfloor.f32 %v351_v27  ;;  %v361_v52 = vfloor.f32 %v353_v42  ;;  %v356_v19 = vmul.f32 %v681_v21, %v341_v8 }
  0x1f   : > { %v363_v58 = vfloor.f32 %v355_v48  ;;  %v358_v7 = vfloor.f32 %v350_v59  ;;  %v360_v13 = vfloor.f32 %v352_v2  ;;  %v362_v25 = vfloor.f32 %v354_v12 }
  0x20   : > { %v365_v36 = vmul.f32 64.0, %v357_v30  ;;  %v367_v39 = vmul.f32 64.0, %v359_v32  ;;  %v369_v61 = vmul.f32 64.0, %v361_v52  ;;  %v364_v38 = vfloor.f32 %v356_v19 }
  0x21   : > { %v371_v6 = vmul.f32 64.0, %v363_v58  ;;  %v366_v18 = vmul.f32 64.0, %v358_v7  ;;  %v368_v31 = vmul.f32 64.0, %v360_v13  ;;  %v370_v43 = vmul.f32 64.0, %v362_v25 }
  0x22   : > { %v688_v44 = vsub.f32 %v334_v20, %v365_v36  ;;  %v694_v47 = vsub.f32 %v336_v23, %v367_v39  ;;  %v728_v11 = vsub.f32 %v338_v35, %v369_v61  ;;  %v766_v59 = vperm.slane %v700_v49, 4 }
  0x23   : > { %v735_v17 = vsub.f32 %v340_v40, %v371_v6  ;;  %v755_v37 = vsub.f32 %v335_v50, %v366_v18  ;;  %v758_v40 = vperm.slane %v700_v49, 3  ;;  %v762_v51 = vsub.f32 %v337_v55, %v368_v31 }
  0x24   : > { %v707_v54 = vmul.f32 %v692_v46, %v688_v44  ;;  %v715_v57 = vmul.f32 %v692_v46, %v694_v47  ;;  %v744_v23 = vmul.f32 %v692_v46, %v728_v11  ;;  %v372_v61 = vmul.f32 64.0, %v364_v38 }
  0x25   : > { %v751_v32 = vmul.f32 %v692_v46, %v735_v17  ;;  %vm772_vm4 = vcmp.eq.s32.totalorder %v305_v26, 1  ;;  %v779_v2 = vsub.f32 %v339_v62, %v370_v43 }
  0x26   : > { %v396_v0 = vfloor.f32 %v707_v54  ;;  %v398_v5 = vfloor.f32 %v715_v57  ;;  %v400_v42 = vfloor.f32 %v744_v23 }
  0x27   : > { %v402_v50 = vfloor.f32 %v751_v32  ;;  %v805_v19 = vmul.f32 %v692_v46, %v779_v2 }
  0x28   : > { %v404_v16 = vmul.f32 8.0, %v396_v0  ;;  %v406_v20 = vmul.f32 8.0, %v398_v5  ;;  %v438_v12 = vmul.f32 %v766_v59, %v396_v0  ;;  %v808_v0 = vperm.slane %v700_v49, 2 }
  0x29   : > { %v410_v53 = vmul.f32 8.0, %v402_v50  ;;  %v401_v31 = vfloor.f32 %v805_v19 }
  0x2a   : > { %v412_v21 = vsub.f32 %v688_v44, %v404_v16  ;;  %v414_v41 = vsub.f32 %v694_v47, %v406_v20  ;;  %v770_v47 = vmul.f32 %v692_v46, %v755_v37  ;;  %v440_v16 = vmul.f32 %v766_v59, %v398_v5 }
  0x2b   : > { %v418_v5 = vsub.f32 %v735_v17, %v410_v53 }
  0x2c   : > { %v421_v55 = vmul.f32 %v758_v40, %v412_v21  ;;  %v397_v13 = vfloor.f32 %v770_v47 }
  0x90   : > { %v243_v63 = vpop.f32.mrf.mxu0  ;;  %v248_v1 = vpop.f32.mrf.mxu1 }
  0x91   : > { %v244_v3 = vadd.f32 %v243_v63, %v711_v56  ;;  %v249_v4 = vadd.f32 %v248_v1, %v711_v56 }
  0x93   : > { %v263_v9 = vmul.f32 1.442695, %v244_v3  ;;  %v267_v10 = vmul.f32 1.442695, %v249_v4  ;;  %v783_v4 = vmul.f32 %v692_v46, %v762_v51 }
  0x95   : > { %594 = vpow2.f32 %v263_v9  ;;  %v423_v9 = vmul.f32 %v758_v40, %v414_v41  ;;  %v399_v60 = vfloor.f32 %v783_v4 }
  0x96   : > { %596 = vpow2.f32 %v267_v10  ;;  %v408_v10 = vmul.f32 8.0, %v400_v42 }
  0x97   : > { %v253_v22 = vpop.f32.mrf.mxu2  ;;  %v258_v24 = vpop.f32.mrf.mxu3 }
  0x98   : > { %v254_v27 = vadd.f32 %v253_v22, %v711_v56  ;;  %v259_v28 = vadd.f32 %v258_v24, %v711_v56  ;;  %v245_v29 = vpop.f32.mrf.mxu0  ;;  %v250_v30 = vpop.f32.mrf.mxu1  ;;  %v416_v57 = vsub.f32 %v728_v11, %v408_v10 }
  0x99   : > { %v246_v33 = vadd.f32 %v245_v29, %v711_v56  ;;  %v251_v34 = vadd.f32 %v250_v30, %v711_v56 }
  0x9a   : > { %v271_v35 = vmul.f32 1.442695, %v254_v27  ;;  %v275_v36 = vmul.f32 1.442695, %v259_v28  ;;  %v405_v27 = vmul.f32 8.0, %v397_v13 }
  0x9b   : > { %v595_v39 = vpop.eup %594  ;;  %v265_v48 = vmul.f32 1.442695, %v246_v33  ;;  %v269_v58 = vmul.f32 1.442695, %v251_v34  ;;  %v407_v33 = vmul.f32 8.0, %v399_v60 }
  0x9c   : > { %v597_v44 = vpop.eup %596  ;;  %v279_v45 = vadd.f32 1.0, %v595_v39  ;;  %598 = vpow2.f32 %v271_v35  ;;  %v413_v43 = vsub.f32 %v755_v37, %v405_v27  ;;  %v442_v37 = vmul.f32 %v766_v59, %v400_v42 }
  0x9d   : > { %v281_v52 = vadd.f32 1.0, %v597_v44  ;;  %600 = vpow2.f32 %v275_v36  ;;  %v425_v36 = vmul.f32 %v758_v40, %v416_v57 }
  0x9e   : > { %602 = vrcp.f32 %v279_v45  ;;  %v409_v45 = vmul.f32 8.0, %v401_v31  ;;  %v422_v42 = vmul.f32 %v758_v40, %v413_v43 }
  0x9f   : > { %604 = vrcp.f32 %v281_v52  ;;  %v255_v1 = vpop.f32.mrf.mxu2  ;;  %v260_v3 = vpop.f32.mrf.mxu3 }
  0xa0   : > { %606 = vpow2.f32 %v265_v48  ;;  %v256_v6 = vadd.f32 %v255_v1, %v711_v56  ;;  %v261_v7 = vadd.f32 %v260_v3, %v711_v56  ;;  %v798_v56 = vsub.f32 %v341_v8, %v372_v61 }
  0xa1   : > { %608 = vpow2.f32 %v269_v58  ;;  %v427_v61 = vmul.f32 %v758_v40, %v418_v5 }
  0xa2   : > { %v599_v62 = vpop.eup %598  ;;  %v273_v14 = vmul.f32 1.442695, %v256_v6  ;;  %v277_v54 = vmul.f32 1.442695, %v261_v7  ;;  %v817_v49 = vmul.f32 %v692_v46, %v798_v56 }
  0xa3   : > { %v601_v15 = vpop.eup %600  ;;  %v283_v18 = vadd.f32 1.0, %v599_v62 }
  0xa4   : > { %v603_v20 = vpop.eup %602  ;;  %v285_v22 = vadd.f32 1.0, %v601_v15  ;;  %610 = vpow2.f32 %v273_v14  ;;  %v403_v38 = vfloor.f32 %v817_v49  ;;  %v417_v14 = vsub.f32 %v779_v2, %v409_v45 }
  0xa5   : > { %v605_v8 = vpop.eup %604  ;;  %v295_v24 = vsub.f32 1.0, %v603_v20  ;;  %612 = vrcp.f32 %v283_v18  ;;  %v441_v2 = vmul.f32 %v766_v59, %v399_v60 }
  0xa6   : > { %v607_v25 = vpop.eup %606  ;;  %v297_v26 = vsub.f32 1.0, %v605_v8  ;;  %614 = vrcp.f32 %v285_v22  ;;  %v411_v53 = vmul.f32 8.0, %v403_v38  ;;  %v445_v19 = vmul.f32 %v766_v59, %v403_v38 }
  0xa7   : > { %v609_v28 = vpop.eup %608  ;;  %v307_v29 = vsel %vm772_vm4, %v595_v39, %v295_v24  ;;  %v280_v30 = vadd.f32 1.0, %v607_v25  ;;  %616 = vpow2.f32 %v277_v54 }
  0xa8   : > { %v429_v11 = vadd.f32 %v421_v55, %v307_v29  ;;  %v309_v17 = vsel %vm772_vm4, %v597_v44, %v297_v26  ;;  %v282_v21 = vadd.f32 1.0, %v609_v28  ;;  %v415_v55 = vsub.f32 %v762_v51, %v407_v33 }
  0xa9   : > { %v431_v34 = vadd.f32 %v423_v9, %v309_v17  ;;  %618 = vrcp.f32 %v280_v30  ;;  %v444_v9 = vmul.f32 %v766_v59, %v402_v50  ;;  %v439_v50 = vmul.f32 %v766_v59, %v397_v13 }
  0xaa   : > { %v611_v46 = vpop.eup %610  ;;  %v446_v35 = vadd.f32 %v438_v12, %v429_v11  ;;  %620 = vrcp.f32 %v282_v21  ;;  %v419_v8 = vsub.f32 %v798_v56, %v411_v53  ;;  %v426_v13 = vmul.f32 %v758_v40, %v417_v14 }
  0xab   : > { %v613_v39 = vpop.eup %612  ;;  %v448_v41 = vadd.f32 %v440_v16, %v431_v34  ;;  %v284_v44 = vadd.f32 1.0, %v611_v46  ;;  %v443_v56 = vmul.f32 %v766_v59, %v401_v31 }
  0xac   : > { %v615_v48 = vpop.eup %614  ;;  %v455_v52 = vmul.f32 %v808_v0, %v446_v35  ;;  %v299_v58 = vsub.f32 1.0, %v613_v39  ;;  %v428_v29 = vmul.f32 %v758_v40, %v419_v8 }
  0xad   : > { %v617_v1 = vpop.eup %616  ;;  %v457_v3 = vmul.f32 %v808_v0, %v448_v41  ;;  %v301_v6 = vsub.f32 1.0, %v615_v48  ;;  %622 = vrcp.f32 %v284_v44 }
  0xae   : > { %463 = vst [vmem:[%s832_s29] sm:$0xff] %v455_v52  ;;  %v311_v7 = vsel %vm772_vm4, %v599_v62, %v299_v58  ;;  %v286_v10 = vadd.f32 1.0, %v617_v1  ;;  %v424_v62 = vmul.f32 %v758_v40, %v415_v55 }
  0xaf   : > { %v619_v51 = vpop.eup %618  ;;  %465 = vst [vmem:[%s832_s29 + $0x10] sm:$0xff] %v457_v3  ;;  %v433_v12 = vadd.f32 %v425_v36, %v311_v7  ;;  %v313_v23 = vsel %vm772_vm4, %v601_v15, %v301_v6 }
  0xb0   : > { %v621_v16 = vpop.eup %620  ;;  %v435_v18 = vadd.f32 %v427_v61, %v313_v23  ;;  %v296_v54 = vsub.f32 1.0, %v619_v51  ;;  %624 = vrcp.f32 %v286_v10 }
  0xb1   : > { %v450_v32 = vadd.f32 %v442_v37, %v433_v12  ;;  %v298_v20 = vsub.f32 1.0, %v621_v16 }
  0xb2   : > { %v452_v22 = vadd.f32 %v444_v9, %v435_v18  ;;  %v308_v15 = vsel %vm772_vm4, %v607_v25, %v296_v54 }
  0xb3   : > { %v623_v24 = vpop.eup %622  ;;  %v459_v57 = vmul.f32 %v808_v0, %v450_v32  ;;  %v430_v5 = vadd.f32 %v422_v42, %v308_v15  ;;  %v310_v47 = vsel %vm772_vm4, %v609_v28, %v298_v20 }
  0xb4   : > { %v461_v26 = vmul.f32 %v808_v0, %v452_v22  ;;  %v432_v27 = vadd.f32 %v424_v62, %v310_v47  ;;  %v300_v25 = vsub.f32 1.0, %v623_v24 }
  0xb5   : > { %467 = vst [vmem:[%s832_s29 + $0x20] sm:$0xff] %v459_v57  ;;  %v447_v4 = vadd.f32 %v439_v50, %v430_v5 }
  0xb6   : > { %v625_v60 = vpop.eup %624  ;;  %469 = vst [vmem:[%s832_s29 + $0x30] sm:$0xff] %v461_v26  ;;  %v449_v49 = vadd.f32 %v441_v2, %v432_v27  ;;  %v312_v28 = vsel %vm772_vm4, %v611_v46, %v300_v25 }
  0xb7   : > { %v456_v30 = vmul.f32 %v808_v0, %v447_v4  ;;  %v434_v11 = vadd.f32 %v426_v13, %v312_v28  ;;  %v302_v17 = vsub.f32 1.0, %v625_v60 }
  0xb8   : > { %v458_v21 = vmul.f32 %v808_v0, %v449_v49 }
  0xb9   : > { %464 = vst [vmem:[%s832_s29 + $0x8] sm:$0xff] %v456_v30  ;;  %v451_v31 = vadd.f32 %v443_v56, %v434_v11  ;;  %v314_v33 = vsel %vm772_vm4, %v617_v1, %v302_v17 }
  0xba   : > { %466 = vst [vmem:[%s832_s29 + $0x18] sm:$0xff] %v458_v21  ;;  %v436_v34 = vadd.f32 %v428_v29, %v314_v33 }
  0xbb   : > { %v460_v46 = vmul.f32 %v808_v0, %v451_v31 }
  0xbc   : > { %v453_v35 = vadd.f32 %v445_v19, %v436_v34 }
  0xbd   : > { %468 = vst [vmem:[%s832_s29 + $0x28] sm:$0xff] %v460_v46 }
  0xbe   : > { %v462_v40 = vmul.f32 %v808_v0, %v453_v35 }
  0xc0   : > { %470 = vst [vmem:[%s832_s29 + $0x38] sm:$0xff] %v462_v40 }
  0xc1 PF: > { %s13_s12 = sadd.s32 1, %s632_s12  }
  0xc2   : > { %p10_p4 = scmp.ge.s32.totalorder %s13_s12, 4  }
  0xc4   :  { %12 = sbr.rel (!%p10_p4) target bundleno = 1 (0x1), region = 62 }

// kernel: darknet_forward.15
= control target key start
LH: loop header
LB: loop body
LE: loop exit
PB: predicated region body
PF: predicated region fallthrough
CT: control target
= control target key end

     0   :  { %s1557_s12 = smov 0   ;;  %s2144_s0 = inlined_call_operand.vmem [shape: bf16[512,32], index: 0, kind: input, shape index: {}]   ;;  %s2145_s1 = inlined_call_operand.vmem [shape: bf16[32,128], index: 1, kind: input, shape index: {}]   ;;  %s2146_s2 = inlined_call_operand.vmem [shape: f32[8,128], index: 2, kind: input, shape index: {}]   ;;  %s2147_s3 = inlined_call_operand.vmem [shape: f32[512,128], index: 3, kind: output, shape index: {}]  }
   0x1 LB: > { %s1259_s13 = sadd.s32 4294967295, %s1532_s12   ;;  %p1263_p0 = scmp.ge.s32.totalorder %s1532_s12, 1  ;;  %s1532_s12 = sphi %s1557_s12, %s13_s12  }
   0x2   : > { %p138_p1 = scmp.lt.s32.totalorder %s1532_s12, 3 }
   0x4   : > { %p139_p2 = pnand %p1263_p0, %p138_p1 }
   0x5   : > { %s1264_s16 = sshll.u32 (!%p139_p2), %s1259_s13, 5  ;;  %s1356_s23 = sshll.u32 (!%p139_p2), %s1259_s13, 8 }
   0x6   : > { %142 = sbr.rel (%p139_p2) target bundleno = 321 (0x141), region = 32  ;;  %p163_p3 = scmp.lt.s32.totalorder (!%p139_p2), %s1264_s16, 63 }
   0xb   : > { %v1376_v0 = vld [vmem:[%s2145_s1 + $0x8] sm:$0xff]  ;;  %v1375_v1 = vld [vmem:[%s2145_s1] sm:$0xff]  ;;  %s2151_s16 = smov (!%p163_p3, %s1264_s16), 63  ;;  %vm305_vm0 = vcmask 261120   ;;  %v1534_v18 = vmov 256.0   ;;  %v640_v20 = vlaneseq  ;;  %v1535_v23 = vmov 16.0  }
   0xc   : > { %360 = vmatpush.bf16.msra.mxu0 %v1376_v0  ;;  %1377 = vmatpush.bf16.msra.mxu1 %v1376_v0  ;;  %s1265_s19 = sshll.u32 %s2151_s16, 2  ;;  %1394 = vrcp.f32 %v1534_v18  ;;  %v1618_v26 = vstv %s1356_s23  ;;  %s1267_s26 = sshll.u32 %s2151_s16, 3 }
   0xd   : > { %1378 = vmatpush.bf16.msra.mxu2 %v1376_v0  ;;  %1379 = vmatpush.bf16.msra.mxu3 %v1376_v0  ;;  %s1579_s22 = scalar_lea.vmem %s2144_s0, %s1265_s19  ;;  %v1615_v22 = vshrl.u32 %v640_v20, 7  ;;  %1396 = vrcp.f32 %v1535_v23  ;;  %s1807_s29 = scalar_lea.vmem %s2147_s3, %s1267_s26 }
   0xe   : > { %v1359_v2 = vld [vmem:[%s1579_s22] sm:$0xff]  ;;  %v1360_v6 = vld [vmem:[%s1579_s22 + $0x8] sm:$0xff]  ;;  %v1361_v10 = vld [vmem:[%s1579_s22 + $0x10] sm:$0xff] }
   0xf   : > { %v1363_v3 = vld [vmem:[%s1579_s22 + $0x20] sm:$0xff]  ;;  %v1364_v7 = vld [vmem:[%s1579_s22 + $0x28] sm:$0xff]  ;;  %v1365_v11 = vld [vmem:[%s1579_s22 + $0x30] sm:$0xff]  ;;  %v649_v25 = vadd.s32 64, %v1615_v22  ;;  %v674_v28 = vadd.s32 %v1618_v26, %v1615_v22  ;;  %v657_v38 = vadd.s32 128, %v1615_v22  ;;  %v665_v40 = vadd.s32 192, %v1615_v22 }
  0x10   : > { %361 = vmatpush.bf16.msra.mxu0 %v1375_v1  ;;  %1380 = vmatpush.bf16.msra.mxu1 %v1375_v1  ;;  %v1367_v4 = vld [vmem:[%s1579_s22 + $0x40] sm:$0xff]  ;;  %v1368_v8 = vld [vmem:[%s1579_s22 + $0x48] sm:$0xff]  ;;  %v1369_v12 = vld [vmem:[%s1579_s22 + $0x50] sm:$0xff]  ;;  %v642_v49 = vadd.s32 8, %v1615_v22  ;;  %v650_v52 = vadd.s32 72, %v1615_v22 }
  0x11   : > { %1381 = vmatpush.bf16.msra.mxu2 %v1375_v1  ;;  %1382 = vmatpush.bf16.msra.mxu3 %v1375_v1  ;;  %v1371_v5 = vld [vmem:[%s1579_s22 + $0x60] sm:$0xff]  ;;  %v1372_v9 = vld [vmem:[%s1579_s22 + $0x68] sm:$0xff]  ;;  %v1373_v13 = vld [vmem:[%s1579_s22 + $0x70] sm:$0xff]  ;;  %v682_v29 = vadd.s32 %v1618_v26, %v649_v25  ;;  %v706_v32 = vcvt.s32.f32 %v674_v28  ;;  %v690_v43 = vadd.s32 %v1618_v26, %v657_v38  ;;  %v698_v45 = vadd.s32 %v1618_v26, %v665_v40 }
  0x12   : > { %v1362_v14 = vld [vmem:[%s1579_s22 + $0x18] sm:$0xff]  ;;  %v1395_v19 = vpop.eup %1394  ;;  %v675_v58 = vadd.s32 %v1618_v26, %v642_v49  ;;  %v683_v59 = vadd.s32 %v1618_v26, %v650_v52  ;;  %v666_v38 = vadd.s32 200, %v1615_v22 }
  0x13   : > { %1340 = vmatmul.msk.bf16.vlgmr.msra.gmra.mxu0 %vm305_vm0, %v1359_v2  ;;  %1344 = vmatmul.msk.bf16.vlgmr.msra.gmra.mxu1 %vm305_vm0, %v1363_v3  ;;  %v1366_v15 = vld [vmem:[%s1579_s22 + $0x38] sm:$0xff]  ;;  %v739_v21 = vmul.f32 256.0, %v1395_v19  ;;  %v1397_v31 = vpop.eup %1396  ;;  %vm743_vm1 = vweird.f32 %v1395_v19  ;;  %v714_v33 = vcvt.s32.f32 %v682_v29  ;;  %v722_v48 = vcvt.s32.f32 %v690_v43 }
  0x14   : > { %1348 = vmatmul.msk.bf16.vlgmr.msra.gmra.mxu2 %vm305_vm0, %v1367_v4  ;;  %1352 = vmatmul.msk.bf16.vlgmr.msra.gmra.mxu3 %vm305_vm0, %v1371_v5  ;;  %v1370_v16 = vld [vmem:[%s1579_s22 + $0x58] sm:$0xff]  ;;  %v874_v35 = vmul.f32 16.0, %v1397_v31  ;;  %v730_v51 = vcvt.s32.f32 %v698_v45  ;;  %vm878_vm2 = vweird.f32 %v1397_v31  ;;  %v707_v0 = vcvt.s32.f32 %v675_v58  ;;  %v211_v5 = vld [vmem:[%s2146_s2] sm:$0xff] }
  0x15   : > { %v1374_v17 = vld [vmem:[%s1579_s22 + $0x78] sm:$0xff]  ;;  %v740_v24 = vsub.f32 1.0, %v739_v21  ;;  %v715_v1 = vcvt.s32.f32 %v683_v59  ;;  %vm603_vm3 = vcmp.ne.f32.partialorder %v211_v5, 0.0  ;;  %v1653_v25 = vperm.slane %v211_v5, 0 }
  0x16   : > { %v875_v39 = vsub.f32 1.0, %v874_v35  ;;  %v1659_v29 = vperm.slane %v211_v5, 4  ;;  %v699_v45 = vadd.s32 %v1618_v26, %v666_v38 }
  0x17   : > { %v741_v27 = vmul.f32 %v1395_v19, %v740_v24 }
  0x18   : > { %v876_v44 = vmul.f32 %v1397_v31, %v875_v39 }
  0x19   : > { %v742_v30 = vadd.f32 %v1395_v19, %v741_v27 }
  0x1a   : > { %v877_v50 = vadd.f32 %v1397_v31, %v876_v44 }
  0x1b   : > { %v1623_v34 = vsel %vm743_vm1, %v1395_v19, %v742_v30  ;;  %v658_v19 = vadd.s32 136, %v1615_v22 }
  0x1c   : > { %v745_v36 = vmul.f32 %v1623_v34, %v706_v32  ;;  %v753_v37 = vmul.f32 %v1623_v34, %v714_v33  ;;  %v761_v55 = vmul.f32 %v1623_v34, %v722_v48  ;;  %v1634_v56 = vsel %vm878_vm2, %v1397_v31, %v877_v50 }
  0x1d   : > { %v769_v57 = vmul.f32 %v1623_v34, %v730_v51  ;;  %v651_v50 = vadd.s32 80, %v1615_v22 }
  0x1e   : > { %v777_v41 = vfloor.f32 %v745_v36  ;;  %v785_v42 = vfloor.f32 %v753_v37  ;;  %v793_v62 = vfloor.f32 %v761_v55  ;;  %v691_v37 = vadd.s32 %v1618_v26, %v658_v19 }
  0x1f   : > { %v801_v63 = vfloor.f32 %v769_v57  ;;  %v1679_v55 = vperm.slane %v211_v5, 2  ;;  %v684_v59 = vadd.s32 %v1618_v26, %v651_v50 }
  0x20   : > { %v809_v46 = vmul.f32 256.0, %v777_v41  ;;  %v817_v47 = vmul.f32 256.0, %v785_v42  ;;  %v825_v4 = vmul.f32 256.0, %v793_v62  ;;  %v723_v44 = vcvt.s32.f32 %v691_v37 }
  0x22   : > { %v841_v53 = vsub.f32 %v706_v32, %v809_v46  ;;  %v849_v54 = vsub.f32 %v714_v33, %v817_v47  ;;  %v643_v46 = vadd.s32 16, %v1615_v22  ;;  %v762_v52 = vmul.f32 %v1623_v34, %v723_v44 }
  0x23   : > { %1341 = vmatmul.msk.bf16.gmra.mxu0 %vm305_vm0, %v1360_v6  ;;  %1345 = vmatmul.msk.bf16.gmra.mxu1 %vm305_vm0, %v1364_v7  ;;  %v833_v6 = vmul.f32 256.0, %v801_v63  ;;  %v746_v7 = vmul.f32 %v1623_v34, %v707_v0 }
  0x24   : > { %1349 = vmatmul.msk.bf16.gmra.mxu2 %vm305_vm0, %v1368_v8  ;;  %1353 = vmatmul.msk.bf16.gmra.mxu3 %vm305_vm0, %v1372_v9  ;;  %v880_v60 = vmul.f32 %v1634_v56, %v841_v53  ;;  %v888_v61 = vmul.f32 %v1634_v56, %v849_v54  ;;  %v754_v8 = vmul.f32 %v1623_v34, %v715_v1  ;;  %v794_v62 = vfloor.f32 %v762_v52 }
  0x26   : > { %v912_v2 = vfloor.f32 %v880_v60  ;;  %v920_v3 = vfloor.f32 %v888_v61  ;;  %v786_v24 = vfloor.f32 %v754_v8 }
  0x28   : > { %v944_v9 = vmul.f32 16.0, %v912_v2  ;;  %v818_v33 = vmul.f32 256.0, %v786_v24  ;;  %v1662_v35 = vmul.f32 %v1659_v29, %v912_v2  ;;  %v1670_v39 = vmul.f32 %v1659_v29, %v920_v3 }
  0x2a   : > { %v850_v43 = vsub.f32 %v715_v1, %v818_v33 }
  0x33   : > { %1342 = vmatmul.msk.bf16.gmra.mxu0 %vm305_vm0, %v1361_v10  ;;  %1346 = vmatmul.msk.bf16.gmra.mxu1 %vm305_vm0, %v1365_v11  ;;  %v952_v10 = vmul.f32 16.0, %v920_v3  ;;  %v1536_v11 = vmov 0  }
  0x34   : > { %1350 = vmatmul.msk.bf16.gmra.mxu2 %vm305_vm0, %v1369_v12  ;;  %1354 = vmatmul.msk.bf16.gmra.mxu3 %vm305_vm0, %v1373_v13  ;;  %v1646_v12 = vsel %vm603_vm3, 1, %v1536_v11  ;;  %v857_v13 = vsub.f32 %v722_v48, %v825_v4 }
  0x35   : > { %v984_v18 = vsub.f32 %v849_v54, %v952_v10  ;;  %v605_v27 = vperm.slane %v1646_v12, 1  ;;  %v676_v54 = vadd.s32 %v1618_v26, %v643_v46 }
  0x36   : > { %v896_v20 = vmul.f32 %v1634_v56, %v857_v13 }
  0x37   : > { %v708_v4 = vcvt.s32.f32 %v676_v54  ;;  %vm1732_vm4 = vcmp.eq.s32.totalorder %v605_v27, 1 }
  0x38   : > { %v928_v30 = vfloor.f32 %v896_v20 }
  0x3a   : > { %v960_v40 = vmul.f32 16.0, %v928_v30  ;;  %v1690_v2 = vmul.f32 %v1659_v29, %v928_v30 }
  0x3c   : > { %v992_v47 = vsub.f32 %v857_v13, %v960_v40  ;;  %v747_v13 = vmul.f32 %v1623_v34, %v708_v4 }
  0x3e   : > { %v779_v24 = vfloor.f32 %v747_v13 }
  0x40   : > { %v811_v38 = vmul.f32 256.0, %v779_v24 }
  0x42   : > { %v843_v54 = vsub.f32 %v708_v4, %v811_v38 }
  0x43   : > { %1343 = vmatmul.msk.bf16.gmra.mxu0 %vm305_vm0, %v1362_v14  ;;  %1347 = vmatmul.msk.bf16.gmra.mxu1 %vm305_vm0, %v1366_v15  ;;  %v865_v14 = vsub.f32 %v730_v51, %v833_v6  ;;  %v778_v15 = vfloor.f32 %v746_v7  ;;  %v889_v51 = vmul.f32 %v1634_v56, %v850_v43 }
  0x44   : > { %1351 = vmatmul.msk.bf16.gmra.mxu2 %vm305_vm0, %v1370_v16  ;;  %1355 = vmatmul.msk.bf16.gmra.mxu3 %vm305_vm0, %v1374_v17  ;;  %v976_v16 = vsub.f32 %v841_v53, %v944_v9  ;;  %v1648_v17 = vperm.slane %v211_v5, 3  ;;  %v731_v53 = vcvt.s32.f32 %v699_v45  ;;  %v716_v5 = vcvt.s32.f32 %v684_v59 }
  0x45   : > { %v904_v21 = vmul.f32 %v1634_v56, %v865_v14  ;;  %v810_v23 = vmul.f32 256.0, %v778_v15  ;;  %v921_v61 = vfloor.f32 %v889_v51  ;;  %v826_v9 = vmul.f32 256.0, %v794_v62 }
  0x46   : > { %v1657_v28 = vmul.f32 %v1648_v17, %v976_v16  ;;  %v1665_v36 = vmul.f32 %v1648_v17, %v984_v18  ;;  %v1682_v57 = vmul.f32 %v1648_v17, %v992_v47  ;;  %v770_v63 = vmul.f32 %v1623_v34, %v731_v53 }
  0x47   : > { %v936_v31 = vfloor.f32 %v904_v21  ;;  %v842_v32 = vsub.f32 %v707_v0, %v810_v23  ;;  %v953_v8 = vmul.f32 16.0, %v921_v61  ;;  %v858_v21 = vsub.f32 %v723_v44, %v826_v9 }
  0x48   : > { %v802_v11 = vfloor.f32 %v770_v63  ;;  %v1706_v30 = vmul.f32 %v1659_v29, %v921_v61  ;;  %v667_v45 = vadd.s32 208, %v1615_v22 }
  0x49   : > { %v968_v41 = vmul.f32 16.0, %v936_v31  ;;  %v881_v42 = vmul.f32 %v1634_v56, %v842_v32  ;;  %v1695_v10 = vmul.f32 %v1659_v29, %v936_v31  ;;  %v985_v19 = vsub.f32 %v850_v43, %v953_v8 }
  0x4a   : > { %v834_v23 = vmul.f32 256.0, %v802_v11  ;;  %v897_v33 = vmul.f32 %v1634_v56, %v858_v21 }
  0x4b   : > { %v1000_v48 = vsub.f32 %v865_v14, %v968_v41  ;;  %v913_v49 = vfloor.f32 %v881_v42  ;;  %v755_v14 = vmul.f32 %v1623_v34, %v716_v5  ;;  %v1711_v42 = vmul.f32 %v1648_v17, %v985_v19 }
  0x4c   : > { %v866_v37 = vsub.f32 %v731_v53, %v834_v23  ;;  %v929_v50 = vfloor.f32 %v897_v33 }
  0x4d   : > { %v945_v58 = vmul.f32 16.0, %v913_v49  ;;  %v1686_v60 = vmul.f32 %v1648_v17, %v1000_v48  ;;  %v1703_v20 = vmul.f32 %v1659_v29, %v913_v49  ;;  %v787_v31 = vfloor.f32 %v755_v14 }
  0x4e   : > { %v905_v51 = vmul.f32 %v1634_v56, %v866_v37  ;;  %v961_v62 = vmul.f32 16.0, %v929_v50  ;;  %v1725_v63 = vmul.f32 %v1659_v29, %v929_v50 }
  0x4f   : > { %v977_v3 = vsub.f32 %v842_v32, %v945_v58  ;;  %v659_v32 = vadd.s32 144, %v1615_v22  ;;  %v819_v43 = vmul.f32 256.0, %v787_v31  ;;  %v1747_v31 = vadd.s32 %v1618_v26, %v667_v45 }
  0x51   : > { %v1700_v18 = vmul.f32 %v1648_v17, %v977_v3  ;;  %v1714_v44 = vadd.s32 %v1618_v26, %v659_v32  ;;  %v1722_v58 = vsub.f32 %v716_v5, %v819_v43  ;;  %v993_v5 = vsub.f32 %v858_v21, %v961_v62 }
  0x53   : > { %v890_v11 = vmul.f32 %v1634_v56, %v1722_v58  ;;  %v724_v24 = vcvt.s32.f32 %v1714_v44 }
  0x55   : > { %v922_v27 = vfloor.f32 %v890_v11 }
  0x90   : > { %v363_v0 = vpop.f32.mrf.mxu0  ;;  %v383_v1 = vpop.f32.mrf.mxu1 }
  0x91   : > { %v364_v6 = vadd.f32 %v363_v0, %v1653_v25  ;;  %v384_v7 = vadd.f32 %v383_v1, %v1653_v25 }
  0x93   : > { %v443_v15 = vmul.f32 1.442695, %v364_v6  ;;  %v459_v16 = vmul.f32 1.442695, %v384_v7  ;;  %v937_v6 = vfloor.f32 %v905_v51  ;;  %v882_v7 = vmul.f32 %v1634_v56, %v843_v54 }
  0x95   : > { %1398 = vpow2.f32 %v443_v15  ;;  %v969_v14 = vmul.f32 16.0, %v937_v6  ;;  %v1740_v15 = vmul.f32 %v1659_v29, %v937_v6  ;;  %v914_v12 = vfloor.f32 %v882_v7 }
  0x96   : > { %1400 = vpow2.f32 %v459_v16  ;;  %v1743_v16 = vmul.f32 %v1648_v17, %v993_v5  ;;  %v763_v5 = vmul.f32 %v1623_v34, %v724_v24 }
  0x97   : > { %v403_v40 = vpop.f32.mrf.mxu2  ;;  %v423_v41 = vpop.f32.mrf.mxu3  ;;  %v1001_v21 = vsub.f32 %v866_v37, %v969_v14  ;;  %v1756_v37 = vmul.f32 %v1659_v29, %v914_v12  ;;  %v732_v14 = vcvt.s32.f32 %v1747_v31 }
  0x98   : > { %v404_v46 = vadd.f32 %v403_v40, %v1653_v25  ;;  %v424_v47 = vadd.f32 %v423_v41, %v1653_v25  ;;  %v365_v48 = vpop.f32.mrf.mxu0  ;;  %v385_v49 = vpop.f32.mrf.mxu1  ;;  %v946_v40 = vmul.f32 16.0, %v914_v12  ;;  %v1779_v12 = vadd.s32 24, %v1615_v22 }
  0x99   : > { %v366_v52 = vadd.f32 %v365_v48, %v1653_v25  ;;  %v386_v53 = vadd.f32 %v385_v49, %v1653_v25  ;;  %v1752_v43 = vmul.f32 %v1648_v17, %v1001_v21 }
  0x9a   : > { %v475_v59 = vmul.f32 1.442695, %v404_v46  ;;  %v491_v61 = vmul.f32 1.442695, %v424_v47  ;;  %v978_v49 = vsub.f32 %v843_v54, %v946_v40 }
  0x9b   : > { %v1399_v0 = vpop.eup %1398  ;;  %v445_v1 = vmul.f32 1.442695, %v366_v52  ;;  %v461_v3 = vmul.f32 1.442695, %v386_v53 }
  0x9c   : > { %v1728_v8 = vpop.eup %1400  ;;  %v507_v9 = vadd.f32 1.0, %v1399_v0  ;;  %1402 = vpow2.f32 %v475_v59  ;;  %v954_v59 = vmul.f32 16.0, %v922_v27 }
  0x9d   : > { %v515_v13 = vadd.f32 1.0, %v1728_v8  ;;  %1404 = vpow2.f32 %v491_v61  ;;  %v1765_v61 = vmul.f32 %v1659_v29, %v922_v27 }
  0x9e   : > { %1406 = vrcp.f32 %v507_v9  ;;  %v986_v9 = vsub.f32 %v1722_v58, %v954_v59 }
  0x9f   : > { %1408 = vrcp.f32 %v515_v13  ;;  %v405_v19 = vpop.f32.mrf.mxu2  ;;  %v425_v23 = vpop.f32.mrf.mxu3 }
  0xa0   : > { %1410 = vpow2.f32 %v445_v1  ;;  %v406_v32 = vadd.f32 %v405_v19, %v1653_v25  ;;  %v426_v33 = vadd.f32 %v425_v23, %v1653_v25  ;;  %v368_v38 = vpop.f32.mrf.mxu0  ;;  %v388_v41 = vpop.f32.mrf.mxu1  ;;  %v1787_v23 = vmul.f32 %v1648_v17, %v986_v9 }
  0xa1   : > { %1412 = vpow2.f32 %v461_v3  ;;  %v369_v46 = vadd.f32 %v368_v38, %v1653_v25  ;;  %v389_v50 = vadd.f32 %v388_v41, %v1653_v25  ;;  %v1769_v3 = vmul.f32 %v1648_v17, %v978_v49 }
  0xa2   : > { %v1758_v47 = vpop.eup %1402  ;;  %v477_v45 = vmul.f32 1.442695, %v406_v32  ;;  %v493_v48 = vmul.f32 1.442695, %v426_v33 }
  0xa3   : > { %v1761_v51 = vpop.eup %1404  ;;  %v523_v52 = vadd.f32 1.0, %v1758_v47  ;;  %v447_v53 = vmul.f32 1.442695, %v369_v46  ;;  %v463_v6 = vmul.f32 1.442695, %v389_v50  ;;  %v795_v46 = vfloor.f32 %v763_v5 }
  0xa4   : > { %v1407_v62 = vpop.eup %1406  ;;  %v531_v1 = vadd.f32 1.0, %v1761_v51  ;;  %1414 = vpow2.f32 %v477_v45 }
  0xa5   : > { %v1409_v54 = vpop.eup %1408  ;;  %v571_v7 = vsub.f32 1.0, %v1407_v62  ;;  %1416 = vrcp.f32 %v523_v52  ;;  %v827_v62 = vmul.f32 256.0, %v795_v46 }
  0xa6   : > { %v1775_v11 = vpop.eup %1410  ;;  %v579_v13 = vsub.f32 1.0, %v1409_v54  ;;  %1418 = vrcp.f32 %v531_v1 }
  0xa7   : > { %v1781_v27 = vpop.eup %1412  ;;  %v607_v19 = vsel %vm1732_vm4, %v1399_v0, %v571_v7  ;;  %v508_v58 = vadd.f32 1.0, %v1775_v11  ;;  %1420 = vpow2.f32 %v493_v48  ;;  %v408_v21 = vpop.f32.mrf.mxu2 }
  0xa8   : > { %v428_v32 = vpop.f32.mrf.mxu3  ;;  %v1041_v33 = vadd.f32 %v1657_v28, %v607_v19  ;;  %v615_v38 = vsel %vm1732_vm4, %v1728_v8, %v579_v13  ;;  %v516_v40 = vadd.f32 1.0, %v1781_v27  ;;  %1422 = vpow2.f32 %v447_v53 }
  0xa9   : > { %v1049_v0 = vadd.f32 %v1665_v36, %v615_v38  ;;  %1424 = vrcp.f32 %v508_v58  ;;  %v409_v41 = vadd.f32 %v408_v21, %v1653_v25  ;;  %v429_v28 = vadd.f32 %v428_v32, %v1653_v25 }
  0xaa   : > { %v1797_v45 = vpop.eup %1414  ;;  %v1106_v48 = vadd.f32 %v1662_v35, %v1041_v33  ;;  %1426 = vrcp.f32 %v516_v40  ;;  %v771_v8 = vmul.f32 %v1623_v34, %v732_v14  ;;  %v1824_v19 = vsub.f32 %v724_v24, %v827_v62 }
  0xab   : > { %v1417_v49 = vpop.eup %1416  ;;  %v1114_v36 = vadd.f32 %v1670_v39, %v1049_v0  ;;  %v524_v50 = vadd.f32 1.0, %v1797_v45  ;;  %1428 = vpow2.f32 %v463_v6  ;;  %v479_v35 = vmul.f32 1.442695, %v409_v41 }
  0xac   : > { %v1419_v52 = vpop.eup %1418  ;;  %v1139_v53 = vmul.f32 %v1679_v55, %v1106_v48  ;;  %v587_v59 = vsub.f32 1.0, %v1417_v49  ;;  %v495_v1 = vmul.f32 1.442695, %v429_v28  ;;  %v803_v5 = vfloor.f32 %v771_v8 }
  0xad   : > { %v1812_v54 = vpop.eup %1420  ;;  %v1147_v7 = vmul.f32 %v1679_v55, %v1114_v36  ;;  %v595_v9 = vsub.f32 1.0, %v1419_v52  ;;  %1430 = vrcp.f32 %v524_v50  ;;  %v898_v44 = vmul.f32 %v1634_v56, %v1824_v19 }
  0xae   : > { %v1815_v13 = vpop.eup %1422  ;;  %1171 = vst [vmem:[%s1807_s29] sm:$0xff] %v1139_v53  ;;  %v623_v39 = vsel %vm1732_vm4, %v1758_v47, %v587_v59  ;;  %v532_v6 = vadd.f32 1.0, %v1812_v54  ;;  %1432 = vpow2.f32 %v479_v35  ;;  %v835_v41 = vmul.f32 256.0, %v803_v5 }
  0xaf   : > { %v1425_v58 = vpop.eup %1424  ;;  %1179 = vst [vmem:[%s1807_s29 + $0x40] sm:$0xff] %v1147_v7  ;;  %v1057_v21 = vadd.f32 %v1682_v57, %v623_v39  ;;  %v631_v32 = vsel %vm1732_vm4, %v1761_v51, %v595_v9  ;;  %v509_v33 = vadd.f32 1.0, %v1815_v13  ;;  %1434 = vpow2.f32 %v495_v1  ;;  %v370_v1 = vpop.f32.mrf.mxu0 }
  0xb0   : > { %v1427_v38 = vpop.eup %1426  ;;  %v1065_v47 = vadd.f32 %v1686_v60, %v631_v32  ;;  %v572_v40 = vsub.f32 1.0, %v1425_v58  ;;  %1436 = vrcp.f32 %v532_v6  ;;  %v930_v48 = vfloor.f32 %v898_v44 }
  0xb1   : > { %v1835_v24 = vpop.eup %1428  ;;  %v1122_v0 = vadd.f32 %v1690_v2, %v1057_v21  ;;  %v580_v57 = vsub.f32 1.0, %v1427_v38  ;;  %1438 = vrcp.f32 %v509_v33  ;;  %v371_v33 = vadd.f32 %v370_v1, %v1653_v25 }
  0xb2   : > { %v1130_v51 = vadd.f32 %v1695_v10, %v1065_v47  ;;  %v608_v46 = vsel %vm1732_vm4, %v1775_v11, %v572_v40  ;;  %v517_v60 = vadd.f32 1.0, %v1835_v24  ;;  %v1850_v10 = vsub.f32 %v732_v14, %v835_v41  ;;  %v390_v40 = vpop.f32.mrf.mxu1 }
  0xb3   : > { %v1431_v28 = vpop.eup %1430  ;;  %v1155_v8 = vmul.f32 %v1679_v55, %v1122_v0  ;;  %v1042_v49 = vadd.f32 %v1700_v18, %v608_v46  ;;  %v616_v2 = vsel %vm1732_vm4, %v1781_v27, %v580_v57  ;;  %v962_v27 = vmul.f32 16.0, %v930_v48 }
  0xb4   : > { %v1852_v36 = vpop.eup %1432  ;;  %v1163_v11 = vmul.f32 %v1679_v55, %v1130_v51  ;;  %v1050_v50 = vadd.f32 %v1711_v42, %v616_v2  ;;  %v588_v35 = vsub.f32 1.0, %v1431_v28  ;;  %1440 = vrcp.f32 %v517_v60  ;;  %v410_v2 = vpop.f32.mrf.mxu2 }
  0xb5   : > { %v1856_v52 = vpop.eup %1434  ;;  %1187 = vst [vmem:[%s1807_s29 + $0x80] sm:$0xff] %v1155_v8  ;;  %v1107_v18 = vadd.f32 %v1703_v20, %v1042_v49  ;;  %v525_v53 = vadd.f32 1.0, %v1852_v36  ;;  %v1862_v31 = vmul.f32 %v1659_v29, %v930_v48  ;;  %v906_v20 = vmul.f32 %v1634_v56, %v1850_v10 }
  0xb6   : > { %v1437_v14 = vpop.eup %1436  ;;  %1195 = vst [vmem:[%s1807_s29 + $0xc0] sm:$0xff] %v1163_v11  ;;  %v1115_v59 = vadd.f32 %v1706_v30, %v1050_v50  ;;  %v624_v42 = vsel %vm1732_vm4, %v1797_v45, %v588_v35  ;;  %v533_v62 = vadd.f32 1.0, %v1856_v52  ;;  %v994_v58 = vsub.f32 %v1824_v19, %v962_v27 }
  0xb7   : > { %v1439_v7 = vpop.eup %1438  ;;  %v1140_v9 = vmul.f32 %v1679_v55, %v1107_v18  ;;  %v1058_v5 = vadd.f32 %v1743_v16, %v624_v42  ;;  %v596_v39 = vsub.f32 1.0, %v1437_v14  ;;  %1442 = vrcp.f32 %v525_v53  ;;  %v430_v42 = vpop.f32.mrf.mxu3 }
  0xb8   : > { %v1148_v30 = vmul.f32 %v1679_v55, %v1115_v59  ;;  %v573_v6 = vsub.f32 1.0, %v1439_v7  ;;  %1444 = vrcp.f32 %v533_v62  ;;  %v938_v32 = vfloor.f32 %v906_v20 }
  0xb9   : > { %1172 = vst [vmem:[%s1807_s29 + $0x8] sm:$0xff] %v1140_v9  ;;  %v1123_v45 = vadd.f32 %v1725_v63, %v1058_v5  ;;  %v632_v21 = vsel %vm1732_vm4, %v1812_v54, %v596_v39  ;;  %v1027_v47 = vmul.f32 %v1648_v17, %v994_v58  ;;  %v677_v63 = vadd.s32 %v1618_v26, %v1779_v12  ;;  %v373_v58 = vpop.f32.mrf.mxu0 }
  0xba   : > { %v1441_v38 = vpop.eup %1440  ;;  %1180 = vst [vmem:[%s1807_s29 + $0x48] sm:$0xff] %v1148_v30  ;;  %v1066_v16 = vadd.f32 %v1752_v43, %v632_v21  ;;  %v609_v19 = vsel %vm1732_vm4, %v1815_v13, %v573_v6  ;;  %v970_v57 = vmul.f32 16.0, %v938_v32  ;;  %v1100_v43 = vmul.f32 %v1659_v29, %v938_v32 }
  0xbb   : > { %v1156_v54 = vmul.f32 %v1679_v55, %v1123_v45  ;;  %v1043_v44 = vadd.f32 %v1769_v3, %v609_v19  ;;  %v581_v0 = vsub.f32 1.0, %v1441_v38  ;;  %v449_v51 = vmul.f32 1.442695, %v371_v33 }
  0xbc   : > { %v1131_v41 = vadd.f32 %v1740_v15, %v1066_v16  ;;  %v709_v46 = vcvt.s32.f32 %v677_v63  ;;  %v1002_v48 = vsub.f32 %v1850_v10, %v970_v57  ;;  %v391_v3 = vadd.f32 %v390_v40, %v1653_v25  ;;  %v393_v40 = vpop.f32.mrf.mxu1 }
  0xbd   : > { %v1443_v60 = vpop.eup %1442  ;;  %1188 = vst [vmem:[%s1807_s29 + $0x88] sm:$0xff] %v1156_v54  ;;  %v1108_v13 = vadd.f32 %v1756_v37, %v1043_v44  ;;  %v617_v12 = vsel %vm1732_vm4, %v1835_v24, %v581_v0  ;;  %1446 = vpow2.f32 %v449_v51  ;;  %v411_v59 = vadd.f32 %v410_v2, %v1653_v25 }
  0xbe   : > { %v1445_v28 = vpop.eup %1444  ;;  %v1164_v15 = vmul.f32 %v1679_v55, %v1131_v41  ;;  %v1051_v8 = vadd.f32 %v1787_v23, %v617_v12  ;;  %v589_v49 = vsub.f32 1.0, %v1443_v60  ;;  %v1035_v50 = vmul.f32 %v1648_v17, %v1002_v48 }
  0xbf   : > { %v1141_v11 = vmul.f32 %v1679_v55, %v1108_v13  ;;  %v597_v37 = vsub.f32 1.0, %v1445_v28  ;;  %v748_v24 = vmul.f32 %v1623_v34, %v709_v46  ;;  %v465_v18 = vmul.f32 1.442695, %v391_v3 }
  0xc0   : > { %1196 = vst [vmem:[%s1807_s29 + $0xc8] sm:$0xff] %v1164_v15  ;;  %v1116_v10 = vadd.f32 %v1765_v61, %v1051_v8  ;;  %v625_v35 = vsel %vm1732_vm4, %v1852_v36, %v589_v49  ;;  %v652_v23 = vadd.s32 88, %v1615_v22  ;;  %v481_v7 = vmul.f32 1.442695, %v411_v59 }
  0xc1   : > { %1173 = vst [vmem:[%s1807_s29 + $0x10] sm:$0xff] %v1141_v11  ;;  %v1059_v53 = vadd.f32 %v1027_v47, %v625_v35  ;;  %v633_v27 = vsel %vm1732_vm4, %v1856_v52, %v597_v37  ;;  %v780_v14 = vfloor.f32 %v748_v24  ;;  %1448 = vpow2.f32 %v465_v18 }
  0xc2   : > { %v1149_v61 = vmul.f32 %v1679_v55, %v1116_v10  ;;  %v1067_v62 = vadd.f32 %v1035_v50, %v633_v27  ;;  %v685_v36 = vadd.s32 %v1618_v26, %v652_v23  ;;  %v660_v9 = vadd.s32 152, %v1615_v22 }
  0xc3   : > { %v1124_v20 = vadd.f32 %v1862_v31, %v1059_v53  ;;  %v812_v1 = vmul.f32 256.0, %v780_v14  ;;  %v1447_v5 = vpop.eup %1446  ;;  %v431_v30 = vadd.f32 %v430_v42, %v1653_v25  ;;  %v668_v6 = vadd.s32 216, %v1615_v22 }
  0xc4   : > { %1181 = vst [vmem:[%s1807_s29 + $0x50] sm:$0xff] %v1149_v61  ;;  %v1132_v52 = vadd.f32 %v1100_v43, %v1067_v62  ;;  %v717_v39 = vcvt.s32.f32 %v685_v36  ;;  %v510_v21 = vadd.f32 1.0, %v1447_v5  ;;  %1450 = vpow2.f32 %v481_v7 }
  0xc5   : > { %v1157_v45 = vmul.f32 %v1679_v55, %v1124_v20  ;;  %v844_v32 = vsub.f32 %v709_v46, %v812_v1  ;;  %v693_v38 = vadd.s32 %v1618_v26, %v660_v9  ;;  %v497_v16 = vmul.f32 1.442695, %v431_v30 }
  0xc6   : > { %v1165_v31 = vmul.f32 %v1679_v55, %v1132_v52  ;;  %v756_v33 = vmul.f32 %v1623_v34, %v717_v39  ;;  %1452 = vrcp.f32 %v510_v21  ;;  %v701_v47 = vadd.s32 %v1618_v26, %v668_v6 }
  0xc7   : > { %1189 = vst [vmem:[%s1807_s29 + $0x90] sm:$0xff] %v1157_v45  ;;  %v883_v19 = vmul.f32 %v1634_v56, %v844_v32  ;;  %v374_v63 = vadd.f32 %v373_v58, %v1653_v25  ;;  %v1449_v54 = vpop.eup %1448  ;;  %v725_v0 = vcvt.s32.f32 %v693_v38  ;;  %1454 = vpow2.f32 %v497_v16 }
  0xc8   : > { %1197 = vst [vmem:[%s1807_s29 + $0xd0] sm:$0xff] %v1165_v31  ;;  %v788_v44 = vfloor.f32 %v756_v33  ;;  %v645_v57 = vadd.s32 32, %v1615_v22  ;;  %v518_v43 = vadd.f32 1.0, %v1449_v54  ;;  %v733_v51 = vcvt.s32.f32 %v701_v47 }
  0xc9   : > { %v915_v41 = vfloor.f32 %v883_v19  ;;  %v451_v46 = vmul.f32 1.442695, %v374_v63  ;;  %v764_v13 = vmul.f32 %v1623_v34, %v725_v0  ;;  %v394_v48 = vadd.f32 %v393_v40, %v1653_v25 }
  0xca   : > { %v820_v60 = vmul.f32 256.0, %v788_v44  ;;  %v678_v12 = vadd.s32 %v1618_v26, %v645_v57  ;;  %v1451_v3 = vpop.eup %1450  ;;  %1456 = vrcp.f32 %v518_v43  ;;  %v772_v8 = vmul.f32 %v1623_v34, %v733_v51 }
  0xcb   : > { %v947_v28 = vmul.f32 16.0, %v915_v41  ;;  %v1077_v15 = vmul.f32 %v1659_v29, %v915_v41  ;;  %v526_v2 = vadd.f32 1.0, %v1451_v3  ;;  %v796_v11 = vfloor.f32 %v764_v13 }
  0xcc   : > { %v852_v49 = vsub.f32 %v717_v39, %v820_v60  ;;  %1458 = vpow2.f32 %v451_v46  ;;  %v1453_v37 = vpop.eup %1452  ;;  %v804_v24 = vfloor.f32 %v772_v8  ;;  %v710_v10 = vcvt.s32.f32 %v678_v12  ;;  %v413_v46 = vpop.f32.mrf.mxu2 }
  0xcd   : > { %v979_v50 = vsub.f32 %v844_v32, %v947_v28  ;;  %v467_v35 = vmul.f32 1.442695, %v394_v48  ;;  %v1455_v18 = vpop.eup %1454  ;;  %v574_v23 = vsub.f32 1.0, %v1453_v37  ;;  %1460 = vrcp.f32 %v526_v2 }
  0xce   : > { %v891_v53 = vmul.f32 %v1634_v56, %v852_v49  ;;  %v828_v27 = vmul.f32 256.0, %v796_v11  ;;  %v534_v59 = vadd.f32 1.0, %v1455_v18  ;;  %v836_v42 = vmul.f32 256.0, %v804_v24 }
  0xcf   : > { %v1012_v14 = vmul.f32 %v1648_v17, %v979_v50  ;;  %v749_v61 = vmul.f32 %v1623_v34, %v710_v10  ;;  %v610_v62 = vsel %vm1732_vm4, %v1447_v5, %v574_v23  ;;  %1462 = vpow2.f32 %v467_v35 }
  0xd0   : > { %v923_v36 = vfloor.f32 %v891_v53  ;;  %v860_v20 = vsub.f32 %v725_v0, %v828_v27  ;;  %v1457_v1 = vpop.eup %1456  ;;  %1464 = vrcp.f32 %v534_v59  ;;  %v868_v9 = vsub.f32 %v733_v51, %v836_v42 }
  0xd1   : > { %v1044_v7 = vadd.f32 %v1012_v14, %v610_v62  ;;  %v781_v52 = vfloor.f32 %v749_v61  ;;  %v582_v30 = vsub.f32 1.0, %v1457_v1  ;;  %v653_v47 = vadd.s32 96, %v1615_v22 }
  0xd2   : > { %v1459_v39 = vpop.eup %1458  ;;  %v955_v6 = vmul.f32 16.0, %v923_v36  ;;  %v1085_v58 = vmul.f32 %v1659_v29, %v923_v36  ;;  %v899_v45 = vmul.f32 %v1634_v56, %v860_v20  ;;  %v907_v32 = vmul.f32 %v1634_v56, %v868_v9  ;;  %v433_v36 = vpop.f32.mrf.mxu3 }
  0xd3   : > { %v1109_v21 = vadd.f32 %v1077_v15, %v1044_v7  ;;  %v511_v31 = vadd.f32 1.0, %v1459_v39  ;;  %v813_v5 = vmul.f32 256.0, %v781_v52  ;;  %v1461_v33 = vpop.eup %1460  ;;  %v618_v38 = vsel %vm1732_vm4, %v1449_v54, %v582_v30 }
  0xd4   : > { %v987_v16 = vsub.f32 %v852_v49, %v955_v6  ;;  %v931_v19 = vfloor.f32 %v899_v45  ;;  %v590_v40 = vsub.f32 1.0, %v1461_v33  ;;  %v939_v44 = vfloor.f32 %v907_v32 }
  0xd5   : > { %v1142_v63 = vmul.f32 %v1679_v55, %v1109_v21  ;;  %1466 = vrcp.f32 %v511_v31  ;;  %v1463_v0 = vpop.eup %1462  ;;  %v845_v51 = vsub.f32 %v710_v10, %v813_v5  ;;  %v686_v11 = vadd.s32 %v1618_v26, %v653_v47  ;;  %v375_v31 = vpop.f32.mrf.mxu0 }
  0xd6   : > { %v1020_v57 = vmul.f32 %v1648_v17, %v987_v16  ;;  %v963_v41 = vmul.f32 16.0, %v931_v19  ;;  %v1093_v43 = vmul.f32 %v1659_v29, %v931_v19  ;;  %v1465_v60 = vpop.eup %1464  ;;  %v626_v54 = vsel %vm1732_vm4, %v1451_v3, %v590_v40 }
  0xd7   : > { %1174 = vst [vmem:[%s1807_s29 + $0x18] sm:$0xff] %v1142_v63  ;;  %v971_v13 = vmul.f32 16.0, %v939_v44  ;;  %v1101_v12 = vmul.f32 %v1659_v29, %v939_v44  ;;  %v519_v48 = vadd.f32 1.0, %v1463_v0  ;;  %v598_v8 = vsub.f32 1.0, %v1465_v60 }
  0xd8   : > { %v1052_v28 = vadd.f32 %v1020_v57, %v618_v38  ;;  %v995_v15 = vsub.f32 %v860_v20, %v963_v41  ;;  %v884_v49 = vmul.f32 %v1634_v56, %v845_v51  ;;  %v414_v37 = vadd.f32 %v413_v46, %v1653_v25 }
  0xd9   : > { %v1003_v2 = vsub.f32 %v868_v9, %v971_v13  ;;  %1468 = vrcp.f32 %v519_v48  ;;  %v634_v3 = vsel %vm1732_vm4, %v1455_v18, %v598_v8  ;;  %v718_v53 = vcvt.s32.f32 %v686_v11 }
  0xda   : > { %v1117_v50 = vadd.f32 %v1085_v58, %v1052_v28  ;;  %v1028_v24 = vmul.f32 %v1648_v17, %v995_v15  ;;  %v916_v10 = vfloor.f32 %v884_v49  ;;  %v483_v27 = vmul.f32 1.442695, %v414_v37 }
  0xdb   : > { %v1467_v35 = vpop.eup %1466  ;;  %v1036_v23 = vmul.f32 %v1648_v17, %v1003_v2  ;;  %v661_v14 = vadd.s32 160, %v1615_v22  ;;  %v757_v18 = vmul.f32 %v1623_v34, %v718_v53  ;;  %v434_v21 = vadd.f32 %v433_v36, %v1653_v25  ;;  %v415_v2 = vpop.f32.mrf.mxu2 }
  0xdc   : > { %v1150_v59 = vmul.f32 %v1679_v55, %v1117_v50  ;;  %v1060_v42 = vadd.f32 %v1028_v24, %v626_v54  ;;  %v575_v61 = vsub.f32 1.0, %v1467_v35  ;;  %v948_v62 = vmul.f32 16.0, %v916_v10 }
  0xdd   : > { %v1068_v20 = vadd.f32 %v1036_v23, %v634_v3  ;;  %v1078_v1 = vmul.f32 %v1659_v29, %v916_v10  ;;  %1470 = vpow2.f32 %v483_v27  ;;  %v694_v30 = vadd.s32 %v1618_v26, %v661_v14 }
  0xde   : > { %1182 = vst [vmem:[%s1807_s29 + $0x58] sm:$0xff] %v1150_v59  ;;  %v1125_v7 = vadd.f32 %v1093_v43, %v1060_v42  ;;  %v611_v9 = vsel %vm1732_vm4, %v1459_v39, %v575_v61  ;;  %v980_v52 = vsub.f32 %v845_v51, %v948_v62  ;;  %v789_v45 = vfloor.f32 %v757_v18  ;;  %v395_v43 = vpop.f32.mrf.mxu1 }
  0xdf   : > { %v1469_v6 = vpop.eup %1468  ;;  %v1133_v58 = vadd.f32 %v1101_v12, %v1068_v20  ;;  %v669_v32 = vadd.s32 224, %v1615_v22  ;;  %v726_v16 = vcvt.s32.f32 %v694_v30  ;;  %v499_v47 = vmul.f32 1.442695, %v434_v21 }
  0xe0   : > { %v1158_v5 = vmul.f32 %v1679_v55, %v1125_v7  ;;  %v1013_v33 = vmul.f32 %v1648_v17, %v980_v52  ;;  %v583_v38 = vsub.f32 1.0, %v1469_v6  ;;  %v821_v19 = vmul.f32 256.0, %v789_v45 }
  0xe1   : > { %v1166_v39 = vmul.f32 %v1679_v55, %v1133_v58  ;;  %v702_v63 = vadd.s32 %v1618_v26, %v669_v32  ;;  %v765_v57 = vmul.f32 %v1623_v34, %v726_v16  ;;  %v376_v41 = vadd.f32 %v375_v31, %v1653_v25 }
  0xe2   : > { %1190 = vst [vmem:[%s1807_s29 + $0x98] sm:$0xff] %v1158_v5  ;;  %v1045_v40 = vadd.f32 %v1013_v33, %v611_v9  ;;  %v619_v44 = vsel %vm1732_vm4, %v1463_v0, %v583_v38  ;;  %v853_v46 = vsub.f32 %v718_v53, %v821_v19  ;;  %1472 = vpow2.f32 %v499_v47 }
  0xe3   : > { %v1471_v51 = vpop.eup %1470  ;;  %1198 = vst [vmem:[%s1807_s29 + $0xd8] sm:$0xff] %v1166_v39  ;;  %v734_v60 = vcvt.s32.f32 %v702_v63  ;;  %v646_v54 = vadd.s32 40, %v1615_v22  ;;  %v797_v48 = vfloor.f32 %v765_v57  ;;  %v453_v28 = vmul.f32 1.442695, %v376_v41 }
  0xe4   : > { %v1110_v13 = vadd.f32 %v1078_v1, %v1045_v40  ;;  %v527_v12 = vadd.f32 1.0, %v1471_v51  ;;  %v892_v15 = vmul.f32 %v1634_v56, %v853_v46  ;;  %v396_v49 = vadd.f32 %v395_v43, %v1653_v25 }
  0xe5   : > { %v773_v0 = vmul.f32 %v1623_v34, %v734_v60  ;;  %v679_v8 = vadd.s32 %v1618_v26, %v646_v54  ;;  %v829_v37 = vmul.f32 256.0, %v797_v48  ;;  %v654_v50 = vadd.s32 104, %v1615_v22 }
  0xe6   : > { %v1143_v11 = vmul.f32 %v1679_v55, %v1110_v13  ;;  %1474 = vrcp.f32 %v527_v12  ;;  %v924_v24 = vfloor.f32 %v892_v15  ;;  %v469_v23 = vmul.f32 1.442695, %v396_v49 }
  0xe7   : > { %v805_v3 = vfloor.f32 %v773_v0  ;;  %1476 = vpow2.f32 %v453_v28  ;;  %v711_v10 = vcvt.s32.f32 %v679_v8  ;;  %v861_v35 = vsub.f32 %v726_v16, %v829_v37 }
  0xe8   : > { %1175 = vst [vmem:[%s1807_s29 + $0x20] sm:$0xff] %v1143_v11  ;;  %v687_v53 = vadd.s32 %v1618_v26, %v654_v50  ;;  %v416_v27 = vadd.f32 %v415_v2, %v1653_v25  ;;  %v1473_v14 = vpop.eup %1472  ;;  %v956_v59 = vmul.f32 16.0, %v924_v24  ;;  %v1086_v42 = vmul.f32 %v1659_v29, %v924_v24  ;;  %v435_v11 = vpop.f32.mrf.mxu3 }
  0xe9   : > { %v837_v61 = vmul.f32 256.0, %v805_v3  ;;  %v750_v62 = vmul.f32 %v1623_v34, %v711_v10  ;;  %v900_v36 = vmul.f32 %v1634_v56, %v861_v35  ;;  %v535_v20 = vadd.f32 1.0, %v1473_v14 }
  0xea   : > { %1478 = vpow2.f32 %v469_v23  ;;  %v719_v1 = vcvt.s32.f32 %v687_v53  ;;  %v988_v18 = vsub.f32 %v853_v46, %v956_v59  ;;  %v485_v52 = vmul.f32 1.442695, %v416_v27 }
  0xeb   : > { %v869_v7 = vsub.f32 %v734_v60, %v837_v61  ;;  %v782_v9 = vfloor.f32 %v750_v62  ;;  %v932_v6 = vfloor.f32 %v900_v36  ;;  %1480 = vrcp.f32 %v535_v20 }
  0xec   : > { %v1475_v30 = vpop.eup %1474  ;;  %v758_v58 = vmul.f32 %v1623_v34, %v719_v1  ;;  %v662_v45 = vadd.s32 168, %v1615_v22  ;;  %v1021_v32 = vmul.f32 %v1648_v17, %v988_v18  ;;  %v436_v61 = vadd.f32 %v435_v11, %v1653_v25 }
  0xed   : > { %v1477_v21 = vpop.eup %1476  ;;  %v591_v31 = vsub.f32 1.0, %v1475_v30  ;;  %v908_v5 = vmul.f32 %v1634_v56, %v869_v7  ;;  %v814_v33 = vmul.f32 256.0, %v782_v9  ;;  %v964_v38 = vmul.f32 16.0, %v932_v6 }
  0xee   : > { %v1094_v16 = vmul.f32 %v1659_v29, %v932_v6  ;;  %v512_v39 = vadd.f32 1.0, %v1477_v21  ;;  %v790_v19 = vfloor.f32 %v758_v58  ;;  %v1053_v47 = vadd.f32 %v1021_v32, %v619_v44 }
  0xef   : > { %v627_v63 = vsel %vm1732_vm4, %v1471_v51, %v591_v31  ;;  %v940_v40 = vfloor.f32 %v908_v5  ;;  %v846_v57 = vsub.f32 %v711_v10, %v814_v33  ;;  %v996_v43 = vsub.f32 %v861_v35, %v964_v38 }
  0xf0   : > { %v2004_v41 = vpop.eup %1478  ;;  %1482 = vrcp.f32 %v512_v39  ;;  %v822_v46 = vmul.f32 256.0, %v790_v19  ;;  %v695_v60 = vadd.s32 %v1618_v26, %v662_v45  ;;  %v1118_v54 = vadd.f32 %v1086_v42, %v1053_v47 }
  0xf1   : > { %v972_v13 = vmul.f32 16.0, %v940_v40  ;;  %v1102_v12 = vmul.f32 %v1659_v29, %v940_v40  ;;  %v885_v48 = vmul.f32 %v1634_v56, %v846_v57  ;;  %v1481_v44 = vpop.eup %1480  ;;  %v1029_v28 = vmul.f32 %v1648_v17, %v996_v43 }
  0xf2   : > { %v520_v51 = vadd.f32 1.0, %v2004_v41  ;;  %v854_v15 = vsub.f32 %v719_v1, %v822_v46  ;;  %1484 = vpow2.f32 %v485_v52  ;;  %v1151_v0 = vmul.f32 %v1679_v55, %v1118_v54 }
  0xf3   : > { %v599_v8 = vsub.f32 1.0, %v1481_v44  ;;  %v1004_v49 = vsub.f32 %v869_v7, %v972_v13  ;;  %v917_v2 = vfloor.f32 %v885_v48  ;;  %v1061_v37 = vadd.f32 %v1029_v28, %v627_v63  ;;  %v398_v63 = vpop.f32.mrf.mxu1  ;;  %v418_v28 = vpop.f32.mrf.mxu2 }
  0xf4   : > { %1486 = vrcp.f32 %v520_v51  ;;  %v893_v50 = vmul.f32 %v1634_v56, %v854_v15  ;;  %v727_v24 = vcvt.s32.f32 %v695_v60  ;;  %1183 = vst [vmem:[%s1807_s29 + $0x60] sm:$0xff] %v1151_v0  ;;  %v670_v1 = vadd.s32 232, %v1615_v22 }
  0xf5   : > { %v635_v3 = vsel %vm1732_vm4, %v1473_v14, %v599_v8  ;;  %v1037_v10 = vmul.f32 %v1648_v17, %v1004_v49  ;;  %v949_v35 = vmul.f32 16.0, %v917_v2  ;;  %v1079_v23 = vmul.f32 %v1659_v29, %v917_v2 }
  0xf6   : > { %v1483_v53 = vpop.eup %1482  ;;  %v1126_v27 = vadd.f32 %v1094_v16, %v1061_v37  ;;  %v925_v59 = vfloor.f32 %v893_v50  ;;  %v766_v42 = vmul.f32 %v1623_v34, %v727_v24  ;;  %v501_v33 = vmul.f32 1.442695, %v436_v61  ;;  %v378_v16 = vpop.f32.mrf.mxu0 }
  0xf7   : > { %v1069_v62 = vadd.f32 %v1037_v10, %v635_v3  ;;  %v576_v36 = vsub.f32 1.0, %v1483_v53  ;;  %v981_v20 = vsub.f32 %v846_v57, %v949_v35  ;;  %v703_v38 = vadd.s32 %v1618_v26, %v670_v1 }
  0xf8   : > { %v1485_v18 = vpop.eup %1484  ;;  %v1159_v14 = vmul.f32 %v1679_v55, %v1126_v27  ;;  %v957_v7 = vmul.f32 16.0, %v925_v59  ;;  %v1087_v9 = vmul.f32 %v1659_v29, %v925_v59  ;;  %v798_v52 = vfloor.f32 %v766_v42 }
  0xf9   : > { %v1134_v30 = vadd.f32 %v1102_v12, %v1069_v62  ;;  %v612_v6 = vsel %vm1732_vm4, %v1477_v21, %v576_v36  ;;  %v1014_v58 = vmul.f32 %v1648_v17, %v981_v20  ;;  %v528_v45 = vadd.f32 1.0, %v1485_v18  ;;  %v438_v62 = vpop.f32.mrf.mxu3 }
  0xfa   : > { %v1487_v32 = vpop.eup %1486  ;;  %1191 = vst [vmem:[%s1807_s29 + $0xa0] sm:$0xff] %v1159_v14  ;;  %v989_v31 = vsub.f32 %v854_v15, %v957_v7  ;;  %v830_v5 = vmul.f32 256.0, %v798_v52  ;;  %v735_v57 = vcvt.s32.f32 %v703_v38  ;;  %v379_v60 = vadd.f32 %v378_v16, %v1653_v25 }
  0xfb   : > { %v1167_v39 = vmul.f32 %v1679_v55, %v1134_v30  ;;  %v1046_v19 = vadd.f32 %v1014_v58, %v612_v6  ;;  %v584_v47 = vsub.f32 1.0, %v1487_v32  ;;  %1488 = vrcp.f32 %v528_v45 }
  0xfc   : > { %v1022_v21 = vmul.f32 %v1648_v17, %v989_v31  ;;  %v862_v40 = vsub.f32 %v727_v24, %v830_v5  ;;  %1490 = vpow2.f32 %v501_v33  ;;  %v647_v54 = vadd.s32 48, %v1615_v22 }
  0xfd   : > { %1199 = vst [vmem:[%s1807_s29 + $0xe0] sm:$0xff] %v1167_v39  ;;  %v1111_v43 = vadd.f32 %v1079_v23, %v1046_v19  ;;  %v620_v46 = vsel %vm1732_vm4, %v2004_v41, %v584_v47  ;;  %v774_v48 = vmul.f32 %v1623_v34, %v735_v57  ;;  %v399_v44 = vadd.f32 %v398_v63, %v1653_v25 }
  0xfe   : > { %v1054_v13 = vadd.f32 %v1022_v21, %v620_v46  ;;  %v901_v12 = vmul.f32 %v1634_v56, %v862_v40  ;;  %v455_v15 = vmul.f32 1.442695, %v379_v60  ;;  %v680_v0 = vadd.s32 %v1618_v26, %v647_v54 }
  0xff   : > { %v1144_v51 = vmul.f32 %v1679_v55, %v1111_v43  ;;  %v655_v41 = vadd.s32 112, %v1615_v22  ;;  %v806_v2 = vfloor.f32 %v774_v48  ;;  %v471_v11 = vmul.f32 1.442695, %v399_v44 }
 0x100   : > { %v1119_v8 = vadd.f32 %v1087_v9, %v1054_v13  ;;  %v933_v49 = vfloor.f32 %v901_v12  ;;  %1492 = vpow2.f32 %v455_v15  ;;  %v712_v50 = vcvt.s32.f32 %v680_v0 }
 0x101   : > { %v1489_v37 = vpop.eup %1488  ;;  %1176 = vst [vmem:[%s1807_s29 + $0x28] sm:$0xff] %v1144_v51  ;;  %v688_v24 = vadd.s32 %v1618_v26, %v655_v41  ;;  %v419_v3 = vadd.f32 %v418_v28, %v1653_v25  ;;  %v838_v42 = vmul.f32 256.0, %v806_v2  ;;  %1494 = vpow2.f32 %v471_v11  ;;  %v380_v2 = vpop.f32.mrf.mxu0 }
 0x102   : > { %v1491_v10 = vpop.eup %1490  ;;  %v1152_v35 = vmul.f32 %v1679_v55, %v1119_v8  ;;  %v592_v23 = vsub.f32 1.0, %v1489_v37  ;;  %v965_v53 = vmul.f32 16.0, %v933_v49  ;;  %v1095_v27 = vmul.f32 %v1659_v29, %v933_v49 }
 0x103   : > { %v536_v59 = vadd.f32 1.0, %v1491_v10  ;;  %v751_v61 = vmul.f32 %v1623_v34, %v712_v50  ;;  %v720_v1 = vcvt.s32.f32 %v688_v24  ;;  %v487_v14 = vmul.f32 1.442695, %v419_v3 }
 0x104   : > { %1184 = vst [vmem:[%s1807_s29 + $0x68] sm:$0xff] %v1152_v35  ;;  %v628_v36 = vsel %vm1732_vm4, %v1485_v18, %v592_v23  ;;  %v997_v20 = vsub.f32 %v862_v40, %v965_v53  ;;  %v870_v7 = vsub.f32 %v735_v57, %v838_v42  ;;  %v663_v52 = vadd.s32 176, %v1615_v22 }
 0x105   : > { %1496 = vrcp.f32 %v536_v59  ;;  %v783_v9 = vfloor.f32 %v751_v61  ;;  %v759_v6 = vmul.f32 %v1623_v34, %v720_v1  ;;  %v439_v58 = vadd.f32 %v438_v62, %v1653_v25 }
 0x106   : > { %v1030_v30 = vmul.f32 %v1648_v17, %v997_v20  ;;  %1498 = vpow2.f32 %v487_v14  ;;  %v1493_v45 = vpop.eup %1492  ;;  %v909_v32 = vmul.f32 %v1634_v56, %v870_v7  ;;  %v696_v18 = vadd.s32 %v1618_v26, %v663_v52 }
 0x107   : > { %v815_v31 = vmul.f32 256.0, %v783_v9  ;;  %v671_v5 = vadd.s32 240, %v1615_v22  ;;  %v513_v38 = vadd.f32 1.0, %v1493_v45  ;;  %v791_v16 = vfloor.f32 %v759_v6  ;;  %v1495_v19 = vpop.eup %1494 }
 0x108   : > { %v1062_v33 = vadd.f32 %v1030_v30, %v628_v36  ;;  %v503_v39 = vmul.f32 1.442695, %v439_v58  ;;  %v941_v47 = vfloor.f32 %v909_v32  ;;  %v728_v21 = vcvt.s32.f32 %v696_v18 }
 0x109   : > { %v847_v63 = vsub.f32 %v712_v50, %v815_v31  ;;  %v704_v40 = vadd.s32 %v1618_v26, %v671_v5  ;;  %1500 = vrcp.f32 %v513_v38  ;;  %v521_v43 = vadd.f32 1.0, %v1495_v19  ;;  %v400_v38 = vpop.f32.mrf.mxu1 }
 0x10a   : > { %v1127_v57 = vadd.f32 %v1095_v27, %v1062_v33  ;;  %v823_v46 = vmul.f32 256.0, %v791_v16  ;;  %v973_v54 = vmul.f32 16.0, %v941_v47  ;;  %v1103_v13 = vmul.f32 %v1659_v29, %v941_v47 }
 0x10b   : > { %v1497_v60 = vpop.eup %1496  ;;  %v886_v12 = vmul.f32 %v1634_v56, %v847_v63  ;;  %v767_v48 = vmul.f32 %v1623_v34, %v728_v21  ;;  %1502 = vrcp.f32 %v521_v43  ;;  %v736_v50 = vcvt.s32.f32 %v704_v40 }
 0x10c   : > { %v1499_v44 = vpop.eup %1498  ;;  %v1160_v28 = vmul.f32 %v1679_v55, %v1127_v57  ;;  %v600_v51 = vsub.f32 1.0, %v1497_v60  ;;  %v855_v15 = vsub.f32 %v720_v1, %v823_v46  ;;  %v1005_v0 = vsub.f32 %v870_v7, %v973_v54 }
 0x10d   : > { %v918_v41 = vfloor.f32 %v886_v12  ;;  %v529_v8 = vadd.f32 1.0, %v1499_v44  ;;  %v799_v49 = vfloor.f32 %v767_v48  ;;  %1504 = vpow2.f32 %v503_v39 }
 0x10e   : > { %1192 = vst [vmem:[%s1807_s29 + $0xa8] sm:$0xff] %v1160_v28  ;;  %v636_v11 = vsel %vm1732_vm4, %v1491_v10, %v600_v51  ;;  %v894_v37 = vmul.f32 %v1634_v56, %v855_v15  ;;  %v1038_v24 = vmul.f32 %v1648_v17, %v1005_v0  ;;  %v775_v59 = vmul.f32 %v1623_v34, %v736_v50  ;;  %v420_v28 = vpop.f32.mrf.mxu2 }
 0x10f   : > { %v950_v3 = vmul.f32 16.0, %v918_v41  ;;  %v1080_v35 = vmul.f32 %v1659_v29, %v918_v41  ;;  %1506 = vrcp.f32 %v529_v8  ;;  %v1501_v23 = vpop.eup %1500  ;;  %v831_v27 = vmul.f32 256.0, %v799_v49 }
 0x110   : > { %v926_v53 = vfloor.f32 %v894_v37  ;;  %v381_v42 = vadd.f32 %v380_v2, %v1653_v25  ;;  %v1070_v61 = vadd.f32 %v1038_v24, %v636_v11  ;;  %v577_v62 = vsub.f32 1.0, %v1501_v23  ;;  %v440_v23 = vpop.f32.mrf.mxu3 }
 0x111   : > { %v982_v10 = vsub.f32 %v847_v63, %v950_v3  ;;  %v648_v36 = vadd.s32 56, %v1615_v22  ;;  %v1503_v20 = vpop.eup %1502  ;;  %v863_v7 = vsub.f32 %v728_v21, %v831_v27  ;;  %v807_v9 = vfloor.f32 %v775_v59 }
 0x112   : > { %v958_v1 = vmul.f32 16.0, %v926_v53  ;;  %v1088_v14 = vmul.f32 %v1659_v29, %v926_v53  ;;  %v1135_v52 = vadd.f32 %v1103_v13, %v1070_v61  ;;  %v613_v30 = vsel %vm1732_vm4, %v1493_v45, %v577_v62 }
 0x113   : > { %v1015_v6 = vmul.f32 %v1648_v17, %v982_v10  ;;  %v585_v58 = vsub.f32 1.0, %v1503_v20  ;;  %v1505_v32 = vpop.eup %1504  ;;  %v902_v18 = vmul.f32 %v1634_v56, %v863_v7  ;;  %v839_v5 = vmul.f32 256.0, %v807_v9 }
 0x114   : > { %v990_v31 = vsub.f32 %v855_v15, %v958_v1  ;;  %v457_v33 = vmul.f32 1.442695, %v381_v42  ;;  %v1168_v39 = vmul.f32 %v1679_v55, %v1135_v52  ;;  %v537_v21 = vadd.f32 1.0, %v1505_v32 }
 0x115   : > { %v1507_v16 = vpop.eup %1506  ;;  %v1047_v47 = vadd.f32 %v1015_v6, %v613_v30  ;;  %v621_v63 = vsel %vm1732_vm4, %v1495_v19, %v585_v58  ;;  %v934_v57 = vfloor.f32 %v902_v18  ;;  %v871_v43 = vsub.f32 %v736_v50, %v839_v5 }
 0x116   : > { %v1023_v45 = vmul.f32 %v1648_v17, %v990_v31  ;;  %v593_v40 = vsub.f32 1.0, %v1507_v16  ;;  %1200 = vst [vmem:[%s1807_s29 + $0xe8] sm:$0xff] %v1168_v39  ;;  %1508 = vrcp.f32 %v537_v21  ;;  %v681_v60 = vadd.s32 %v1618_v26, %v648_v36 }
 0x117   : > { %v1112_v46 = vadd.f32 %v1080_v35, %v1047_v47  ;;  %v401_v54 = vadd.f32 %v400_v38, %v1653_v25  ;;  %v966_v48 = vmul.f32 16.0, %v934_v57  ;;  %v1096_v19 = vmul.f32 %v1659_v29, %v934_v57 }
 0x118   : > { %v1055_v13 = vadd.f32 %v1023_v45, %v621_v63  ;;  %v629_v12 = vsel %vm1732_vm4, %v1499_v44, %v593_v40  ;;  %v910_v15 = vmul.f32 %v1634_v56, %v871_v43  ;;  %1510 = vpow2.f32 %v457_v33 }
 0x119   : > { %v1145_v51 = vmul.f32 %v1679_v55, %v1112_v46  ;;  %v713_v0 = vcvt.s32.f32 %v681_v60  ;;  %v998_v8 = vsub.f32 %v863_v7, %v966_v48  ;;  %v473_v49 = vmul.f32 1.442695, %v401_v54 }
 0x11a   : > { %v1120_v41 = vadd.f32 %v1088_v14, %v1055_v13  ;;  %v656_v2 = vadd.s32 120, %v1615_v22  ;;  %v942_v11 = vfloor.f32 %v910_v15  ;;  %v421_v37 = vadd.f32 %v420_v28, %v1653_v25 }
 0x11b   : > { %1177 = vst [vmem:[%s1807_s29 + $0x30] sm:$0xff] %v1145_v51  ;;  %v752_v44 = vmul.f32 %v1623_v34, %v713_v0  ;;  %v664_v50 = vadd.s32 184, %v1615_v22  ;;  %v1031_v3 = vmul.f32 %v1648_v17, %v998_v8  ;;  %1512 = vpow2.f32 %v473_v49 }
 0x11c   : > { %v1153_v24 = vmul.f32 %v1679_v55, %v1120_v41  ;;  %v689_v35 = vadd.s32 %v1618_v26, %v656_v2  ;;  %v1509_v53 = vpop.eup %1508  ;;  %v974_v27 = vmul.f32 16.0, %v942_v11  ;;  %v1104_v59 = vmul.f32 %v1659_v29, %v942_v11 }
 0x11d   : > { %v784_v42 = vfloor.f32 %v752_v44  ;;  %v489_v61 = vmul.f32 1.442695, %v421_v37  ;;  %v1063_v62 = vadd.f32 %v1031_v3, %v629_v12  ;;  %v601_v10 = vsub.f32 1.0, %v1509_v53 }
 0x11e   : > { %1185 = vst [vmem:[%s1807_s29 + $0x70] sm:$0xff] %v1153_v24  ;;  %v721_v36 = vcvt.s32.f32 %v689_v35  ;;  %v697_v20 = vadd.s32 %v1618_v26, %v664_v50  ;;  %v1511_v1 = vpop.eup %1510  ;;  %v1006_v14 = vsub.f32 %v871_v43, %v974_v27  ;;  %v441_v9 = vadd.f32 %v440_v23, %v1653_v25 }
 0x11f   : > { %v816_v7 = vmul.f32 256.0, %v784_v42  ;;  %1514 = vpow2.f32 %v489_v61  ;;  %v1128_v52 = vadd.f32 %v1096_v19, %v1063_v62  ;;  %v637_v30 = vsel %vm1732_vm4, %v1505_v32, %v601_v10 }
 0x120   : > { %v514_v6 = vadd.f32 1.0, %v1511_v1  ;;  %v760_v58 = vmul.f32 %v1623_v34, %v721_v36  ;;  %v1039_v31 = vmul.f32 %v1648_v17, %v1006_v14  ;;  %v729_v5 = vcvt.s32.f32 %v697_v20 }
 0x121   : > { %v848_v18 = vsub.f32 %v713_v0, %v816_v7  ;;  %v505_v33 = vmul.f32 1.442695, %v441_v9  ;;  %v1513_v38 = vpop.eup %1512  ;;  %v1161_v16 = vmul.f32 %v1679_v55, %v1128_v52  ;;  %v672_v25 = vadd.s32 248, %v1615_v22 }
 0x122   : > { %1516 = vrcp.f32 %v514_v6  ;;  %v792_v39 = vfloor.f32 %v760_v58  ;;  %v1071_v47 = vadd.f32 %v1039_v31, %v637_v30  ;;  %v522_v32 = vadd.f32 1.0, %v1513_v38 }
 0x123   : > { %v887_v63 = vmul.f32 %v1634_v56, %v848_v18  ;;  %v768_v21 = vmul.f32 %v1623_v34, %v729_v5  ;;  %1193 = vst [vmem:[%s1807_s29 + $0xb0] sm:$0xff] %v1161_v16  ;;  %1518 = vpow2.f32 %v505_v33  ;;  %v705_v40 = vadd.s32 %v1618_v26, %v672_v25 }
 0x124   : > { %v824_v45 = vmul.f32 256.0, %v792_v39  ;;  %v1136_v43 = vadd.f32 %v1104_v59, %v1071_v47  ;;  %1520 = vrcp.f32 %v522_v32 }
 0x125   : > { %v1515_v57 = vpop.eup %1514  ;;  %v919_v46 = vfloor.f32 %v887_v63  ;;  %v800_v60 = vfloor.f32 %v768_v21  ;;  %v737_v22 = vcvt.s32.f32 %v705_v40 }
 0x126   : > { %v856_v54 = vsub.f32 %v721_v36, %v824_v45  ;;  %v530_v13 = vadd.f32 1.0, %v1515_v57  ;;  %v1169_v12 = vmul.f32 %v1679_v55, %v1136_v43 }
 0x127   : > { %v951_v48 = vmul.f32 16.0, %v919_v46  ;;  %v832_v19 = vmul.f32 256.0, %v800_v60  ;;  %v776_v15 = vmul.f32 %v1623_v34, %v737_v22  ;;  %v1081_v49 = vmul.f32 %v1659_v29, %v919_v46 }
 0x128   : > { %v1517_v28 = vpop.eup %1516  ;;  %v895_v51 = vmul.f32 %v1634_v56, %v856_v54  ;;  %1522 = vrcp.f32 %v530_v13  ;;  %1201 = vst [vmem:[%s1807_s29 + $0xf0] sm:$0xff] %v1169_v12 }
 0x129   : > { %v578_v26 = vsub.f32 1.0, %v1517_v28  ;;  %v983_v0 = vsub.f32 %v848_v18, %v951_v48  ;;  %v864_v41 = vsub.f32 %v729_v5, %v832_v19  ;;  %v1519_v8 = vpop.eup %1518  ;;  %v808_v11 = vfloor.f32 %v776_v15 }
 0x12a   : > { %v927_v2 = vfloor.f32 %v895_v51  ;;  %v1521_v44 = vpop.eup %1520  ;;  %v538_v3 = vadd.f32 1.0, %v1519_v8 }
 0x12b   : > { %v614_v37 = vsel %vm1732_vm4, %v1511_v1, %v578_v26  ;;  %v1016_v50 = vmul.f32 %v1648_v17, %v983_v0  ;;  %v903_v24 = vmul.f32 %v1634_v56, %v864_v41  ;;  %v586_v35 = vsub.f32 1.0, %v1521_v44 }
 0x12c   : > { %v959_v34 = vmul.f32 16.0, %v927_v2  ;;  %v840_v23 = vmul.f32 256.0, %v808_v11  ;;  %1524 = vrcp.f32 %v538_v3  ;;  %v1089_v14 = vmul.f32 %v1659_v29, %v927_v2 }
 0x12d   : > { %v1048_v53 = vadd.f32 %v1016_v50, %v614_v37  ;;  %v935_v27 = vfloor.f32 %v903_v24  ;;  %v622_v10 = vsel %vm1732_vm4, %v1513_v38, %v586_v35 }
 0x12e   : > { %v1523_v59 = vpop.eup %1522  ;;  %v991_v42 = vsub.f32 %v856_v54, %v959_v34  ;;  %v872_v61 = vsub.f32 %v737_v22, %v840_v23 }
 0x12f   : > { %v1113_v62 = vadd.f32 %v1081_v49, %v1048_v53  ;;  %v594_v36 = vsub.f32 1.0, %v1523_v59  ;;  %v967_v20 = vmul.f32 16.0, %v935_v27  ;;  %v1097_v5 = vmul.f32 %v1659_v29, %v935_v27 }
 0x130   : > { %v1024_v1 = vmul.f32 %v1648_v17, %v991_v42  ;;  %v911_v7 = vmul.f32 %v1634_v56, %v872_v61 }
 0x131   : > { %v1146_v9 = vmul.f32 %v1679_v55, %v1113_v62  ;;  %v999_v52 = vsub.f32 %v864_v41, %v967_v20  ;;  %v630_v6 = vsel %vm1732_vm4, %v1515_v57, %v594_v36 }
 0x132   : > { %v1056_v30 = vadd.f32 %v1024_v1, %v622_v10  ;;  %v943_v58 = vfloor.f32 %v911_v7  ;;  %v1525_v31 = vpop.eup %1524 }
 0x133   : > { %1178 = vst [vmem:[%s1807_s29 + $0x38] sm:$0xff] %v1146_v9  ;;  %v1032_v18 = vmul.f32 %v1648_v17, %v999_v52  ;;  %v602_v38 = vsub.f32 1.0, %v1525_v31 }
 0x134   : > { %v1121_v33 = vadd.f32 %v1089_v14, %v1056_v30  ;;  %v975_v56 = vmul.f32 16.0, %v943_v58  ;;  %v1105_v21 = vmul.f32 %v1659_v29, %v943_v58 }
 0x135   : > { %v1064_v16 = vadd.f32 %v1032_v18, %v630_v6  ;;  %v638_v63 = vsel %vm1732_vm4, %v1519_v8, %v602_v38 }
 0x136   : > { %v1154_v39 = vmul.f32 %v1679_v55, %v1121_v33  ;;  %v1007_v25 = vsub.f32 %v872_v61, %v975_v56 }
 0x137   : > { %v1129_v47 = vadd.f32 %v1097_v5, %v1064_v16 }
 0x138   : > { %1186 = vst [vmem:[%s1807_s29 + $0x78] sm:$0xff] %v1154_v39  ;;  %v1040_v32 = vmul.f32 %v1648_v17, %v1007_v25 }
 0x139   : > { %v1162_v45 = vmul.f32 %v1679_v55, %v1129_v47 }
 0x13a   : > { %v1072_v40 = vadd.f32 %v1040_v32, %v638_v63 }
 0x13b   : > { %1194 = vst [vmem:[%s1807_s29 + $0xb8] sm:$0xff] %v1162_v45 }
 0x13c   : > { %v1137_v57 = vadd.f32 %v1105_v21, %v1072_v40 }
 0x13e   : > { %v1170_v43 = vmul.f32 %v1679_v55, %v1137_v57 }
 0x140   : > { %1202 = vst [vmem:[%s1807_s29 + $0xf8] sm:$0xff] %v1170_v43 }
 0x141 PF: > { %s13_s12 = sadd.s32 1, %s1532_s12  }
 0x142   : > { %p10_p4 = scmp.ge.s32.totalorder %s13_s12, 4  }
 0x144   :  { %12 = sbr.rel (!%p10_p4) target bundleno = 1 (0x1), region = 62 }

</bundles_post_ra>
